<compile_context>
chip_gen: v5e
topology: v5e:2x2
jax: 0.10.0
libtpu: 0.0.40
codegen_flags: <defaults>
</compile_context>

<pallas_src>
import functools

import jax
import jax.numpy as jnp
from jax.experimental import pallas as pl
from jax.experimental.pallas import tpu as pltpu


def _round_up(x, m):
    return (x + m - 1) // m * m


# ----------------------------------------------------------------------------
# Pallas kernel: one (Cout-tile c, image n, row-block j) grid step
# ----------------------------------------------------------------------------
def _wsconv3x3_kernel(body_ref, h0_ref, h1_ref, w_ref, b_ref, o_ref,
                      win_ref, acc_ref, *, th, wp, w_out, cin, op_dtype):
    n_rows = th + 2
    win_rows = n_rows * wp
    m = th * wp

    # ---- stage the (th+2)-row halo window as a flat (win_rows, Cin) slab (dw = 0) ----
    for r in range(th):
        win_ref[0, r * wp:(r + 1) * wp, :] = body_ref[0, r]
    win_ref[0, th * wp:(th + 1) * wp, :] = h0_ref[0, 0]
    win_ref[0, (th + 1) * wp:, :] = h1_ref[0, 0]

    # ---- column-pre-shifted copies (dw = 1, 2): every tap slice below then starts at
    #      a multiple-of-8 sublane offset, so no per-tap misaligned re-layout is needed.
    #      The one/two trailing rows only ever feed cropped (never-stored) columns; they
    #      are zeroed for determinism.
    win_ref[1, :win_rows - 1, :] = win_ref[0, 1:, :]
    win_ref[1, win_rows - 1:, :] = jnp.zeros((1, cin), op_dtype)
    win_ref[2, :win_rows - 2, :] = win_ref[0, 2:, :]
    win_ref[2, win_rows - 2:, :] = jnp.zeros((2, cin), op_dtype)

    # ---- 9 shifted GEMMs, accumulated in an f32 VMEM accumulator (MRB-friendly) ----
    first = True
    for dh in range(3):
        base = dh * wp                                   # multiple of 8 (wp % 8 == 0)
        for dw in range(3):
            xs = win_ref[dw, base:base + m, :]           # (m, Cin), aligned slice
            contrib = jnp.dot(xs, w_ref[dh * 3 + dw],    # (Cin, tn)
                              preferred_element_type=jnp.float32)
            if first:
                acc_ref[...] = contrib
                first = False
            else:
                acc_ref[...] += contrib

    # ---- bias add + store only the W real output columns (lane-dense channels) ----
    bias = b_ref[...]                                    # (1, tn) f32
    for r in range(th):
        o_ref[0, r] = (acc_ref[r * wp:r * wp + w_out, :] + bias).astype(o_ref.dtype)


# ----------------------------------------------------------------------------
# NHWC core
# ----------------------------------------------------------------------------
def wsconv2d_nhwc(x_nhwc, weight, bias, *, gain=2, k_s=3, block_rows=32, tn=None,
                  operand_dtype=jnp.bfloat16, out_dtype=jnp.float32,
                  vmem_limit_bytes=48 * 1024 * 1024):
    assert k_s == 3, "kernel is specialized to the module's 3x3 / stride 1 / pad 1 conv"
    N, H, W, Cin = x_nhwc.shape
    Cout = weight.shape[0]
    # NOTE: matches the module's exact precedence: ((gain / Cin) * k^2) ** 0.5
    scale = float((gain / Cin * k_s ** 2) ** 0.5)

    op_dtype = jnp.dtype(operand_dtype) if operand_dtype is not None else x_nhwc.dtype
    out_dtype = jnp.dtype(out_dtype)
    op_size, out_size = op_dtype.itemsize, out_dtype.itemsize

    Coutp = _round_up(Cout, 128)                 # lane-dense output channels
    Wp = _round_up(W + 2, 8)                     # padded width, sublane aligned

    # Cout tile width: hold the whole weight tensor VMEM-resident when it fits (it does
    # for every ProGAN layer in bf16) -> weights DMA'd exactly once for the whole grid.
    if tn is None:
        if 2 * 9 * Cin * Coutp * op_size <= 12 * 1024 * 1024:
            tn = Coutp
        elif Coutp % 256 == 0:
            tn = 256                             # v6e / v7x MXU-width-friendly fallback
        else:
            tn = 128
    tn = min(tn, Coutp)
    assert Coutp % tn == 0
    c_tiles = Coutp // tn

    # Output rows per grid step: as large as the VMEM budget allows.
    th = max(1, min(block_rows, H))
    budget = int(vmem_limit_bytes * 0.8)
    while th > 8:
        est = (3 * (th + 2) * Wp * Cin * op_size      # 3 shifted windows
               + th * Wp * tn * 4                     # f32 accumulator
               + 2 * th * Wp * Cin * op_size          # body block (double buffered)
               + 4 * Wp * Cin * op_size               # halo rows
               + 2 * 9 * Cin * tn * op_size           # weights
               + 2 * th * W * tn * out_size)          # output block
        if est <= budget:
            break
        th //= 2
    th = max(1, min(th, H))

    Hq = _round_up(H, th)
    hb = Hq // th
    m = th * Wp
    win_rows = (th + 2) * Wp

    # NHWC zero padding: 1 top / (Hq-H)+1 bottom rows, 1 left / (Wp-W-1) right cols.
    x_pad = jnp.pad(x_nhwc, ((0, 0), (1, Hq - H + 1), (1, Wp - W - 1), (0, 0)))
    x_pad = x_pad.astype(op_dtype)

    # Fold scale into the (tiny) weights: (Cout,Cin,3,3) -> (9, Cin, Coutp).
    w_taps = (jnp.transpose(weight, (2, 3, 1, 0)) * scale).reshape(k_s * k_s, Cin, Cout)
    w_taps = jnp.pad(w_taps, ((0, 0), (0, 0), (0, Coutp - Cout))).astype(op_dtype)
    b_row = jnp.pad(bias, (0, Coutp - Cout)).reshape(1, Coutp).astype(jnp.float32)

    kernel = functools.partial(_wsconv3x3_kernel, th=th, wp=Wp, w_out=W,
                               cin=Cin, op_dtype=op_dtype)

    out = pl.pallas_call(
        kernel,
        out_shape=jax.ShapeDtypeStruct((N, Hq, W, Coutp), out_dtype),
        grid_spec=pltpu.PrefetchScalarGridSpec(
            num_scalar_prefetch=0,
            # Cout tile OUTERMOST: the weight block index only changes c_tiles times in
            # total (usually once), instead of once per (n, row-block) step.
            grid=(c_tiles, N, hb),
            in_specs=[
                # body rows of the halo window: one (th, Wp, Cin) block
                pl.BlockSpec((1, th, Wp, Cin), lambda c, n, j: (n, j, 0, 0)),
                # two single-row halo blocks (padded rows j*th+th and j*th+th+1)
                pl.BlockSpec((1, 1, Wp, Cin), lambda c, n, j: (n, j * th + th, 0, 0)),
                pl.BlockSpec((1, 1, Wp, Cin), lambda c, n, j: (n, j * th + th + 1, 0, 0)),
                # scaled weight taps + bias (constant across n, j -> fetched once per c)
                pl.BlockSpec((k_s * k_s, Cin, tn), lambda c, n, j: (0, 0, c)),
                pl.BlockSpec((1, tn), lambda c, n, j: (0, c)),
            ],
            out_specs=pl.BlockSpec((1, th, W, tn), lambda c, n, j: (n, j, 0, c)),
            scratch_shapes=[
                pltpu.VMEM((3, win_rows, Cin), op_dtype),   # dw = 0,1,2 shifted windows
                pltpu.VMEM((m, tn), jnp.float32),           # f32 accumulator
            ],
        ),
        compiler_params=pltpu.CompilerParams(
            dimension_semantics=("arbitrary", "parallel", "parallel"),
            vmem_limit_bytes=vmem_limit_bytes,
        ),
    )(x_pad, x_pad, x_pad, w_taps, b_row)

    # Rows H..Hq-1 and channels Cout..Coutp-1 are padding; width needs no crop anymore.
    return out[:, :H, :, :Cout]


# ----------------------------------------------------------------------------
# Public NCHW interface matching the PyTorch module
# ----------------------------------------------------------------------------
def wsconv2d_forward(x_nchw, weight, bias, **kwargs):
    # TODO(synk): a full-NHWC model would drop both transposes (and the channel crop)
    # and keep the output lane-dense end to end; kept here for the NCHW module contract.
    x_nhwc = jnp.transpose(x_nchw, (0, 2, 3, 1))
    y_nhwc = wsconv2d_nhwc(x_nhwc, weight, bias, **kwargs)
    return jnp.transpose(y_nhwc, (0, 3, 1, 2))


# ----------------------------------------------------------------------------
# Pure-JAX references (correctness checks)
# ----------------------------------------------------------------------------
def wsconv2d_reference(x, weight, bias, *, gain=2, k_s=3, operand_dtype=None):
    Cin = x.shape[1]
    scale = (gain / Cin * k_s ** 2) ** 0.5       # module precedence
    if operand_dtype is None:
        xx, ww = x * scale, weight               # exactly the module: conv(x*scale, W)
    else:
        # mimic the kernel's quantization: scale folded into weights, operands cast
        xx = x.astype(operand_dtype).astype(jnp.float32)
        ww = (weight * scale).astype(operand_dtype).astype(jnp.float32)
    y = jax.lax.conv_general_dilated(
        xx, ww, window_strides=(1, 1), padding=((1, 1), (1, 1)),
        dimension_numbers=("NCHW", "OIHW", "NCHW"),
        precision=jax.lax.Precision.HIGHEST)
    return y + bias.reshape(1, -1, 1, 1)


if __name__ == "__main__":
    key = jax.random.PRNGKey(0)

    # Small shapes consistent with the module.
    N, Cin, H, W = 2, 4, 16, 16
    Cout = 8

    kx, kw_ = jax.random.split(key)
    x = jax.random.normal(kx, (N, Cin, H, W), dtype=jnp.float32)
    # Deterministic parameter init mirroring the module:
    #   nn.init.normal_(weight);  nn.init.constant_(bias, 0)
    weight = jax.random.normal(kw_, (Cout, Cin, 3, 3), dtype=jnp.float32)
    bias = jnp.zeros((Cout,), dtype=jnp.float32)

    # 1) f32-operand path vs. exact f32 reference (tight tolerance).
    fwd_f32 = jax.jit(functools.partial(wsconv2d_forward, operand_dtype=jnp.float32))
    out32 = jax.block_until_ready(fwd_f32(x, weight, bias))
    ref32 = jax.block_until_ready(wsconv2d_reference(x, weight, bias))
    assert out32.shape == (N, Cout, H, W)
    err32 = float(jnp.max(jnp.abs(out32 - ref32)))
    assert jnp.allclose(out32, ref32, atol=1e-3, rtol=1e-3), f"f32 max abs err {err32}"

    # 2) default bf16-operand path (f32 accumulation) vs. identically-quantized reference.
    fwd_bf16 = jax.jit(wsconv2d_forward)
    out16 = jax.block_until_ready(fwd_bf16(x, weight, bias))
    ref16 = jax.block_until_ready(
        wsconv2d_reference(x, weight, bias, operand_dtype=jnp.bfloat16))
    err16 = float(jnp.max(jnp.abs(out16 - ref16)))
    assert jnp.allclose(out16, ref16, atol=1e-2, rtol=1e-2), f"bf16 max abs err {err16}"

    print("KERNEL_OK")
</pallas_src>

<mosaic_0001>
module attributes {stable_mosaic.version = 11 : i64} {
  func.func @_wsconv3x3_kernel(%arg0: i32, %arg1: i32, %arg2: i32, %arg3: memref<1x16x24x4xf32, #tpu.memory_space<vmem>>, %arg4: memref<1x1x24x4xf32, #tpu.memory_space<vmem>>, %arg5: memref<1x1x24x4xf32, #tpu.memory_space<vmem>>, %arg6: memref<9x4x128xf32, #tpu.memory_space<vmem>>, %arg7: memref<1x128xf32, #tpu.memory_space<vmem>>, %arg8: memref<1x16x16x128xf32, #tpu.memory_space<vmem>>, %arg9: memref<3x432x4xf32, #tpu.memory_space<vmem>>, %arg10: memref<384x128xf32, #tpu.memory_space<vmem>>) attributes {dimension_semantics = [#tpu.dimension_semantics<arbitrary>, #tpu.dimension_semantics<parallel>, #tpu.dimension_semantics<parallel>], iteration_bounds = array<i64: 1, 2, 1>, scalar_prefetch = 0 : i64, scratch_operands = 2 : i64, tpu.core_type = #tpu.core_type<tc>, window_params = [{transform_indices = @transform_0, window_bounds = array<i64: 1, 16, 24, 4>}, {transform_indices = @transform_1, window_bounds = array<i64: 1, 1, 24, 4>}, {transform_indices = @transform_2, window_bounds = array<i64: 1, 1, 24, 4>}, {transform_indices = @transform_3, window_bounds = array<i64: 9, 4, 128>}, {transform_indices = @transform_4, window_bounds = array<i64: 1, 128>}, {transform_indices = @transform_5, window_bounds = array<i64: 1, 16, 16, 128>}]} {
    %c0 = arith.constant 0 : index
    %c0_0 = arith.constant 0 : index
    %c0_1 = arith.constant 0 : index
    %c0_2 = arith.constant 0 : index
    %0 = vector.load %arg3[%c0, %c0_0, %c0_1, %c0_2] : memref<1x16x24x4xf32, #tpu.memory_space<vmem>>, vector<1x1x24x4xf32>
    %1 = vector.shape_cast %0 : vector<1x1x24x4xf32> to vector<24x4xf32>
    %c0_3 = arith.constant 0 : index
    %c0_4 = arith.constant 0 : index
    %c0_5 = arith.constant 0 : index
    %2 = vector.load %arg9[%c0_3, %c0_4, %c0_5] : memref<3x432x4xf32, #tpu.memory_space<vmem>>, vector<1x24x4xf32>
    %3 = vector.shape_cast %2 : vector<1x24x4xf32> to vector<24x4xf32>
    %4 = vector.shape_cast %1 : vector<24x4xf32> to vector<1x24x4xf32>
    tpu.vector_store %arg9[%c0_3, %c0_4, %c0_5], %4 {strides = array<i32>} : memref<3x432x4xf32, #tpu.memory_space<vmem>>, vector<1x24x4xf32>,
    %c0_6 = arith.constant 0 : index
    %c1 = arith.constant 1 : index
    %c0_7 = arith.constant 0 : index
    %c0_8 = arith.constant 0 : index
    %5 = vector.load %arg3[%c0_6, %c1, %c0_7, %c0_8] : memref<1x16x24x4xf32, #tpu.memory_space<vmem>>, vector<1x1x24x4xf32>
    %6 = vector.shape_cast %5 : vector<1x1x24x4xf32> to vector<24x4xf32>
    %c0_9 = arith.constant 0 : index
    %c24 = arith.constant 24 : index
    %c0_10 = arith.constant 0 : index
    %7 = vector.load %arg9[%c0_9, %c24, %c0_10] : memref<3x432x4xf32, #tpu.memory_space<vmem>>, vector<1x24x4xf32>
    %8 = vector.shape_cast %7 : vector<1x24x4xf32> to vector<24x4xf32>
    %9 = vector.shape_cast %6 : vector<24x4xf32> to vector<1x24x4xf32>
    tpu.vector_store %arg9[%c0_9, %c24, %c0_10], %9 {strides = array<i32>} : memref<3x432x4xf32, #tpu.memory_space<vmem>>, vector<1x24x4xf32>,
    %c0_11 = arith.constant 0 : index
    %c2 = arith.constant 2 : index
    %c0_12 = arith.constant 0 : index
    %c0_13 = arith.constant 0 : index
    %10 = vector.load %arg3[%c0_11, %c2, %c0_12, %c0_13] : memref<1x16x24x4xf32, #tpu.memory_space<vmem>>, vector<1x1x24x4xf32>
    %11 = vector.shape_cast %10 : vector<1x1x24x4xf32> to vector<24x4xf32>
    %c0_14 = arith.constant 0 : index
    %c48 = arith.constant 48 : index
    %c0_15 = arith.constant 0 : index
    %12 = vector.load %arg9[%c0_14, %c48, %c0_15] : memref<3x432x4xf32, #tpu.memory_space<vmem>>, vector<1x24x4xf32>
    %13 = vector.shape_cast %12 : vector<1x24x4xf32> to vector<24x4xf32>
    %14 = vector.shape_cast %11 : vector<24x4xf32> to vector<1x24x4xf32>
    tpu.vector_store %arg9[%c0_14, %c48, %c0_15], %14 {strides = array<i32>} : memref<3x432x4xf32, #tpu.memory_space<vmem>>, vector<1x24x4xf32>,
    %c0_16 = arith.constant 0 : index
    %c3 = arith.constant 3 : index
    %c0_17 = arith.constant 0 : index
    %c0_18 = arith.constant 0 : index
    %15 = vector.load %arg3[%c0_16, %c3, %c0_17, %c0_18] : memref<1x16x24x4xf32, #tpu.memory_space<vmem>>, vector<1x1x24x4xf32>
    %16 = vector.shape_cast %15 : vector<1x1x24x4xf32> to vector<24x4xf32>
    %c0_19 = arith.constant 0 : index
    %c72 = arith.constant 72 : index
    %c0_20 = arith.constant 0 : index
    %17 = vector.load %arg9[%c0_19, %c72, %c0_20] : memref<3x432x4xf32, #tpu.memory_space<vmem>>, vector<1x24x4xf32>
    %18 = vector.shape_cast %17 : vector<1x24x4xf32> to vector<24x4xf32>
    %19 = vector.shape_cast %16 : vector<24x4xf32> to vector<1x24x4xf32>
    tpu.vector_store %arg9[%c0_19, %c72, %c0_20], %19 {strides = array<i32>} : memref<3x432x4xf32, #tpu.memory_space<vmem>>, vector<1x24x4xf32>,
    %c0_21 = arith.constant 0 : index
    %c4 = arith.constant 4 : index
    %c0_22 = arith.constant 0 : index
    %c0_23 = arith.constant 0 : index
    %20 = vector.load %arg3[%c0_21, %c4, %c0_22, %c0_23] : memref<1x16x24x4xf32, #tpu.memory_space<vmem>>, vector<1x1x24x4xf32>
    %21 = vector.shape_cast %20 : vector<1x1x24x4xf32> to vector<24x4xf32>
    %c0_24 = arith.constant 0 : index
    %c96 = arith.constant 96 : index
    %c0_25 = arith.constant 0 : index
    %22 = vector.load %arg9[%c0_24, %c96, %c0_25] : memref<3x432x4xf32, #tpu.memory_space<vmem>>, vector<1x24x4xf32>
    %23 = vector.shape_cast %22 : vector<1x24x4xf32> to vector<24x4xf32>
    %24 = vector.shape_cast %21 : vector<24x4xf32> to vector<1x24x4xf32>
    tpu.vector_store %arg9[%c0_24, %c96, %c0_25], %24 {strides = array<i32>} : memref<3x432x4xf32, #tpu.memory_space<vmem>>, vector<1x24x4xf32>,
    %c0_26 = arith.constant 0 : index
    %c5 = arith.constant 5 : index
    %c0_27 = arith.constant 0 : index
    %c0_28 = arith.constant 0 : index
    %25 = vector.load %arg3[%c0_26, %c5, %c0_27, %c0_28] : memref<1x16x24x4xf32, #tpu.memory_space<vmem>>, vector<1x1x24x4xf32>
    %26 = vector.shape_cast %25 : vector<1x1x24x4xf32> to vector<24x4xf32>
    %c0_29 = arith.constant 0 : index
    %c120 = arith.constant 120 : index
    %c0_30 = arith.constant 0 : index
    %27 = vector.load %arg9[%c0_29, %c120, %c0_30] : memref<3x432x4xf32, #tpu.memory_space<vmem>>, vector<1x24x4xf32>
    %28 = vector.shape_cast %27 : vector<1x24x4xf32> to vector<24x4xf32>
    %29 = vector.shape_cast %26 : vector<24x4xf32> to vector<1x24x4xf32>
    tpu.vector_store %arg9[%c0_29, %c120, %c0_30], %29 {strides = array<i32>} : memref<3x432x4xf32, #tpu.memory_space<vmem>>, vector<1x24x4xf32>,
    %c0_31 = arith.constant 0 : index
    %c6 = arith.constant 6 : index
    %c0_32 = arith.constant 0 : index
    %c0_33 = arith.constant 0 : index
    %30 = vector.load %arg3[%c0_31, %c6, %c0_32, %c0_33] : memref<1x16x24x4xf32, #tpu.memory_space<vmem>>, vector<1x1x24x4xf32>
    %31 = vector.shape_cast %30 : vector<1x1x24x4xf32> to vector<24x4xf32>
    %c0_34 = arith.constant 0 : index
    %c144 = arith.constant 144 : index
    %c0_35 = arith.constant 0 : index
    %32 = vector.load %arg9[%c0_34, %c144, %c0_35] : memref<3x432x4xf32, #tpu.memory_space<vmem>>, vector<1x24x4xf32>
    %33 = vector.shape_cast %32 : vector<1x24x4xf32> to vector<24x4xf32>
    %34 = vector.shape_cast %31 : vector<24x4xf32> to vector<1x24x4xf32>
    tpu.vector_store %arg9[%c0_34, %c144, %c0_35], %34 {strides = array<i32>} : memref<3x432x4xf32, #tpu.memory_space<vmem>>, vector<1x24x4xf32>,
    %c0_36 = arith.constant 0 : index
    %c7 = arith.constant 7 : index
    %c0_37 = arith.constant 0 : index
    %c0_38 = arith.constant 0 : index
    %35 = vector.load %arg3[%c0_36, %c7, %c0_37, %c0_38] : memref<1x16x24x4xf32, #tpu.memory_space<vmem>>, vector<1x1x24x4xf32>
    %36 = vector.shape_cast %35 : vector<1x1x24x4xf32> to vector<24x4xf32>
    %c0_39 = arith.constant 0 : index
    %c168 = arith.constant 168 : index
    %c0_40 = arith.constant 0 : index
    %37 = vector.load %arg9[%c0_39, %c168, %c0_40] : memref<3x432x4xf32, #tpu.memory_space<vmem>>, vector<1x24x4xf32>
    %38 = vector.shape_cast %37 : vector<1x24x4xf32> to vector<24x4xf32>
    %39 = vector.shape_cast %36 : vector<24x4xf32> to vector<1x24x4xf32>
    tpu.vector_store %arg9[%c0_39, %c168, %c0_40], %39 {strides = array<i32>} : memref<3x432x4xf32, #tpu.memory_space<vmem>>, vector<1x24x4xf32>,
    %c0_41 = arith.constant 0 : index
    %c8 = arith.constant 8 : index
    %c0_42 = arith.constant 0 : index
    %c0_43 = arith.constant 0 : index
    %40 = vector.load %arg3[%c0_41, %c8, %c0_42, %c0_43] : memref<1x16x24x4xf32, #tpu.memory_space<vmem>>, vector<1x1x24x4xf32>
    %41 = vector.shape_cast %40 : vector<1x1x24x4xf32> to vector<24x4xf32>
    %c0_44 = arith.constant 0 : index
    %c192 = arith.constant 192 : index
    %c0_45 = arith.constant 0 : index
    %42 = vector.load %arg9[%c0_44, %c192, %c0_45] : memref<3x432x4xf32, #tpu.memory_space<vmem>>, vector<1x24x4xf32>
    %43 = vector.shape_cast %42 : vector<1x24x4xf32> to vector<24x4xf32>
    %44 = vector.shape_cast %41 : vector<24x4xf32> to vector<1x24x4xf32>
    tpu.vector_store %arg9[%c0_44, %c192, %c0_45], %44 {strides = array<i32>} : memref<3x432x4xf32, #tpu.memory_space<vmem>>, vector<1x24x4xf32>,
    %c0_46 = arith.constant 0 : index
    %c9 = arith.constant 9 : index
    %c0_47 = arith.constant 0 : index
    %c0_48 = arith.constant 0 : index
    %45 = vector.load %arg3[%c0_46, %c9, %c0_47, %c0_48] : memref<1x16x24x4xf32, #tpu.memory_space<vmem>>, vector<1x1x24x4xf32>
    %46 = vector.shape_cast %45 : vector<1x1x24x4xf32> to vector<24x4xf32>
    %c0_49 = arith.constant 0 : index
    %c216 = arith.constant 216 : index
    %c0_50 = arith.constant 0 : index
    %47 = vector.load %arg9[%c0_49, %c216, %c0_50] : memref<3x432x4xf32, #tpu.memory_space<vmem>>, vector<1x24x4xf32>
    %48 = vector.shape_cast %47 : vector<1x24x4xf32> to vector<24x4xf32>
    %49 = vector.shape_cast %46 : vector<24x4xf32> to vector<1x24x4xf32>
    tpu.vector_store %arg9[%c0_49, %c216, %c0_50], %49 {strides = array<i32>} : memref<3x432x4xf32, #tpu.memory_space<vmem>>, vector<1x24x4xf32>,
    %c0_51 = arith.constant 0 : index
    %c10 = arith.constant 10 : index
    %c0_52 = arith.constant 0 : index
    %c0_53 = arith.constant 0 : index
    %50 = vector.load %arg3[%c0_51, %c10, %c0_52, %c0_53] : memref<1x16x24x4xf32, #tpu.memory_space<vmem>>, vector<1x1x24x4xf32>
    %51 = vector.shape_cast %50 : vector<1x1x24x4xf32> to vector<24x4xf32>
    %c0_54 = arith.constant 0 : index
    %c240 = arith.constant 240 : index
    %c0_55 = arith.constant 0 : index
    %52 = vector.load %arg9[%c0_54, %c240, %c0_55] : memref<3x432x4xf32, #tpu.memory_space<vmem>>, vector<1x24x4xf32>
    %53 = vector.shape_cast %52 : vector<1x24x4xf32> to vector<24x4xf32>
    %54 = vector.shape_cast %51 : vector<24x4xf32> to vector<1x24x4xf32>
    tpu.vector_store %arg9[%c0_54, %c240, %c0_55], %54 {strides = array<i32>} : memref<3x432x4xf32, #tpu.memory_space<vmem>>, vector<1x24x4xf32>,
    %c0_56 = arith.constant 0 : index
    %c11 = arith.constant 11 : index
    %c0_57 = arith.constant 0 : index
    %c0_58 = arith.constant 0 : index
    %55 = vector.load %arg3[%c0_56, %c11, %c0_57, %c0_58] : memref<1x16x24x4xf32, #tpu.memory_space<vmem>>, vector<1x1x24x4xf32>
    %56 = vector.shape_cast %55 : vector<1x1x24x4xf32> to vector<24x4xf32>
    %c0_59 = arith.constant 0 : index
    %c264 = arith.constant 264 : index
    %c0_60 = arith.constant 0 : index
    %57 = vector.load %arg9[%c0_59, %c264, %c0_60] : memref<3x432x4xf32, #tpu.memory_space<vmem>>, vector<1x24x4xf32>
    %58 = vector.shape_cast %57 : vector<1x24x4xf32> to vector<24x4xf32>
    %59 = vector.shape_cast %56 : vector<24x4xf32> to vector<1x24x4xf32>
    tpu.vector_store %arg9[%c0_59, %c264, %c0_60], %59 {strides = array<i32>} : memref<3x432x4xf32, #tpu.memory_space<vmem>>, vector<1x24x4xf32>,
    %c0_61 = arith.constant 0 : index
    %c12 = arith.constant 12 : index
    %c0_62 = arith.constant 0 : index
    %c0_63 = arith.constant 0 : index
    %60 = vector.load %arg3[%c0_61, %c12, %c0_62, %c0_63] : memref<1x16x24x4xf32, #tpu.memory_space<vmem>>, vector<1x1x24x4xf32>
    %61 = vector.shape_cast %60 : vector<1x1x24x4xf32> to vector<24x4xf32>
    %c0_64 = arith.constant 0 : index
    %c288 = arith.constant 288 : index
    %c0_65 = arith.constant 0 : index
    %62 = vector.load %arg9[%c0_64, %c288, %c0_65] : memref<3x432x4xf32, #tpu.memory_space<vmem>>, vector<1x24x4xf32>
    %63 = vector.shape_cast %62 : vector<1x24x4xf32> to vector<24x4xf32>
    %64 = vector.shape_cast %61 : vector<24x4xf32> to vector<1x24x4xf32>
    tpu.vector_store %arg9[%c0_64, %c288, %c0_65], %64 {strides = array<i32>} : memref<3x432x4xf32, #tpu.memory_space<vmem>>, vector<1x24x4xf32>,
    %c0_66 = arith.constant 0 : index
    %c13 = arith.constant 13 : index
    %c0_67 = arith.constant 0 : index
    %c0_68 = arith.constant 0 : index
    %65 = vector.load %arg3[%c0_66, %c13, %c0_67, %c0_68] : memref<1x16x24x4xf32, #tpu.memory_space<vmem>>, vector<1x1x24x4xf32>
    %66 = vector.shape_cast %65 : vector<1x1x24x4xf32> to vector<24x4xf32>
    %c0_69 = arith.constant 0 : index
    %c312 = arith.constant 312 : index
    %c0_70 = arith.constant 0 : index
    %67 = vector.load %arg9[%c0_69, %c312, %c0_70] : memref<3x432x4xf32, #tpu.memory_space<vmem>>, vector<1x24x4xf32>
    %68 = vector.shape_cast %67 : vector<1x24x4xf32> to vector<24x4xf32>
    %69 = vector.shape_cast %66 : vector<24x4xf32> to vector<1x24x4xf32>
    tpu.vector_store %arg9[%c0_69, %c312, %c0_70], %69 {strides = array<i32>} : memref<3x432x4xf32, #tpu.memory_space<vmem>>, vector<1x24x4xf32>,
    %c0_71 = arith.constant 0 : index
    %c14 = arith.constant 14 : index
    %c0_72 = arith.constant 0 : index
    %c0_73 = arith.constant 0 : index
    %70 = vector.load %arg3[%c0_71, %c14, %c0_72, %c0_73] : memref<1x16x24x4xf32, #tpu.memory_space<vmem>>, vector<1x1x24x4xf32>
    %71 = vector.shape_cast %70 : vector<1x1x24x4xf32> to vector<24x4xf32>
    %c0_74 = arith.constant 0 : index
    %c336 = arith.constant 336 : index
    %c0_75 = arith.constant 0 : index
    %72 = vector.load %arg9[%c0_74, %c336, %c0_75] : memref<3x432x4xf32, #tpu.memory_space<vmem>>, vector<1x24x4xf32>
    %73 = vector.shape_cast %72 : vector<1x24x4xf32> to vector<24x4xf32>
    %74 = vector.shape_cast %71 : vector<24x4xf32> to vector<1x24x4xf32>
    tpu.vector_store %arg9[%c0_74, %c336, %c0_75], %74 {strides = array<i32>} : memref<3x432x4xf32, #tpu.memory_space<vmem>>, vector<1x24x4xf32>,
    %c0_76 = arith.constant 0 : index
    %c15 = arith.constant 15 : index
    %c0_77 = arith.constant 0 : index
    %c0_78 = arith.constant 0 : index
    %75 = vector.load %arg3[%c0_76, %c15, %c0_77, %c0_78] : memref<1x16x24x4xf32, #tpu.memory_space<vmem>>, vector<1x1x24x4xf32>
    %76 = vector.shape_cast %75 : vector<1x1x24x4xf32> to vector<24x4xf32>
    %c0_79 = arith.constant 0 : index
    %c360 = arith.constant 360 : index
    %c0_80 = arith.constant 0 : index
    %77 = vector.load %arg9[%c0_79, %c360, %c0_80] : memref<3x432x4xf32, #tpu.memory_space<vmem>>, vector<1x24x4xf32>
    %78 = vector.shape_cast %77 : vector<1x24x4xf32> to vector<24x4xf32>
    %79 = vector.shape_cast %76 : vector<24x4xf32> to vector<1x24x4xf32>
    tpu.vector_store %arg9[%c0_79, %c360, %c0_80], %79 {strides = array<i32>} : memref<3x432x4xf32, #tpu.memory_space<vmem>>, vector<1x24x4xf32>,
    %c0_81 = arith.constant 0 : index
    %c0_82 = arith.constant 0 : index
    %c0_83 = arith.constant 0 : index
    %c0_84 = arith.constant 0 : index
    %80 = vector.load %arg4[%c0_81, %c0_82, %c0_83, %c0_84] : memref<1x1x24x4xf32, #tpu.memory_space<vmem>>, vector<1x1x24x4xf32>
    %81 = vector.shape_cast %80 : vector<1x1x24x4xf32> to vector<24x4xf32>
    %c0_85 = arith.constant 0 : index
    %c384 = arith.constant 384 : index
    %c0_86 = arith.constant 0 : index
    %82 = vector.load %arg9[%c0_85, %c384, %c0_86] : memref<3x432x4xf32, #tpu.memory_space<vmem>>, vector<1x24x4xf32>
    %83 = vector.shape_cast %82 : vector<1x24x4xf32> to vector<24x4xf32>
    %84 = vector.shape_cast %81 : vector<24x4xf32> to vector<1x24x4xf32>
    tpu.vector_store %arg9[%c0_85, %c384, %c0_86], %84 {strides = array<i32>} : memref<3x432x4xf32, #tpu.memory_space<vmem>>, vector<1x24x4xf32>,
    %c0_87 = arith.constant 0 : index
    %c0_88 = arith.constant 0 : index
    %c0_89 = arith.constant 0 : index
    %c0_90 = arith.constant 0 : index
    %85 = vector.load %arg5[%c0_87, %c0_88, %c0_89, %c0_90] : memref<1x1x24x4xf32, #tpu.memory_space<vmem>>, vector<1x1x24x4xf32>
    %86 = vector.shape_cast %85 : vector<1x1x24x4xf32> to vector<24x4xf32>
    %c0_91 = arith.constant 0 : index
    %c408 = arith.constant 408 : index
    %c0_92 = arith.constant 0 : index
    %87 = vector.load %arg9[%c0_91, %c408, %c0_92] : memref<3x432x4xf32, #tpu.memory_space<vmem>>, vector<1x24x4xf32>
    %88 = vector.shape_cast %87 : vector<1x24x4xf32> to vector<24x4xf32>
    %89 = vector.shape_cast %86 : vector<24x4xf32> to vector<1x24x4xf32>
    tpu.vector_store %arg9[%c0_91, %c408, %c0_92], %89 {strides = array<i32>} : memref<3x432x4xf32, #tpu.memory_space<vmem>>, vector<1x24x4xf32>,
    %c0_93 = arith.constant 0 : index
    %c1_94 = arith.constant 1 : index
    %c0_95 = arith.constant 0 : index
    %90 = vector.load %arg9[%c0_93, %c1_94, %c0_95] : memref<3x432x4xf32, #tpu.memory_space<vmem>>, vector<1x431x4xf32>
    %91 = vector.shape_cast %90 : vector<1x431x4xf32> to vector<431x4xf32>
    %c1_96 = arith.constant 1 : index
    %c0_97 = arith.constant 0 : index
    %c0_98 = arith.constant 0 : index
    %92 = vector.load %arg9[%c1_96, %c0_97, %c0_98] : memref<3x432x4xf32, #tpu.memory_space<vmem>>, vector<1x431x4xf32>
    %93 = vector.shape_cast %92 : vector<1x431x4xf32> to vector<431x4xf32>
    %94 = vector.shape_cast %91 : vector<431x4xf32> to vector<1x431x4xf32>
    tpu.vector_store %arg9[%c1_96, %c0_97, %c0_98], %94 {strides = array<i32>} : memref<3x432x4xf32, #tpu.memory_space<vmem>>, vector<1x431x4xf32>,
    %cst = arith.constant 0.000000e+00 : f32
    %95 = vector.broadcast %cst : f32 to vector<1x4xf32>
    %c1_99 = arith.constant 1 : index
    %c431 = arith.constant 431 : index
    %c0_100 = arith.constant 0 : index
    %96 = vector.load %arg9[%c1_99, %c431, %c0_100] : memref<3x432x4xf32, #tpu.memory_space<vmem>>, vector<1x1x4xf32>
    %97 = vector.shape_cast %96 : vector<1x1x4xf32> to vector<1x4xf32>
    %98 = vector.shape_cast %95 : vector<1x4xf32> to vector<1x1x4xf32>
    tpu.vector_store %arg9[%c1_99, %c431, %c0_100], %98 {strides = array<i32>} : memref<3x432x4xf32, #tpu.memory_space<vmem>>, vector<1x1x4xf32>,
    %c0_101 = arith.constant 0 : index
    %c2_102 = arith.constant 2 : index
    %c0_103 = arith.constant 0 : index
    %99 = vector.load %arg9[%c0_101, %c2_102, %c0_103] : memref<3x432x4xf32, #tpu.memory_space<vmem>>, vector<1x430x4xf32>
    %100 = vector.shape_cast %99 : vector<1x430x4xf32> to vector<430x4xf32>
    %c2_104 = arith.constant 2 : index
    %c0_105 = arith.constant 0 : index
    %c0_106 = arith.constant 0 : index
    %101 = vector.load %arg9[%c2_104, %c0_105, %c0_106] : memref<3x432x4xf32, #tpu.memory_space<vmem>>, vector<1x430x4xf32>
    %102 = vector.shape_cast %101 : vector<1x430x4xf32> to vector<430x4xf32>
    %103 = vector.shape_cast %100 : vector<430x4xf32> to vector<1x430x4xf32>
    tpu.vector_store %arg9[%c2_104, %c0_105, %c0_106], %103 {strides = array<i32>} : memref<3x432x4xf32, #tpu.memory_space<vmem>>, vector<1x430x4xf32>,
    %cst_107 = arith.constant 0.000000e+00 : f32
    %104 = vector.broadcast %cst_107 : f32 to vector<2x4xf32>
    %c2_108 = arith.constant 2 : index
    %c430 = arith.constant 430 : index
    %c0_109 = arith.constant 0 : index
    %105 = vector.load %arg9[%c2_108, %c430, %c0_109] : memref<3x432x4xf32, #tpu.memory_space<vmem>>, vector<1x2x4xf32>
    %106 = vector.shape_cast %105 : vector<1x2x4xf32> to vector<2x4xf32>
    %107 = vector.shape_cast %104 : vector<2x4xf32> to vector<1x2x4xf32>
    tpu.vector_store %arg9[%c2_108, %c430, %c0_109], %107 {strides = array<i32>} : memref<3x432x4xf32, #tpu.memory_space<vmem>>, vector<1x2x4xf32>,
    %c0_110 = arith.constant 0 : index
    %c0_111 = arith.constant 0 : index
    %c0_112 = arith.constant 0 : index
    %108 = vector.load %arg9[%c0_110, %c0_111, %c0_112] : memref<3x432x4xf32, #tpu.memory_space<vmem>>, vector<1x384x4xf32>
    %109 = vector.shape_cast %108 : vector<1x384x4xf32> to vector<384x4xf32>
    %c0_113 = arith.constant 0 : index
    %c0_114 = arith.constant 0 : index
    %c0_115 = arith.constant 0 : index
    %110 = vector.load %arg6[%c0_113, %c0_114, %c0_115] : memref<9x4x128xf32, #tpu.memory_space<vmem>>, vector<1x4x128xf32>
    %111 = vector.shape_cast %110 : vector<1x4x128xf32> to vector<4x128xf32>
    %cst_116 = arith.constant dense<0.000000e+00> : vector<384x128xf32>
    %112 = tpu.matmul %109, %111, %cst_116 {dimension_numbers = #tpu.dot_dimension_numbers<[1], [0], [0], [1], [0, 0, 1, 1], [], []>} : vector<384x4xf32>, vector<4x128xf32>, vector<384x128xf32> -> vector<384x128xf32>
    %c0_117 = arith.constant 0 : index
    %c0_118 = arith.constant 0 : index
    %113 = vector.load %arg10[%c0_117, %c0_118] : memref<384x128xf32, #tpu.memory_space<vmem>>, vector<384x128xf32>
    tpu.vector_store %arg10[%c0_117, %c0_118], %112 {strides = array<i32>} : memref<384x128xf32, #tpu.memory_space<vmem>>, vector<384x128xf32>,
    %c1_119 = arith.constant 1 : index
    %c0_120 = arith.constant 0 : index
    %c0_121 = arith.constant 0 : index
    %114 = vector.load %arg9[%c1_119, %c0_120, %c0_121] : memref<3x432x4xf32, #tpu.memory_space<vmem>>, vector<1x384x4xf32>
    %115 = vector.shape_cast %114 : vector<1x384x4xf32> to vector<384x4xf32>
    %c1_122 = arith.constant 1 : index
    %c0_123 = arith.constant 0 : index
    %c0_124 = arith.constant 0 : index
    %116 = vector.load %arg6[%c1_122, %c0_123, %c0_124] : memref<9x4x128xf32, #tpu.memory_space<vmem>>, vector<1x4x128xf32>
    %117 = vector.shape_cast %116 : vector<1x4x128xf32> to vector<4x128xf32>
    %cst_125 = arith.constant dense<0.000000e+00> : vector<384x128xf32>
    %118 = tpu.matmul %115, %117, %cst_125 {dimension_numbers = #tpu.dot_dimension_numbers<[1], [0], [0], [1], [0, 0, 1, 1], [], []>} : vector<384x4xf32>, vector<4x128xf32>, vector<384x128xf32> -> vector<384x128xf32>
    %c0_126 = arith.constant 0 : index
    %c0_127 = arith.constant 0 : index
    %119 = vector.load %arg10[%c0_126, %c0_127] : memref<384x128xf32, #tpu.memory_space<vmem>>, vector<384x128xf32>
    %120 = arith.addf %119, %118 : vector<384x128xf32>
    %c0_128 = arith.constant 0 : index
    %c0_129 = arith.constant 0 : index
    %121 = vector.load %arg10[%c0_128, %c0_129] : memref<384x128xf32, #tpu.memory_space<vmem>>, vector<384x128xf32>
    tpu.vector_store %arg10[%c0_128, %c0_129], %120 {strides = array<i32>} : memref<384x128xf32, #tpu.memory_space<vmem>>, vector<384x128xf32>,
    %c2_130 = arith.constant 2 : index
    %c0_131 = arith.constant 0 : index
    %c0_132 = arith.constant 0 : index
    %122 = vector.load %arg9[%c2_130, %c0_131, %c0_132] : memref<3x432x4xf32, #tpu.memory_space<vmem>>, vector<1x384x4xf32>
    %123 = vector.shape_cast %122 : vector<1x384x4xf32> to vector<384x4xf32>
    %c2_133 = arith.constant 2 : index
    %c0_134 = arith.constant 0 : index
    %c0_135 = arith.constant 0 : index
    %124 = vector.load %arg6[%c2_133, %c0_134, %c0_135] : memref<9x4x128xf32, #tpu.memory_space<vmem>>, vector<1x4x128xf32>
    %125 = vector.shape_cast %124 : vector<1x4x128xf32> to vector<4x128xf32>
    %cst_136 = arith.constant dense<0.000000e+00> : vector<384x128xf32>
    %126 = tpu.matmul %123, %125, %cst_136 {dimension_numbers = #tpu.dot_dimension_numbers<[1], [0], [0], [1], [0, 0, 1, 1], [], []>} : vector<384x4xf32>, vector<4x128xf32>, vector<384x128xf32> -> vector<384x128xf32>
    %c0_137 = arith.constant 0 : index
    %c0_138 = arith.constant 0 : index
    %127 = vector.load %arg10[%c0_137, %c0_138] : memref<384x128xf32, #tpu.memory_space<vmem>>, vector<384x128xf32>
    %128 = arith.addf %127, %126 : vector<384x128xf32>
    %c0_139 = arith.constant 0 : index
    %c0_140 = arith.constant 0 : index
    %129 = vector.load %arg10[%c0_139, %c0_140] : memref<384x128xf32, #tpu.memory_space<vmem>>, vector<384x128xf32>
    tpu.vector_store %arg10[%c0_139, %c0_140], %128 {strides = array<i32>} : memref<384x128xf32, #tpu.memory_space<vmem>>, vector<384x128xf32>,
    %c0_141 = arith.constant 0 : index
    %c24_142 = arith.constant 24 : index
    %c0_143 = arith.constant 0 : index
    %130 = vector.load %arg9[%c0_141, %c24_142, %c0_143] : memref<3x432x4xf32, #tpu.memory_space<vmem>>, vector<1x384x4xf32>
    %131 = vector.shape_cast %130 : vector<1x384x4xf32> to vector<384x4xf32>
    %c3_144 = arith.constant 3 : index
    %c0_145 = arith.constant 0 : index
    %c0_146 = arith.constant 0 : index
    %132 = vector.load %arg6[%c3_144, %c0_145, %c0_146] : memref<9x4x128xf32, #tpu.memory_space<vmem>>, vector<1x4x128xf32>
    %133 = vector.shape_cast %132 : vector<1x4x128xf32> to vector<4x128xf32>
    %cst_147 = arith.constant dense<0.000000e+00> : vector<384x128xf32>
    %134 = tpu.matmul %131, %133, %cst_147 {dimension_numbers = #tpu.dot_dimension_numbers<[1], [0], [0], [1], [0, 0, 1, 1], [], []>} : vector<384x4xf32>, vector<4x128xf32>, vector<384x128xf32> -> vector<384x128xf32>
    %c0_148 = arith.constant 0 : index
    %c0_149 = arith.constant 0 : index
    %135 = vector.load %arg10[%c0_148, %c0_149] : memref<384x128xf32, #tpu.memory_space<vmem>>, vector<384x128xf32>
    %136 = arith.addf %135, %134 : vector<384x128xf32>
    %c0_150 = arith.constant 0 : index
    %c0_151 = arith.constant 0 : index
    %137 = vector.load %arg10[%c0_150, %c0_151] : memref<384x128xf32, #tpu.memory_space<vmem>>, vector<384x128xf32>
    tpu.vector_store %arg10[%c0_150, %c0_151], %136 {strides = array<i32>} : memref<384x128xf32, #tpu.memory_space<vmem>>, vector<384x128xf32>,
    %c1_152 = arith.constant 1 : index
    %c24_153 = arith.constant 24 : index
    %c0_154 = arith.constant 0 : index
    %138 = vector.load %arg9[%c1_152, %c24_153, %c0_154] : memref<3x432x4xf32, #tpu.memory_space<vmem>>, vector<1x384x4xf32>
    %139 = vector.shape_cast %138 : vector<1x384x4xf32> to vector<384x4xf32>
    %c4_155 = arith.constant 4 : index
    %c0_156 = arith.constant 0 : index
    %c0_157 = arith.constant 0 : index
    %140 = vector.load %arg6[%c4_155, %c0_156, %c0_157] : memref<9x4x128xf32, #tpu.memory_space<vmem>>, vector<1x4x128xf32>
    %141 = vector.shape_cast %140 : vector<1x4x128xf32> to vector<4x128xf32>
    %cst_158 = arith.constant dense<0.000000e+00> : vector<384x128xf32>
    %142 = tpu.matmul %139, %141, %cst_158 {dimension_numbers = #tpu.dot_dimension_numbers<[1], [0], [0], [1], [0, 0, 1, 1], [], []>} : vector<384x4xf32>, vector<4x128xf32>, vector<384x128xf32> -> vector<384x128xf32>
    %c0_159 = arith.constant 0 : index
    %c0_160 = arith.constant 0 : index
    %143 = vector.load %arg10[%c0_159, %c0_160] : memref<384x128xf32, #tpu.memory_space<vmem>>, vector<384x128xf32>
    %144 = arith.addf %143, %142 : vector<384x128xf32>
    %c0_161 = arith.constant 0 : index
    %c0_162 = arith.constant 0 : index
    %145 = vector.load %arg10[%c0_161, %c0_162] : memref<384x128xf32, #tpu.memory_space<vmem>>, vector<384x128xf32>
    tpu.vector_store %arg10[%c0_161, %c0_162], %144 {strides = array<i32>} : memref<384x128xf32, #tpu.memory_space<vmem>>, vector<384x128xf32>,
    %c2_163 = arith.constant 2 : index
    %c24_164 = arith.constant 24 : index
    %c0_165 = arith.constant 0 : index
    %146 = vector.load %arg9[%c2_163, %c24_164, %c0_165] : memref<3x432x4xf32, #tpu.memory_space<vmem>>, vector<1x384x4xf32>
    %147 = vector.shape_cast %146 : vector<1x384x4xf32> to vector<384x4xf32>
    %c5_166 = arith.constant 5 : index
    %c0_167 = arith.constant 0 : index
    %c0_168 = arith.constant 0 : index
    %148 = vector.load %arg6[%c5_166, %c0_167, %c0_168] : memref<9x4x128xf32, #tpu.memory_space<vmem>>, vector<1x4x128xf32>
    %149 = vector.shape_cast %148 : vector<1x4x128xf32> to vector<4x128xf32>
    %cst_169 = arith.constant dense<0.000000e+00> : vector<384x128xf32>
    %150 = tpu.matmul %147, %149, %cst_169 {dimension_numbers = #tpu.dot_dimension_numbers<[1], [0], [0], [1], [0, 0, 1, 1], [], []>} : vector<384x4xf32>, vector<4x128xf32>, vector<384x128xf32> -> vector<384x128xf32>
    %c0_170 = arith.constant 0 : index
    %c0_171 = arith.constant 0 : index
    %151 = vector.load %arg10[%c0_170, %c0_171] : memref<384x128xf32, #tpu.memory_space<vmem>>, vector<384x128xf32>
    %152 = arith.addf %151, %150 : vector<384x128xf32>
    %c0_172 = arith.constant 0 : index
    %c0_173 = arith.constant 0 : index
    %153 = vector.load %arg10[%c0_172, %c0_173] : memref<384x128xf32, #tpu.memory_space<vmem>>, vector<384x128xf32>
    tpu.vector_store %arg10[%c0_172, %c0_173], %152 {strides = array<i32>} : memref<384x128xf32, #tpu.memory_space<vmem>>, vector<384x128xf32>,
    %c0_174 = arith.constant 0 : index
    %c48_175 = arith.constant 48 : index
    %c0_176 = arith.constant 0 : index
    %154 = vector.load %arg9[%c0_174, %c48_175, %c0_176] : memref<3x432x4xf32, #tpu.memory_space<vmem>>, vector<1x384x4xf32>
    %155 = vector.shape_cast %154 : vector<1x384x4xf32> to vector<384x4xf32>
    %c6_177 = arith.constant 6 : index
    %c0_178 = arith.constant 0 : index
    %c0_179 = arith.constant 0 : index
    %156 = vector.load %arg6[%c6_177, %c0_178, %c0_179] : memref<9x4x128xf32, #tpu.memory_space<vmem>>, vector<1x4x128xf32>
    %157 = vector.shape_cast %156 : vector<1x4x128xf32> to vector<4x128xf32>
    %cst_180 = arith.constant dense<0.000000e+00> : vector<384x128xf32>
    %158 = tpu.matmul %155, %157, %cst_180 {dimension_numbers = #tpu.dot_dimension_numbers<[1], [0], [0], [1], [0, 0, 1, 1], [], []>} : vector<384x4xf32>, vector<4x128xf32>, vector<384x128xf32> -> vector<384x128xf32>
    %c0_181 = arith.constant 0 : index
    %c0_182 = arith.constant 0 : index
    %159 = vector.load %arg10[%c0_181, %c0_182] : memref<384x128xf32, #tpu.memory_space<vmem>>, vector<384x128xf32>
    %160 = arith.addf %159, %158 : vector<384x128xf32>
    %c0_183 = arith.constant 0 : index
    %c0_184 = arith.constant 0 : index
    %161 = vector.load %arg10[%c0_183, %c0_184] : memref<384x128xf32, #tpu.memory_space<vmem>>, vector<384x128xf32>
    tpu.vector_store %arg10[%c0_183, %c0_184], %160 {strides = array<i32>} : memref<384x128xf32, #tpu.memory_space<vmem>>, vector<384x128xf32>,
    %c1_185 = arith.constant 1 : index
    %c48_186 = arith.constant 48 : index
    %c0_187 = arith.constant 0 : index
    %162 = vector.load %arg9[%c1_185, %c48_186, %c0_187] : memref<3x432x4xf32, #tpu.memory_space<vmem>>, vector<1x384x4xf32>
    %163 = vector.shape_cast %162 : vector<1x384x4xf32> to vector<384x4xf32>
    %c7_188 = arith.constant 7 : index
    %c0_189 = arith.constant 0 : index
    %c0_190 = arith.constant 0 : index
    %164 = vector.load %arg6[%c7_188, %c0_189, %c0_190] : memref<9x4x128xf32, #tpu.memory_space<vmem>>, vector<1x4x128xf32>
    %165 = vector.shape_cast %164 : vector<1x4x128xf32> to vector<4x128xf32>
    %cst_191 = arith.constant dense<0.000000e+00> : vector<384x128xf32>
    %166 = tpu.matmul %163, %165, %cst_191 {dimension_numbers = #tpu.dot_dimension_numbers<[1], [0], [0], [1], [0, 0, 1, 1], [], []>} : vector<384x4xf32>, vector<4x128xf32>, vector<384x128xf32> -> vector<384x128xf32>
    %c0_192 = arith.constant 0 : index
    %c0_193 = arith.constant 0 : index
    %167 = vector.load %arg10[%c0_192, %c0_193] : memref<384x128xf32, #tpu.memory_space<vmem>>, vector<384x128xf32>
    %168 = arith.addf %167, %166 : vector<384x128xf32>
    %c0_194 = arith.constant 0 : index
    %c0_195 = arith.constant 0 : index
    %169 = vector.load %arg10[%c0_194, %c0_195] : memref<384x128xf32, #tpu.memory_space<vmem>>, vector<384x128xf32>
    tpu.vector_store %arg10[%c0_194, %c0_195], %168 {strides = array<i32>} : memref<384x128xf32, #tpu.memory_space<vmem>>, vector<384x128xf32>,
    %c2_196 = arith.constant 2 : index
    %c48_197 = arith.constant 48 : index
    %c0_198 = arith.constant 0 : index
    %170 = vector.load %arg9[%c2_196, %c48_197, %c0_198] : memref<3x432x4xf32, #tpu.memory_space<vmem>>, vector<1x384x4xf32>
    %171 = vector.shape_cast %170 : vector<1x384x4xf32> to vector<384x4xf32>
    %c8_199 = arith.constant 8 : index
    %c0_200 = arith.constant 0 : index
    %c0_201 = arith.constant 0 : index
    %172 = vector.load %arg6[%c8_199, %c0_200, %c0_201] : memref<9x4x128xf32, #tpu.memory_space<vmem>>, vector<1x4x128xf32>
    %173 = vector.shape_cast %172 : vector<1x4x128xf32> to vector<4x128xf32>
    %cst_202 = arith.constant dense<0.000000e+00> : vector<384x128xf32>
    %174 = tpu.matmul %171, %173, %cst_202 {dimension_numbers = #tpu.dot_dimension_numbers<[1], [0], [0], [1], [0, 0, 1, 1], [], []>} : vector<384x4xf32>, vector<4x128xf32>, vector<384x128xf32> -> vector<384x128xf32>
    %c0_203 = arith.constant 0 : index
    %c0_204 = arith.constant 0 : index
    %175 = vector.load %arg10[%c0_203, %c0_204] : memref<384x128xf32, #tpu.memory_space<vmem>>, vector<384x128xf32>
    %176 = arith.addf %175, %174 : vector<384x128xf32>
    %c0_205 = arith.constant 0 : index
    %c0_206 = arith.constant 0 : index
    %177 = vector.load %arg10[%c0_205, %c0_206] : memref<384x128xf32, #tpu.memory_space<vmem>>, vector<384x128xf32>
    tpu.vector_store %arg10[%c0_205, %c0_206], %176 {strides = array<i32>} : memref<384x128xf32, #tpu.memory_space<vmem>>, vector<384x128xf32>,
    %c0_207 = arith.constant 0 : index
    %c0_208 = arith.constant 0 : index
    %178 = vector.load %arg7[%c0_207, %c0_208] : memref<1x128xf32, #tpu.memory_space<vmem>>, vector<1x128xf32>
    %c0_209 = arith.constant 0 : index
    %c0_210 = arith.constant 0 : index
    %179 = vector.load %arg10[%c0_209, %c0_210] : memref<384x128xf32, #tpu.memory_space<vmem>>, vector<16x128xf32>
    %180 = vector.broadcast %178 : vector<1x128xf32> to vector<16x128xf32>
    %181 = arith.addf %179, %180 : vector<16x128xf32>
    %c0_211 = arith.constant 0 : index
    %c0_212 = arith.constant 0 : index
    %c0_213 = arith.constant 0 : index
    %c0_214 = arith.constant 0 : index
    %182 = vector.load %arg8[%c0_211, %c0_212, %c0_213, %c0_214] : memref<1x16x16x128xf32, #tpu.memory_space<vmem>>, vector<1x1x16x128xf32>
    %183 = vector.shape_cast %182 : vector<1x1x16x128xf32> to vector<16x128xf32>
    %184 = vector.shape_cast %181 : vector<16x128xf32> to vector<1x1x16x128xf32>
    tpu.vector_store %arg8[%c0_211, %c0_212, %c0_213, %c0_214], %184 {strides = array<i32>} : memref<1x16x16x128xf32, #tpu.memory_space<vmem>>, vector<1x1x16x128xf32>,
    %c24_215 = arith.constant 24 : index
    %c0_216 = arith.constant 0 : index
    %185 = vector.load %arg10[%c24_215, %c0_216] : memref<384x128xf32, #tpu.memory_space<vmem>>, vector<16x128xf32>
    %186 = vector.broadcast %178 : vector<1x128xf32> to vector<16x128xf32>
    %187 = arith.addf %185, %186 : vector<16x128xf32>
    %c0_217 = arith.constant 0 : index
    %c1_218 = arith.constant 1 : index
    %c0_219 = arith.constant 0 : index
    %c0_220 = arith.constant 0 : index
    %188 = vector.load %arg8[%c0_217, %c1_218, %c0_219, %c0_220] : memref<1x16x16x128xf32, #tpu.memory_space<vmem>>, vector<1x1x16x128xf32>
    %189 = vector.shape_cast %188 : vector<1x1x16x128xf32> to vector<16x128xf32>
    %190 = vector.shape_cast %187 : vector<16x128xf32> to vector<1x1x16x128xf32>
    tpu.vector_store %arg8[%c0_217, %c1_218, %c0_219, %c0_220], %190 {strides = array<i32>} : memref<1x16x16x128xf32, #tpu.memory_space<vmem>>, vector<1x1x16x128xf32>,
    %c48_221 = arith.constant 48 : index
    %c0_222 = arith.constant 0 : index
    %191 = vector.load %arg10[%c48_221, %c0_222] : memref<384x128xf32, #tpu.memory_space<vmem>>, vector<16x128xf32>
    %192 = vector.broadcast %178 : vector<1x128xf32> to vector<16x128xf32>
    %193 = arith.addf %191, %192 : vector<16x128xf32>
    %c0_223 = arith.constant 0 : index
    %c2_224 = arith.constant 2 : index
    %c0_225 = arith.constant 0 : index
    %c0_226 = arith.constant 0 : index
    %194 = vector.load %arg8[%c0_223, %c2_224, %c0_225, %c0_226] : memref<1x16x16x128xf32, #tpu.memory_space<vmem>>, vector<1x1x16x128xf32>
    %195 = vector.shape_cast %194 : vector<1x1x16x128xf32> to vector<16x128xf32>
    %196 = vector.shape_cast %193 : vector<16x128xf32> to vector<1x1x16x128xf32>
    tpu.vector_store %arg8[%c0_223, %c2_224, %c0_225, %c0_226], %196 {strides = array<i32>} : memref<1x16x16x128xf32, #tpu.memory_space<vmem>>, vector<1x1x16x128xf32>,
    %c72_227 = arith.constant 72 : index
    %c0_228 = arith.constant 0 : index
    %197 = vector.load %arg10[%c72_227, %c0_228] : memref<384x128xf32, #tpu.memory_space<vmem>>, vector<16x128xf32>
    %198 = vector.broadcast %178 : vector<1x128xf32> to vector<16x128xf32>
    %199 = arith.addf %197, %198 : vector<16x128xf32>
    %c0_229 = arith.constant 0 : index
    %c3_230 = arith.constant 3 : index
    %c0_231 = arith.constant 0 : index
    %c0_232 = arith.constant 0 : index
    %200 = vector.load %arg8[%c0_229, %c3_230, %c0_231, %c0_232] : memref<1x16x16x128xf32, #tpu.memory_space<vmem>>, vector<1x1x16x128xf32>
    %201 = vector.shape_cast %200 : vector<1x1x16x128xf32> to vector<16x128xf32>
    %202 = vector.shape_cast %199 : vector<16x128xf32> to vector<1x1x16x128xf32>
    tpu.vector_store %arg8[%c0_229, %c3_230, %c0_231, %c0_232], %202 {strides = array<i32>} : memref<1x16x16x128xf32, #tpu.memory_space<vmem>>, vector<1x1x16x128xf32>,
    %c96_233 = arith.constant 96 : index
    %c0_234 = arith.constant 0 : index
    %203 = vector.load %arg10[%c96_233, %c0_234] : memref<384x128xf32, #tpu.memory_space<vmem>>, vector<16x128xf32>
    %204 = vector.broadcast %178 : vector<1x128xf32> to vector<16x128xf32>
    %205 = arith.addf %203, %204 : vector<16x128xf32>
    %c0_235 = arith.constant 0 : index
    %c4_236 = arith.constant 4 : index
    %c0_237 = arith.constant 0 : index
    %c0_238 = arith.constant 0 : index
    %206 = vector.load %arg8[%c0_235, %c4_236, %c0_237, %c0_238] : memref<1x16x16x128xf32, #tpu.memory_space<vmem>>, vector<1x1x16x128xf32>
    %207 = vector.shape_cast %206 : vector<1x1x16x128xf32> to vector<16x128xf32>
    %208 = vector.shape_cast %205 : vector<16x128xf32> to vector<1x1x16x128xf32>
    tpu.vector_store %arg8[%c0_235, %c4_236, %c0_237, %c0_238], %208 {strides = array<i32>} : memref<1x16x16x128xf32, #tpu.memory_space<vmem>>, vector<1x1x16x128xf32>,
    %c120_239 = arith.constant 120 : index
    %c0_240 = arith.constant 0 : index
    %209 = vector.load %arg10[%c120_239, %c0_240] : memref<384x128xf32, #tpu.memory_space<vmem>>, vector<16x128xf32>
    %210 = vector.broadcast %178 : vector<1x128xf32> to vector<16x128xf32>
    %211 = arith.addf %209, %210 : vector<16x128xf32>
    %c0_241 = arith.constant 0 : index
    %c5_242 = arith.constant 5 : index
    %c0_243 = arith.constant 0 : index
    %c0_244 = arith.constant 0 : index
    %212 = vector.load %arg8[%c0_241, %c5_242, %c0_243, %c0_244] : memref<1x16x16x128xf32, #tpu.memory_space<vmem>>, vector<1x1x16x128xf32>
    %213 = vector.shape_cast %212 : vector<1x1x16x128xf32> to vector<16x128xf32>
    %214 = vector.shape_cast %211 : vector<16x128xf32> to vector<1x1x16x128xf32>
    tpu.vector_store %arg8[%c0_241, %c5_242, %c0_243, %c0_244], %214 {strides = array<i32>} : memref<1x16x16x128xf32, #tpu.memory_space<vmem>>, vector<1x1x16x128xf32>,
    %c144_245 = arith.constant 144 : index
    %c0_246 = arith.constant 0 : index
    %215 = vector.load %arg10[%c144_245, %c0_246] : memref<384x128xf32, #tpu.memory_space<vmem>>, vector<16x128xf32>
    %216 = vector.broadcast %178 : vector<1x128xf32> to vector<16x128xf32>
    %217 = arith.addf %215, %216 : vector<16x128xf32>
    %c0_247 = arith.constant 0 : index
    %c6_248 = arith.constant 6 : index
    %c0_249 = arith.constant 0 : index
    %c0_250 = arith.constant 0 : index
    %218 = vector.load %arg8[%c0_247, %c6_248, %c0_249, %c0_250] : memref<1x16x16x128xf32, #tpu.memory_space<vmem>>, vector<1x1x16x128xf32>
    %219 = vector.shape_cast %218 : vector<1x1x16x128xf32> to vector<16x128xf32>
    %220 = vector.shape_cast %217 : vector<16x128xf32> to vector<1x1x16x128xf32>
    tpu.vector_store %arg8[%c0_247, %c6_248, %c0_249, %c0_250], %220 {strides = array<i32>} : memref<1x16x16x128xf32, #tpu.memory_space<vmem>>, vector<1x1x16x128xf32>,
    %c168_251 = arith.constant 168 : index
    %c0_252 = arith.constant 0 : index
    %221 = vector.load %arg10[%c168_251, %c0_252] : memref<384x128xf32, #tpu.memory_space<vmem>>, vector<16x128xf32>
    %222 = vector.broadcast %178 : vector<1x128xf32> to vector<16x128xf32>
    %223 = arith.addf %221, %222 : vector<16x128xf32>
    %c0_253 = arith.constant 0 : index
    %c7_254 = arith.constant 7 : index
    %c0_255 = arith.constant 0 : index
    %c0_256 = arith.constant 0 : index
    %224 = vector.load %arg8[%c0_253, %c7_254, %c0_255, %c0_256] : memref<1x16x16x128xf32, #tpu.memory_space<vmem>>, vector<1x1x16x128xf32>
    %225 = vector.shape_cast %224 : vector<1x1x16x128xf32> to vector<16x128xf32>
    %226 = vector.shape_cast %223 : vector<16x128xf32> to vector<1x1x16x128xf32>
    tpu.vector_store %arg8[%c0_253, %c7_254, %c0_255, %c0_256], %226 {strides = array<i32>} : memref<1x16x16x128xf32, #tpu.memory_space<vmem>>, vector<1x1x16x128xf32>,
    %c192_257 = arith.constant 192 : index
    %c0_258 = arith.constant 0 : index
    %227 = vector.load %arg10[%c192_257, %c0_258] : memref<384x128xf32, #tpu.memory_space<vmem>>, vector<16x128xf32>
    %228 = vector.broadcast %178 : vector<1x128xf32> to vector<16x128xf32>
    %229 = arith.addf %227, %228 : vector<16x128xf32>
    %c0_259 = arith.constant 0 : index
    %c8_260 = arith.constant 8 : index
    %c0_261 = arith.constant 0 : index
    %c0_262 = arith.constant 0 : index
    %230 = vector.load %arg8[%c0_259, %c8_260, %c0_261, %c0_262] : memref<1x16x16x128xf32, #tpu.memory_space<vmem>>, vector<1x1x16x128xf32>
    %231 = vector.shape_cast %230 : vector<1x1x16x128xf32> to vector<16x128xf32>
    %232 = vector.shape_cast %229 : vector<16x128xf32> to vector<1x1x16x128xf32>
    tpu.vector_store %arg8[%c0_259, %c8_260, %c0_261, %c0_262], %232 {strides = array<i32>} : memref<1x16x16x128xf32, #tpu.memory_space<vmem>>, vector<1x1x16x128xf32>,
    %c216_263 = arith.constant 216 : index
    %c0_264 = arith.constant 0 : index
    %233 = vector.load %arg10[%c216_263, %c0_264] : memref<384x128xf32, #tpu.memory_space<vmem>>, vector<16x128xf32>
    %234 = vector.broadcast %178 : vector<1x128xf32> to vector<16x128xf32>
    %235 = arith.addf %233, %234 : vector<16x128xf32>
    %c0_265 = arith.constant 0 : index
    %c9_266 = arith.constant 9 : index
    %c0_267 = arith.constant 0 : index
    %c0_268 = arith.constant 0 : index
    %236 = vector.load %arg8[%c0_265, %c9_266, %c0_267, %c0_268] : memref<1x16x16x128xf32, #tpu.memory_space<vmem>>, vector<1x1x16x128xf32>
    %237 = vector.shape_cast %236 : vector<1x1x16x128xf32> to vector<16x128xf32>
    %238 = vector.shape_cast %235 : vector<16x128xf32> to vector<1x1x16x128xf32>
    tpu.vector_store %arg8[%c0_265, %c9_266, %c0_267, %c0_268], %238 {strides = array<i32>} : memref<1x16x16x128xf32, #tpu.memory_space<vmem>>, vector<1x1x16x128xf32>,
    %c240_269 = arith.constant 240 : index
    %c0_270 = arith.constant 0 : index
    %239 = vector.load %arg10[%c240_269, %c0_270] : memref<384x128xf32, #tpu.memory_space<vmem>>, vector<16x128xf32>
    %240 = vector.broadcast %178 : vector<1x128xf32> to vector<16x128xf32>
    %241 = arith.addf %239, %240 : vector<16x128xf32>
    %c0_271 = arith.constant 0 : index
    %c10_272 = arith.constant 10 : index
    %c0_273 = arith.constant 0 : index
    %c0_274 = arith.constant 0 : index
    %242 = vector.load %arg8[%c0_271, %c10_272, %c0_273, %c0_274] : memref<1x16x16x128xf32, #tpu.memory_space<vmem>>, vector<1x1x16x128xf32>
    %243 = vector.shape_cast %242 : vector<1x1x16x128xf32> to vector<16x128xf32>
    %244 = vector.shape_cast %241 : vector<16x128xf32> to vector<1x1x16x128xf32>
    tpu.vector_store %arg8[%c0_271, %c10_272, %c0_273, %c0_274], %244 {strides = array<i32>} : memref<1x16x16x128xf32, #tpu.memory_space<vmem>>, vector<1x1x16x128xf32>,
    %c264_275 = arith.constant 264 : index
    %c0_276 = arith.constant 0 : index
    %245 = vector.load %arg10[%c264_275, %c0_276] : memref<384x128xf32, #tpu.memory_space<vmem>>, vector<16x128xf32>
    %246 = vector.broadcast %178 : vector<1x128xf32> to vector<16x128xf32>
    %247 = arith.addf %245, %246 : vector<16x128xf32>
    %c0_277 = arith.constant 0 : index
    %c11_278 = arith.constant 11 : index
    %c0_279 = arith.constant 0 : index
    %c0_280 = arith.constant 0 : index
    %248 = vector.load %arg8[%c0_277, %c11_278, %c0_279, %c0_280] : memref<1x16x16x128xf32, #tpu.memory_space<vmem>>, vector<1x1x16x128xf32>
    %249 = vector.shape_cast %248 : vector<1x1x16x128xf32> to vector<16x128xf32>
    %250 = vector.shape_cast %247 : vector<16x128xf32> to vector<1x1x16x128xf32>
    tpu.vector_store %arg8[%c0_277, %c11_278, %c0_279, %c0_280], %250 {strides = array<i32>} : memref<1x16x16x128xf32, #tpu.memory_space<vmem>>, vector<1x1x16x128xf32>,
    %c288_281 = arith.constant 288 : index
    %c0_282 = arith.constant 0 : index
    %251 = vector.load %arg10[%c288_281, %c0_282] : memref<384x128xf32, #tpu.memory_space<vmem>>, vector<16x128xf32>
    %252 = vector.broadcast %178 : vector<1x128xf32> to vector<16x128xf32>
    %253 = arith.addf %251, %252 : vector<16x128xf32>
    %c0_283 = arith.constant 0 : index
    %c12_284 = arith.constant 12 : index
    %c0_285 = arith.constant 0 : index
    %c0_286 = arith.constant 0 : index
    %254 = vector.load %arg8[%c0_283, %c12_284, %c0_285, %c0_286] : memref<1x16x16x128xf32, #tpu.memory_space<vmem>>, vector<1x1x16x128xf32>
    %255 = vector.shape_cast %254 : vector<1x1x16x128xf32> to vector<16x128xf32>
    %256 = vector.shape_cast %253 : vector<16x128xf32> to vector<1x1x16x128xf32>
    tpu.vector_store %arg8[%c0_283, %c12_284, %c0_285, %c0_286], %256 {strides = array<i32>} : memref<1x16x16x128xf32, #tpu.memory_space<vmem>>, vector<1x1x16x128xf32>,
    %c312_287 = arith.constant 312 : index
    %c0_288 = arith.constant 0 : index
    %257 = vector.load %arg10[%c312_287, %c0_288] : memref<384x128xf32, #tpu.memory_space<vmem>>, vector<16x128xf32>
    %258 = vector.broadcast %178 : vector<1x128xf32> to vector<16x128xf32>
    %259 = arith.addf %257, %258 : vector<16x128xf32>
    %c0_289 = arith.constant 0 : index
    %c13_290 = arith.constant 13 : index
    %c0_291 = arith.constant 0 : index
    %c0_292 = arith.constant 0 : index
    %260 = vector.load %arg8[%c0_289, %c13_290, %c0_291, %c0_292] : memref<1x16x16x128xf32, #tpu.memory_space<vmem>>, vector<1x1x16x128xf32>
    %261 = vector.shape_cast %260 : vector<1x1x16x128xf32> to vector<16x128xf32>
    %262 = vector.shape_cast %259 : vector<16x128xf32> to vector<1x1x16x128xf32>
    tpu.vector_store %arg8[%c0_289, %c13_290, %c0_291, %c0_292], %262 {strides = array<i32>} : memref<1x16x16x128xf32, #tpu.memory_space<vmem>>, vector<1x1x16x128xf32>,
    %c336_293 = arith.constant 336 : index
    %c0_294 = arith.constant 0 : index
    %263 = vector.load %arg10[%c336_293, %c0_294] : memref<384x128xf32, #tpu.memory_space<vmem>>, vector<16x128xf32>
    %264 = vector.broadcast %178 : vector<1x128xf32> to vector<16x128xf32>
    %265 = arith.addf %263, %264 : vector<16x128xf32>
    %c0_295 = arith.constant 0 : index
    %c14_296 = arith.constant 14 : index
    %c0_297 = arith.constant 0 : index
    %c0_298 = arith.constant 0 : index
    %266 = vector.load %arg8[%c0_295, %c14_296, %c0_297, %c0_298] : memref<1x16x16x128xf32, #tpu.memory_space<vmem>>, vector<1x1x16x128xf32>
    %267 = vector.shape_cast %266 : vector<1x1x16x128xf32> to vector<16x128xf32>
    %268 = vector.shape_cast %265 : vector<16x128xf32> to vector<1x1x16x128xf32>
    tpu.vector_store %arg8[%c0_295, %c14_296, %c0_297, %c0_298], %268 {strides = array<i32>} : memref<1x16x16x128xf32, #tpu.memory_space<vmem>>, vector<1x1x16x128xf32>,
    %c360_299 = arith.constant 360 : index
    %c0_300 = arith.constant 0 : index
    %269 = vector.load %arg10[%c360_299, %c0_300] : memref<384x128xf32, #tpu.memory_space<vmem>>, vector<16x128xf32>
    %270 = vector.broadcast %178 : vector<1x128xf32> to vector<16x128xf32>
    %271 = arith.addf %269, %270 : vector<16x128xf32>
    %c0_301 = arith.constant 0 : index
    %c15_302 = arith.constant 15 : index
    %c0_303 = arith.constant 0 : index
    %c0_304 = arith.constant 0 : index
    %272 = vector.load %arg8[%c0_301, %c15_302, %c0_303, %c0_304] : memref<1x16x16x128xf32, #tpu.memory_space<vmem>>, vector<1x1x16x128xf32>
    %273 = vector.shape_cast %272 : vector<1x1x16x128xf32> to vector<16x128xf32>
    %274 = vector.shape_cast %271 : vector<16x128xf32> to vector<1x1x16x128xf32>
    tpu.vector_store %arg8[%c0_301, %c15_302, %c0_303, %c0_304], %274 {strides = array<i32>} : memref<1x16x16x128xf32, #tpu.memory_space<vmem>>, vector<1x1x16x128xf32>,
    return
  }
  func.func @transform_0(%arg0: i32, %arg1: i32, %arg2: i32) -> (i32, i32, i32, i32) {
    %c0_i32 = arith.constant 0 : i32
    %c0_i32_0 = arith.constant 0 : i32
    %c0_i32_1 = arith.constant 0 : i32
    return %arg1, %arg2, %c0_i32, %c0_i32_0 : i32, i32, i32, i32
  }
  func.func @transform_1(%arg0: i32, %arg1: i32, %arg2: i32) -> (i32, i32, i32, i32) {
    %c16_i32 = arith.constant 16 : i32
    %0 = arith.muli %arg2, %c16_i32 : i32
    %c16_i32_0 = arith.constant 16 : i32
    %1 = arith.addi %0, %c16_i32_0 : i32
    %c0_i32 = arith.constant 0 : i32
    %c0_i32_1 = arith.constant 0 : i32
    %c0_i32_2 = arith.constant 0 : i32
    return %arg1, %1, %c0_i32, %c0_i32_1 : i32, i32, i32, i32
  }
  func.func @transform_2(%arg0: i32, %arg1: i32, %arg2: i32) -> (i32, i32, i32, i32) {
    %c16_i32 = arith.constant 16 : i32
    %0 = arith.muli %arg2, %c16_i32 : i32
    %c16_i32_0 = arith.constant 16 : i32
    %1 = arith.addi %0, %c16_i32_0 : i32
    %c1_i32 = arith.constant 1 : i32
    %2 = arith.addi %1, %c1_i32 : i32
    %c0_i32 = arith.constant 0 : i32
    %c0_i32_1 = arith.constant 0 : i32
    %c0_i32_2 = arith.constant 0 : i32
    return %arg1, %2, %c0_i32, %c0_i32_1 : i32, i32, i32, i32
  }
  func.func @transform_3(%arg0: i32, %arg1: i32, %arg2: i32) -> (i32, i32, i32) {
    %c0_i32 = arith.constant 0 : i32
    %c0_i32_0 = arith.constant 0 : i32
    %c0_i32_1 = arith.constant 0 : i32
    return %c0_i32, %c0_i32_0, %arg0 : i32, i32, i32
  }
  func.func @transform_4(%arg0: i32, %arg1: i32, %arg2: i32) -> (i32, i32) {
    %c0_i32 = arith.constant 0 : i32
    %c0_i32_0 = arith.constant 0 : i32
    return %c0_i32, %arg0 : i32, i32
  }
  func.func @transform_5(%arg0: i32, %arg1: i32, %arg2: i32) -> (i32, i32, i32, i32) {
    %c0_i32 = arith.constant 0 : i32
    %c0_i32_0 = arith.constant 0 : i32
    return %arg1, %arg2, %c0_i32, %arg0 : i32, i32, i32, i32
  }
}

</mosaic_0001>

<bundles_post_ra>
// kernel: wsconv2d_forward.1
= control target key start
LH: loop header
LB: loop body
LE: loop exit
PB: predicated region body
PF: predicated region fallthrough
CT: control target
= control target key end

     0   :  { %s6130_s18 = smov 0   ;;  %s6132_s19 = smov 0   ;;  %s7225_s0 = inlined_call_operand.vmem [shape: f32[2,18,24,4], index: 0, kind: input, shape index: {}, may-alias: {0,1,2}]   ;;  %s7226_s1 = inlined_call_operand.vmem [shape: f32[2,18,24,4], index: 1, kind: input, shape index: {}, may-alias: {0,1,2}]   ;;  %s7227_s2 = inlined_call_operand.vmem [shape: f32[2,18,24,4], index: 2, kind: input, shape index: {}, may-alias: {0,1,2}]   ;;  %s7228_s3 = inlined_call_operand.vmem [shape: f32[9,4,128], index: 3, kind: input, shape index: {}]   ;;  %s7229_s4 = inlined_call_operand.vmem [shape: f32[1,128], index: 4, kind: input, shape index: {}]   ;;  %s7230_s5 = inlined_call_operand.vmem [shape: f32[2,16,16,128], index: 5, kind: output, shape index: {}]  }
   0x1   :  { %s6134_s20 = smov 0  }
   0x2 LB: > { %s30_s21 = sadd.s32 1, %s6093_s19  ;;  %p5505_p0 = scmp.ge.s32.totalorder %s6097_s20, 1  ;;  %s6097_s20 = sphi %s6134_s20, %s15_s20   ;;  %s6093_s19 = sphi %s6132_s19, %s7232_s19   ;;  %s6089_s18 = sphi %s6130_s18, %s7231_s18  }
   0x3   : > { %p32_p1 = scmp.ge.s32.totalorder %s30_s21, 2  ;;  %p293_p2 = scmp.lt.s32.totalorder %s6097_s20, 3 }
   0x5   : > { %s7234_s21 = smov (%p32_p1, %s30_s21), 0  ;;  %p294_p3 = pnand %p5505_p0, %p293_p2 }
   0x6   : > { %p374_p4 = scmp.lt.s32.totalorder (!%p294_p3), %s6089_s18, 1 }
   0x7   : > { %297 = sbr.rel (%p294_p3) target bundleno = 1016 (0x3f8), region = 40 }
   0xc   : > { %v832_v0 = vld [vmem:[%s7228_s3] sm:$0xf]  ;;  %vm977_vm0 = vcmask 1043456   ;;  %v5655_v1 = vld [vmem:[%s7228_s3 + $0x8] sm:$0xf]  ;;  %s7236_s18 = smov (!%p374_p4, %s6089_s18), 1 }
   0xd   : > { %6042 = vmatpush.msk.msra.mxu1 %vm977_vm0, %v832_v0  ;;  %6043 = vmatpush.msk.msra.mxu2 %vm977_vm0, %v832_v0  ;;  %v5705_v2 = vld [vmem:[%s7228_s3 + $0xc] sm:$0xf]  ;;  %v5605_v3 = vld [vmem:[%s7228_s3 + $0x4] sm:$0xf]  ;;  %v5755_v4 = vld [vmem:[%s7228_s3 + $0x10] sm:$0xf] }
   0xe   : > { %6044 = vmatpush.msk.msra.mxu3 %vm977_vm0, %v832_v0  ;;  %s6172_s7 = smul.u32 432, %s7236_s18  ;;  %5556 = vmatpush.msk.msra.mxu0 %vm977_vm0, %v832_v0  ;;  %vm439_vm1 = vcmask 31744   ;;  %s6041_s6 = sshll.u32 %s7236_s18, 8  ;;  %vm668_vm2 = vcmask 30720   ;;  %vm670_vm3 = vcmask 24576   ;;  %vm780_vm4 = vcmask 29696  }
   0xf   : > { %5656 = vmatpush.msk.msrb.mxu2 %vm977_vm0, %v5655_v1  ;;  %5606 = vmatpush.msk.msrb.mxu1 %vm977_vm0, %v5605_v3  ;;  %s6977_s11 = scalar_lea.vmem %s7230_s5, %s6041_s6  ;;  %vm782_vm5 = vcmask 25600  }
  0x10   : > { %5706 = vmatpush.msk.msrb.mxu3 %vm977_vm0, %v5705_v2  ;;  %5756 = vmatpush.msk.msrb.mxu0 %vm977_vm0, %v5755_v4  ;;  %s6180_s10 = scalar_lea.vmem %s7225_s0, %s6172_s7  ;;  %s6038_s23 = sadd.s32 384, %s6172_s7 }
  0x11   : > { %v5520_v5 = vld [vmem:[%s6180_s10 + $0x60] sm:$0xff]  ;;  %v5521_v9 = vld [vmem:[%s6180_s10 + $0x68] sm:$0xff]  ;;  %v5522_v13 = vld [vmem:[%s6180_s10 + $0x70] sm:$0xff]  ;;  %s6786_s26 = scalar_lea.vmem %s7226_s1, %s6038_s23  ;;  %s6040_s27 = sadd.s32 408, %s6172_s7 }
  0x12   : > { %v5532_v6 = vld [vmem:[%s6180_s10 + $0xc0] sm:$0xff]  ;;  %468 = vst.msk [vmem:[#allocation2 + $0x60] sm:$0xff] %vm439_vm1, %v5520_v5  ;;  %v5533_v10 = vld [vmem:[%s6180_s10 + $0xc8] sm:$0xff]  ;;  %v5534_v14 = vld [vmem:[%s6180_s10 + $0xd0] sm:$0xff]  ;;  %s6822_s30 = scalar_lea.vmem %s7227_s2, %s6040_s27 }
  0x13   : > { %v5544_v7 = vld [vmem:[%s6180_s10 + $0x120] sm:$0xff]  ;;  %496 = vst.msk [vmem:[#allocation2 + $0xc0] sm:$0xff] %vm439_vm1, %v5532_v6  ;;  %v5545_v11 = vld [vmem:[%s6180_s10 + $0x128] sm:$0xff]  ;;  %v5546_v16 = vld [vmem:[%s6180_s10 + $0x130] sm:$0xff] }
  0x14   : > { %v436_v8 = vld [vmem:[%s6180_s10] sm:$0xff]  ;;  %524 = vst.msk [vmem:[#allocation2 + $0x120] sm:$0xff] %vm439_vm1, %v5544_v7  ;;  %v437_v12 = vld [vmem:[%s6180_s10 + $0x8] sm:$0xff]  ;;  %v438_v18 = vld [vmem:[%s6180_s10 + $0x10] sm:$0xff] }
  0x15   : > { %440 = vst.msk [vmem:[#allocation2] sm:$0xff] %vm439_vm1, %v436_v8  ;;  %v5523_v20 = vld [vmem:[%s6180_s10 + $0x78] sm:$0xff]  ;;  %v5524_v26 = vld [vmem:[%s6180_s10 + $0x80] sm:$0xff]  ;;  %v5525_v33 = vld [vmem:[%s6180_s10 + $0x88] sm:$0xff] }
  0x16   : > { %469 = vst.msk [vmem:[#allocation2 + $0x68] sm:$0xff] %vm439_vm1, %v5521_v9  ;;  %v5535_v22 = vld [vmem:[%s6180_s10 + $0xd8] sm:$0xff]  ;;  %v5536_v28 = vld [vmem:[%s6180_s10 + $0xe0] sm:$0xff]  ;;  %v5537_v34 = vld [vmem:[%s6180_s10 + $0xe8] sm:$0xff] }
  0x17   : > { %497 = vst.msk [vmem:[#allocation2 + $0xc8] sm:$0xff] %vm439_vm1, %v5533_v10  ;;  %v5547_v23 = vld [vmem:[%s6180_s10 + $0x138] sm:$0xff]  ;;  %v5548_v30 = vld [vmem:[%s6180_s10 + $0x140] sm:$0xff]  ;;  %v5549_v35 = vld [vmem:[%s6180_s10 + $0x148] sm:$0xff] }
  0x18   : > { %525 = vst.msk [vmem:[#allocation2 + $0x128] sm:$0xff] %vm439_vm1, %v5545_v11  ;;  %v5511_v24 = vld [vmem:[%s6180_s10 + $0x18] sm:$0xff]  ;;  %v5512_v32 = vld [vmem:[%s6180_s10 + $0x20] sm:$0xff]  ;;  %v5513_v36 = vld [vmem:[%s6180_s10 + $0x28] sm:$0xff] }
  0x19   : > { %v6199_v15 = vld [vmem:[#allocation2 + $0x60] sm:$0xff]  ;;  %441 = vst.msk [vmem:[#allocation2 + $0x8] sm:$0xff] %vm439_vm1, %v437_v12  ;;  %v5526_v38 = vld [vmem:[%s6180_s10 + $0x90] sm:$0xff]  ;;  %v5527_v45 = vld [vmem:[%s6180_s10 + $0x98] sm:$0xff] }
  0x1a   : > { %5569 = vmatmul.msk.f32.vlgmr.msra.gmra.mxu1 %vm439_vm1, %v6199_v15  ;;  %v808_v17 = vld [vmem:[#allocation2 + $0xc0] sm:$0xff]  ;;  %470 = vst.msk [vmem:[#allocation2 + $0x70] sm:$0xff] %vm439_vm1, %v5522_v13  ;;  %v5538_v40 = vld [vmem:[%s6180_s10 + $0xf0] sm:$0xff]  ;;  %v5539_v46 = vld [vmem:[%s6180_s10 + $0xf8] sm:$0xff] }
  0x1b   : > { %5581 = vmatmul.msk.f32.vlgmr.msra.gmra.mxu2 %vm439_vm1, %v808_v17  ;;  %v820_v19 = vld [vmem:[#allocation2 + $0x120] sm:$0xff]  ;;  %498 = vst.msk [vmem:[#allocation2 + $0xd0] sm:$0xff] %vm439_vm1, %v5534_v14  ;;  %v5550_v42 = vld [vmem:[%s6180_s10 + $0x150] sm:$0xff]  ;;  %v5551_v47 = vld [vmem:[%s6180_s10 + $0x158] sm:$0xff] }
  0x1c   : > { %5593 = vmatmul.msk.f32.vlgmr.msra.gmra.mxu3 %vm439_vm1, %v820_v19  ;;  %v784_v21 = vld [vmem:[#allocation2] sm:$0xff]  ;;  %526 = vst.msk [vmem:[#allocation2 + $0x130] sm:$0xff] %vm439_vm1, %v5546_v16  ;;  %v5514_v44 = vld [vmem:[%s6180_s10 + $0x30] sm:$0xff]  ;;  %v5515_v51 = vld [vmem:[%s6180_s10 + $0x38] sm:$0xff] }
  0x1d   : > { %5557 = vmatmul.msk.f32.vlgmr.msra.gmra.mxu0 %vm439_vm1, %v784_v21  ;;  %442 = vst.msk [vmem:[#allocation2 + $0x10] sm:$0xff] %vm439_vm1, %v438_v18  ;;  %v6218_v25 = vld [vmem:[#allocation2 + $0x68] sm:$0xff]  ;;  %v5528_v53 = vld [vmem:[%s6180_s10 + $0xa0] sm:$0xff]  ;;  %v5530_v5 = vld [vmem:[%s6180_s10 + $0xb0] sm:$0xff] }
  0x1e   : > { %475 = vst.msk [vmem:[#allocation2 + $0x78] sm:$0xff] %vm439_vm1, %v5523_v20  ;;  %v809_v27 = vld [vmem:[#allocation2 + $0xc8] sm:$0xff]  ;;  %v5540_v54 = vld [vmem:[%s6180_s10 + $0x100] sm:$0xff]  ;;  %v5542_v6 = vld [vmem:[%s6180_s10 + $0x110] sm:$0xff] }
  0x1f   : > { %503 = vst.msk [vmem:[#allocation2 + $0xd8] sm:$0xff] %vm439_vm1, %v5535_v22  ;;  %v821_v29 = vld [vmem:[#allocation2 + $0x128] sm:$0xff]  ;;  %v5552_v55 = vld [vmem:[%s6180_s10 + $0x160] sm:$0xff]  ;;  %v5554_v7 = vld [vmem:[%s6180_s10 + $0x170] sm:$0xff] }
  0x20   : > { %531 = vst.msk [vmem:[#allocation2 + $0x138] sm:$0xff] %vm439_vm1, %v5547_v23  ;;  %v785_v31 = vld [vmem:[#allocation2 + $0x8] sm:$0xff]  ;;  %v5516_v59 = vld [vmem:[%s6180_s10 + $0x40] sm:$0xff]  ;;  %v5518_v11 = vld [vmem:[%s6180_s10 + $0x50] sm:$0xff] }
  0x21   : > { %447 = vst.msk [vmem:[#allocation2 + $0x18] sm:$0xff] %vm439_vm1, %v5511_v24  ;;  %v6241_v37 = vld [vmem:[#allocation2 + $0x70] sm:$0xff]  ;;  %v5529_v61 = vld [vmem:[%s6180_s10 + $0xa8] sm:$0xff]  ;;  %v5531_v13 = vld [vmem:[%s6180_s10 + $0xb8] sm:$0xff] }
  0x22   : > { %5570 = vmatmul.msk.f32.gmra.mxu1 %vm439_vm1, %v6218_v25  ;;  %476 = vst.msk [vmem:[#allocation2 + $0x80] sm:$0xff] %vm439_vm1, %v5524_v26  ;;  %v810_v39 = vld [vmem:[#allocation2 + $0xd0] sm:$0xff]  ;;  %v5541_v62 = vld [vmem:[%s6180_s10 + $0x108] sm:$0xff]  ;;  %v5543_v14 = vld [vmem:[%s6180_s10 + $0x118] sm:$0xff] }
  0x23   : > { %5582 = vmatmul.msk.f32.gmra.mxu2 %vm439_vm1, %v809_v27  ;;  %504 = vst.msk [vmem:[#allocation2 + $0xe0] sm:$0xff] %vm439_vm1, %v5536_v28  ;;  %v822_v41 = vld [vmem:[#allocation2 + $0x130] sm:$0xff]  ;;  %v5553_v63 = vld [vmem:[%s6180_s10 + $0x168] sm:$0xff]  ;;  %v5555_v16 = vld [vmem:[%s6180_s10 + $0x178] sm:$0xff] }
  0x24   : > { %5594 = vmatmul.msk.f32.gmra.mxu3 %vm439_vm1, %v821_v29  ;;  %532 = vst.msk [vmem:[#allocation2 + $0x140] sm:$0xff] %vm439_vm1, %v5548_v30  ;;  %v786_v43 = vld [vmem:[#allocation2 + $0x10] sm:$0xff]  ;;  %v5517_v3 = vld [vmem:[%s6180_s10 + $0x48] sm:$0xff]  ;;  %v5519_v20 = vld [vmem:[%s6180_s10 + $0x58] sm:$0xff] }
  0x25   : > { %5558 = vmatmul.msk.f32.gmra.mxu0 %vm439_vm1, %v785_v31  ;;  %448 = vst.msk [vmem:[#allocation2 + $0x20] sm:$0xff] %vm439_vm1, %v5512_v32  ;;  %v6263_v48 = vld [vmem:[#allocation2 + $0x78] sm:$0xff]  ;;  %v560_v22 = vld [vmem:[#allocation2 + $0x1] sm:$0xff]  ;;  %v561_v30 = vld [vmem:[#allocation2 + $0x9] sm:$0xff] }
  0x26   : > { %477 = vst.msk [vmem:[#allocation2 + $0x88] sm:$0xff] %vm439_vm1, %v5525_v33  ;;  %v811_v49 = vld [vmem:[#allocation2 + $0xd8] sm:$0xff]  ;;  %v672_v23 = vld [vmem:[#allocation2 + $0x2] sm:$0xff]  ;;  %v673_v31 = vld [vmem:[#allocation2 + $0xa] sm:$0xff] }
  0x27   : > { %505 = vst.msk [vmem:[#allocation2 + $0xe8] sm:$0xff] %vm439_vm1, %v5537_v34  ;;  %v823_v50 = vld [vmem:[#allocation2 + $0x138] sm:$0xff]  ;;  %v5805_v34 = vld [vmem:[%s7228_s3 + $0x14] sm:$0xf] }
  0x28   : > { %533 = vst.msk [vmem:[#allocation2 + $0x148] sm:$0xff] %vm439_vm1, %v5549_v35  ;;  %v6270_v52 = vld [vmem:[#allocation2 + $0x18] sm:$0xff]  ;;  %v5955_v35 = vld [vmem:[%s7228_s3 + $0x20] sm:$0xf]  ;;  %5806 = vmatpush.msk.msra.mxu1 %vm977_vm0, %v5805_v34 }
  0x29   : > { %449 = vst.msk [vmem:[#allocation2 + $0x28] sm:$0xff] %vm439_vm1, %v5513_v36  ;;  %v6283_v56 = vld [vmem:[#allocation2 + $0x80] sm:$0xff]  ;;  %v5855_v32 = vld [vmem:[%s7228_s3 + $0x18] sm:$0xf]  ;;  %v5905_v33 = vld [vmem:[%s7228_s3 + $0x1c] sm:$0xf]  ;;  %5956 = vmatpush.msk.msra.mxu0 %vm977_vm0, %v5955_v35 }
  0x2a   : > { %5571 = vmatmul.msk.f32.gmra.mxu1 %vm439_vm1, %v6241_v37  ;;  %482 = vst.msk [vmem:[#allocation2 + $0x90] sm:$0xff] %vm439_vm1, %v5526_v38  ;;  %v812_v57 = vld [vmem:[#allocation2 + $0xe0] sm:$0xff]  ;;  %5856 = vmatpush.msk.msra.mxu2 %vm977_vm0, %v5855_v32 }
  0x2b   : > { %5583 = vmatmul.msk.f32.gmra.mxu2 %vm439_vm1, %v810_v39  ;;  %510 = vst.msk [vmem:[#allocation2 + $0xf0] sm:$0xff] %vm439_vm1, %v5538_v40  ;;  %v824_v58 = vld [vmem:[#allocation2 + $0x140] sm:$0xff]  ;;  %5906 = vmatpush.msk.msra.mxu3 %vm977_vm0, %v5905_v33 }
  0x2c   : > { %5595 = vmatmul.msk.f32.gmra.mxu3 %vm439_vm1, %v822_v41  ;;  %538 = vst.msk [vmem:[#allocation2 + $0x150] sm:$0xff] %vm439_vm1, %v5550_v42  ;;  %v6288_v60 = vld [vmem:[#allocation2 + $0x20] sm:$0xff]  ;;  %v562_v42 = vld [vmem:[#allocation2 + $0x11] sm:$0xff] }
  0x2d   : > { %5559 = vmatmul.msk.f32.gmra.mxu0 %vm439_vm1, %v786_v43  ;;  %454 = vst.msk [vmem:[#allocation2 + $0x30] sm:$0xff] %vm439_vm1, %v5514_v44  ;;  %v6301_v0 = vld [vmem:[#allocation2 + $0x88] sm:$0xff]  ;;  %v563_v28 = vld [vmem:[#allocation2 + $0x19] sm:$0xff] }
  0x2e   : > { %483 = vst.msk [vmem:[#allocation2 + $0x98] sm:$0xff] %vm439_vm1, %v5527_v45  ;;  %v813_v1 = vld [vmem:[#allocation2 + $0xe8] sm:$0xff]  ;;  %v674_v43 = vld [vmem:[#allocation2 + $0x12] sm:$0xff] }
  0x2f   : > { %511 = vst.msk [vmem:[#allocation2 + $0xf8] sm:$0xff] %vm439_vm1, %v5539_v46  ;;  %v825_v2 = vld [vmem:[#allocation2 + $0x148] sm:$0xff] }
  0x30   : > { %539 = vst.msk [vmem:[#allocation2 + $0x158] sm:$0xff] %vm439_vm1, %v5551_v47  ;;  %v6306_v4 = vld [vmem:[#allocation2 + $0x28] sm:$0xff] }
  0x31   : > { %455 = vst.msk [vmem:[#allocation2 + $0x38] sm:$0xff] %vm439_vm1, %v5515_v51  ;;  %v6319_v8 = vld [vmem:[#allocation2 + $0x90] sm:$0xff]  ;;  %v564_v40 = vld [vmem:[#allocation2 + $0x21] sm:$0xff] }
  0x32   : > { %5572 = vmatmul.msk.f32.gmra.mxu1 %vm439_vm1, %v6263_v48  ;;  %484 = vst.msk [vmem:[#allocation2 + $0xa0] sm:$0xff] %vm439_vm1, %v5528_v53  ;;  %v814_v9 = vld [vmem:[#allocation2 + $0xf0] sm:$0xff] }
  0x33   : > { %5584 = vmatmul.msk.f32.gmra.mxu2 %vm439_vm1, %v811_v49  ;;  %512 = vst.msk [vmem:[#allocation2 + $0x100] sm:$0xff] %vm439_vm1, %v5540_v54  ;;  %v826_v10 = vld [vmem:[#allocation2 + $0x150] sm:$0xff] }
  0x34   : > { %5596 = vmatmul.msk.f32.gmra.mxu3 %vm439_vm1, %v823_v50  ;;  %540 = vst.msk [vmem:[#allocation2 + $0x160] sm:$0xff] %vm439_vm1, %v5552_v55  ;;  %v6324_v12 = vld [vmem:[#allocation2 + $0x30] sm:$0xff]  ;;  %v675_v50 = vld [vmem:[#allocation2 + $0x1a] sm:$0xff] }
  0x35   : > { %5560 = vmatmul.msk.f32.gmra.mxu0 %vm439_vm1, %v6270_v52  ;;  %456 = vst.msk [vmem:[#allocation2 + $0x40] sm:$0xff] %vm439_vm1, %v5516_v59  ;;  %v6337_v17 = vld [vmem:[#allocation2 + $0x98] sm:$0xff]  ;;  %v565_v47 = vld [vmem:[#allocation2 + $0x29] sm:$0xff] }
  0x36   : > { %489 = vst.msk [vmem:[#allocation2 + $0xa8] sm:$0xff] %vm439_vm1, %v5529_v61  ;;  %v815_v18 = vld [vmem:[#allocation2 + $0xf8] sm:$0xff] }
  0x37   : > { %517 = vst.msk [vmem:[#allocation2 + $0x108] sm:$0xff] %vm439_vm1, %v5541_v62  ;;  %v827_v19 = vld [vmem:[#allocation2 + $0x158] sm:$0xff] }
  0x38   : > { %545 = vst.msk [vmem:[#allocation2 + $0x168] sm:$0xff] %vm439_vm1, %v5553_v63  ;;  %v6342_v21 = vld [vmem:[#allocation2 + $0x38] sm:$0xff] }
  0x39   : > { %461 = vst.msk [vmem:[#allocation2 + $0x48] sm:$0xff] %vm439_vm1, %v5517_v3  ;;  %v6351_v24 = vld [vmem:[#allocation2 + $0xa0] sm:$0xff]  ;;  %v566_v55 = vld [vmem:[#allocation2 + $0x31] sm:$0xff] }
  0x3a   : > { %5573 = vmatmul.msk.f32.gmra.mxu1 %vm439_vm1, %v6283_v56  ;;  %490 = vst.msk [vmem:[#allocation2 + $0xb0] sm:$0xff] %vm439_vm1, %v5530_v5  ;;  %v816_v26 = vld [vmem:[#allocation2 + $0x100] sm:$0xff] }
  0x3b   : > { %5585 = vmatmul.msk.f32.gmra.mxu2 %vm439_vm1, %v812_v57  ;;  %518 = vst.msk [vmem:[#allocation2 + $0x110] sm:$0xff] %vm439_vm1, %v5542_v6  ;;  %v828_v27 = vld [vmem:[#allocation2 + $0x160] sm:$0xff] }
  0x3c   : > { %5597 = vmatmul.msk.f32.gmra.mxu3 %vm439_vm1, %v824_v58  ;;  %546 = vst.msk [vmem:[#allocation2 + $0x170] sm:$0xff] %vm439_vm1, %v5554_v7  ;;  %v6355_v29 = vld [vmem:[#allocation2 + $0x40] sm:$0xff]  ;;  %v678_v7 = vld [vmem:[#allocation2 + $0x32] sm:$0xff] }
  0x3d   : > { %5561 = vmatmul.msk.f32.gmra.mxu0 %vm439_vm1, %v6288_v60  ;;  %462 = vst.msk [vmem:[#allocation2 + $0x50] sm:$0xff] %vm439_vm1, %v5518_v11  ;;  %v6380_v36 = vld [vmem:[#allocation2 + $0xa8] sm:$0xff]  ;;  %v567_v62 = vld [vmem:[#allocation2 + $0x39] sm:$0xff] }
  0x3e   : > { %491 = vst.msk [vmem:[#allocation2 + $0xb8] sm:$0xff] %vm439_vm1, %v5531_v13  ;;  %v817_v38 = vld [vmem:[#allocation2 + $0x108] sm:$0xff]  ;;  %v679_v13 = vld [vmem:[#allocation2 + $0x3a] sm:$0xff] }
  0x3f   : > { %519 = vst.msk [vmem:[#allocation2 + $0x118] sm:$0xff] %vm439_vm1, %v5543_v14  ;;  %v829_v39 = vld [vmem:[#allocation2 + $0x168] sm:$0xff] }
  0x40   : > { %547 = vst.msk [vmem:[#allocation2 + $0x178] sm:$0xff] %vm439_vm1, %v5555_v16  ;;  %v6384_v41 = vld [vmem:[#allocation2 + $0x48] sm:$0xff] }
  0x41   : > { %463 = vst.msk [vmem:[#allocation2 + $0x58] sm:$0xff] %vm439_vm1, %v5519_v20  ;;  %v6393_v44 = vld [vmem:[#allocation2 + $0xb0] sm:$0xff]  ;;  %v676_v58 = vld [vmem:[#allocation2 + $0x22] sm:$0xff] }
  0x42   : > { %5574 = vmatmul.msk.f32.gmra.mxu1 %vm439_vm1, %v6301_v0  ;;  %615 = vst.msk [vmem:[#allocation2 + $0x1b0] sm:$0xff] %vm439_vm1, %v560_v22  ;;  %v818_v45 = vld [vmem:[#allocation2 + $0x110] sm:$0xff]  ;;  %v568_v5 = vld [vmem:[#allocation2 + $0x41] sm:$0xff] }
  0x43   : > { %5586 = vmatmul.msk.f32.gmra.mxu2 %vm439_vm1, %v813_v1  ;;  %727 = vst.msk [vmem:[#allocation2 + $0x360] sm:$0xff] %vm439_vm1, %v672_v23  ;;  %v830_v46 = vld [vmem:[#allocation2 + $0x170] sm:$0xff] }
  0x44   : > { %5598 = vmatmul.msk.f32.gmra.mxu3 %vm439_vm1, %v825_v2  ;;  %618 = vst.msk [vmem:[#allocation2 + $0x1c8] sm:$0xff] %vm439_vm1, %v563_v28  ;;  %v6397_v49 = vld [vmem:[#allocation2 + $0x50] sm:$0xff] }
  0x45   : > { %5562 = vmatmul.msk.f32.gmra.mxu0 %vm439_vm1, %v6306_v4  ;;  %616 = vst.msk [vmem:[#allocation2 + $0x1b8] sm:$0xff] %vm439_vm1, %v561_v30  ;;  %v6405_v51 = vld [vmem:[#allocation2 + $0xb8] sm:$0xff]  ;;  %v677_v1 = vld [vmem:[#allocation2 + $0x2a] sm:$0xff] }
  0x46   : > { %728 = vst.msk [vmem:[#allocation2 + $0x368] sm:$0xff] %vm439_vm1, %v673_v31  ;;  %v819_v53 = vld [vmem:[#allocation2 + $0x118] sm:$0xff]  ;;  %v572_v31 = vld [vmem:[#allocation2 + $0x61] sm:$0xff] }
  0x47   : > { %619 = vst.msk [vmem:[#allocation2 + $0x1d0] sm:$0xff] %vm439_vm1, %v564_v40  ;;  %v831_v54 = vld [vmem:[#allocation2 + $0x178] sm:$0xff]  ;;  %v573_v40 = vld [vmem:[#allocation2 + $0x69] sm:$0xff] }
  0x48   : > { %617 = vst.msk [vmem:[#allocation2 + $0x1c0] sm:$0xff] %vm439_vm1, %v562_v42  ;;  %v6409_v57 = vld [vmem:[#allocation2 + $0x58] sm:$0xff] }
  0x49   : > { %729 = vst.msk [vmem:[#allocation2 + $0x370] sm:$0xff] %vm439_vm1, %v674_v43  ;;  %v1190_v59 = vld [vmem:[#allocation2 + $0x1b0] sm:$0xff]  ;;  %v571_v20 = vld [vmem:[#allocation2 + $0x59] sm:$0xff] }
  0x4a   : > { %5575 = vmatmul.msk.f32.gmra.mxu1 %vm439_vm1, %v6319_v8  ;;  %620 = vst.msk [vmem:[#allocation2 + $0x1d8] sm:$0xff] %vm439_vm1, %v565_v47  ;;  %v1692_v61 = vld [vmem:[#allocation2 + $0x360] sm:$0xff]  ;;  %v570_v14 = vld [vmem:[#allocation2 + $0x51] sm:$0xff] }
  0x4b   : > { %5587 = vmatmul.msk.f32.gmra.mxu2 %vm439_vm1, %v814_v9  ;;  %730 = vst.msk [vmem:[#allocation2 + $0x378] sm:$0xff] %vm439_vm1, %v675_v50  ;;  %v2696_v63 = vld [vmem:[#allocation2 + $0x1c8] sm:$0xff]  ;;  %v682_v34 = vld [vmem:[#allocation2 + $0x52] sm:$0xff] }
  0x4c   : > { %5599 = vmatmul.msk.f32.gmra.mxu3 %vm439_vm1, %v826_v10  ;;  %621 = vst.msk [vmem:[#allocation2 + $0x1e0] sm:$0xff] %vm439_vm1, %v566_v55  ;;  %v1191_v2 = vld [vmem:[#allocation2 + $0x1b8] sm:$0xff]  ;;  %v569_v10 = vld [vmem:[#allocation2 + $0x49] sm:$0xff] }
  0x4d   : > { %5563 = vmatmul.msk.f32.gmra.mxu0 %vm439_vm1, %v6324_v12  ;;  %731 = vst.msk [vmem:[#allocation2 + $0x380] sm:$0xff] %vm439_vm1, %v676_v58  ;;  %v1693_v3 = vld [vmem:[#allocation2 + $0x368] sm:$0xff] }
  0x4e   : > { %622 = vst.msk [vmem:[#allocation2 + $0x1e8] sm:$0xff] %vm439_vm1, %v567_v62  ;;  %v2697_v6 = vld [vmem:[#allocation2 + $0x1d0] sm:$0xff]  ;;  %v684_v58 = vld [vmem:[#allocation2 + $0x62] sm:$0xff] }
  0x4f   : > { %732 = vst.msk [vmem:[#allocation2 + $0x388] sm:$0xff] %vm439_vm1, %v677_v1 }
  0x50   : > { %623 = vst.msk [vmem:[#allocation2 + $0x1f0] sm:$0xff] %vm439_vm1, %v568_v5  ;;  %v1694_v9 = vld [vmem:[#allocation2 + $0x370] sm:$0xff] }
  0x51   : > { %733 = vst.msk [vmem:[#allocation2 + $0x390] sm:$0xff] %vm439_vm1, %v678_v7  ;;  %v2698_v11 = vld [vmem:[#allocation2 + $0x1d8] sm:$0xff] }
  0x52   : > { %5576 = vmatmul.msk.f32.gmra.mxu1 %vm439_vm1, %v6337_v17  ;;  %624 = vst.msk [vmem:[#allocation2 + $0x1f8] sm:$0xff] %vm439_vm1, %v569_v10 }
  0x53   : > { %5588 = vmatmul.msk.f32.gmra.mxu2 %vm439_vm1, %v815_v18  ;;  %734 = vst.msk [vmem:[#allocation2 + $0x398] sm:$0xff] %vm439_vm1, %v679_v13  ;;  %v2699_v16 = vld [vmem:[#allocation2 + $0x1e0] sm:$0xff] }
  0x54   : > { %5600 = vmatmul.msk.f32.gmra.mxu3 %vm439_vm1, %v827_v19  ;;  %625 = vst.msk [vmem:[#allocation2 + $0x200] sm:$0xff] %vm439_vm1, %v570_v14  ;;  %v680_v18 = vld [vmem:[#allocation2 + $0x42] sm:$0xff] }
  0x55   : > { %5564 = vmatmul.msk.f32.gmra.mxu0 %vm439_vm1, %v6342_v21  ;;  %735 = vst.msk [vmem:[#allocation2 + $0x3a0] sm:$0xff] %vm439_vm1, %v680_v18  ;;  %v1696_v19 = vld [vmem:[#allocation2 + $0x380] sm:$0xff]  ;;  %v2700_v23 = vld [vmem:[#allocation2 + $0x1e8] sm:$0xff] }
  0x56   : > { %626 = vst.msk [vmem:[#allocation2 + $0x208] sm:$0xff] %vm439_vm1, %v571_v20  ;;  %v1697_v30 = vld [vmem:[#allocation2 + $0x388] sm:$0xff]  ;;  %v687_v20 = vld [vmem:[#allocation2 + $0x7a] sm:$0xff] }
  0x57   : > { %v2701_v33 = vld [vmem:[#allocation2 + $0x1f0] sm:$0xff]  ;;  %627 = vst.msk [vmem:[#allocation2 + $0x210] sm:$0xff] %vm439_vm1, %v572_v31 }
  0x58   : > { %737 = vst.msk [vmem:[#allocation2 + $0x3b0] sm:$0xff] %vm439_vm1, %v682_v34  ;;  %v578_v31 = vld [vmem:[#allocation2 + $0x91] sm:$0xff] }
  0x59   : > { %v2702_v43 = vld [vmem:[#allocation2 + $0x1f8] sm:$0xff]  ;;  %628 = vst.msk [vmem:[#allocation2 + $0x218] sm:$0xff] %vm439_vm1, %v573_v40 }
  0x5a   : > { %5577 = vmatmul.msk.f32.gmra.mxu1 %vm439_vm1, %v6351_v24  ;;  %v1699_v50 = vld [vmem:[#allocation2 + $0x398] sm:$0xff]  ;;  %739 = vst.msk [vmem:[#allocation2 + $0x3c0] sm:$0xff] %vm439_vm1, %v684_v58  ;;  %v580_v58 = vld [vmem:[#allocation2 + $0xa1] sm:$0xff] }
  0x5b   : > { %5589 = vmatmul.msk.f32.gmra.mxu2 %vm439_vm1, %v816_v26  ;;  %v681_v26 = vld [vmem:[#allocation2 + $0x4a] sm:$0xff]  ;;  %v2703_v55 = vld [vmem:[#allocation2 + $0x200] sm:$0xff]  ;;  %742 = vst.msk [vmem:[#allocation2 + $0x3d8] sm:$0xff] %vm439_vm1, %v687_v20 }
  0x5c   : > { %5601 = vmatmul.msk.f32.gmra.mxu3 %vm439_vm1, %v828_v27  ;;  %736 = vst.msk [vmem:[#allocation2 + $0x3a8] sm:$0xff] %vm439_vm1, %v681_v26  ;;  %v1700_v62 = vld [vmem:[#allocation2 + $0x3a0] sm:$0xff] }
  0x5d   : > { %5565 = vmatmul.msk.f32.gmra.mxu0 %vm439_vm1, %v6355_v29  ;;  %633 = vst.msk [vmem:[#allocation2 + $0x240] sm:$0xff] %vm439_vm1, %v578_v31 }
  0x5e   : > { %v2705_v10 = vld [vmem:[#allocation2 + $0x210] sm:$0xff]  ;;  %635 = vst.msk [vmem:[#allocation2 + $0x250] sm:$0xff] %vm439_vm1, %v580_v58 }
  0x5f   : > { %v1702_v14 = vld [vmem:[#allocation2 + $0x3b0] sm:$0xff] }
  0x62   : > { %5578 = vmatmul.msk.f32.gmra.mxu1 %vm439_vm1, %v6380_v36 }
  0x63   : > { %5590 = vmatmul.msk.f32.gmra.mxu2 %vm439_vm1, %v817_v38  ;;  %v1701_v7 = vld [vmem:[#allocation2 + $0x3a8] sm:$0xff] }
  0x64   : > { %5602 = vmatmul.msk.f32.gmra.mxu3 %vm439_vm1, %v829_v39  ;;  %v1698_v39 = vld [vmem:[#allocation2 + $0x390] sm:$0xff]  ;;  %v2711_v20 = vld [vmem:[#allocation2 + $0x240] sm:$0xff] }
  0x65   : > { %5566 = vmatmul.msk.f32.gmra.mxu0 %vm439_vm1, %v6384_v41 }
  0x6a   : > { %5579 = vmatmul.msk.f32.gmra.mxu1 %vm439_vm1, %v6393_v44 }
  0x6b   : > { %5591 = vmatmul.msk.f32.gmra.mxu2 %vm439_vm1, %v818_v45  ;;  %v683_v45 = vld [vmem:[#allocation2 + $0x5a] sm:$0xff] }
  0x6c   : > { %5603 = vmatmul.msk.f32.gmra.mxu3 %vm439_vm1, %v830_v46  ;;  %738 = vst.msk [vmem:[#allocation2 + $0x3b8] sm:$0xff] %vm439_vm1, %v683_v45 }
  0x6d   : > { %5567 = vmatmul.msk.f32.gmra.mxu0 %vm439_vm1, %v6397_v49 }
  0x72   : > { %5580 = vmatmul.msk.f32.gmra.mxu1 %vm439_vm1, %v6405_v51 }
  0x73   : > { %5592 = vmatmul.msk.f32.gmra.mxu2 %vm439_vm1, %v819_v53  ;;  %v574_v53 = vld [vmem:[#allocation2 + $0x71] sm:$0xff] }
  0x74   : > { %5604 = vmatmul.msk.f32.gmra.mxu3 %vm439_vm1, %v831_v54  ;;  %629 = vst.msk [vmem:[#allocation2 + $0x220] sm:$0xff] %vm439_vm1, %v574_v53 }
  0x75   : > { %5568 = vmatmul.msk.f32.gmra.mxu0 %vm439_vm1, %v6409_v57 }
  0x7a   : > { %5607 = vmatmul.msk.f32.vlgmr.msrb.gmra.mxu1 %vm439_vm1, %v1190_v59 }
  0x7b   : > { %5657 = vmatmul.msk.f32.vlgmr.msrb.gmra.mxu2 %vm439_vm1, %v1692_v61  ;;  %v2707_v34 = vld [vmem:[#allocation2 + $0x220] sm:$0xff] }
  0x7c   : > { %5707 = vmatmul.msk.f32.vlgmr.msrb.gmra.mxu3 %vm439_vm1, %v6270_v52  ;;  %v1192_v52 = vld [vmem:[#allocation2 + $0x1c0] sm:$0xff] }
  0x7d   : > { %5757 = vmatmul.msk.f32.vlgmr.msrb.gmra.mxu0 %vm439_vm1, %v2696_v63 }
  0x82   : > { %5608 = vmatmul.msk.f32.gmra.mxu1 %vm439_vm1, %v1191_v2  ;;  %v2704_v2 = vld [vmem:[#allocation2 + $0x208] sm:$0xff] }
  0x83   : > { %5658 = vmatmul.msk.f32.gmra.mxu2 %vm439_vm1, %v1693_v3  ;;  %v685_v3 = vld [vmem:[#allocation2 + $0x6a] sm:$0xff] }
  0x84   : > { %5708 = vmatmul.msk.f32.gmra.mxu3 %vm439_vm1, %v6288_v60  ;;  %v1695_v60 = vld [vmem:[#allocation2 + $0x378] sm:$0xff]  ;;  %740 = vst.msk [vmem:[#allocation2 + $0x3c8] sm:$0xff] %vm439_vm1, %v685_v3 }
  0x85   : > { %5758 = vmatmul.msk.f32.gmra.mxu0 %vm439_vm1, %v2697_v6 }
  0x8a   : > { %5609 = vmatmul.msk.f32.gmra.mxu1 %vm439_vm1, %v1192_v52  ;;  %v576_v52 = vld [vmem:[#allocation2 + $0x81] sm:$0xff] }
  0x8b   : > { %5659 = vmatmul.msk.f32.gmra.mxu2 %vm439_vm1, %v1694_v9  ;;  %631 = vst.msk [vmem:[#allocation2 + $0x230] sm:$0xff] %vm439_vm1, %v576_v52  ;;  %v581_v52 = vld [vmem:[#allocation2 + $0xa9] sm:$0xff] }
  0x8c   : > { %5709 = vmatmul.msk.f32.gmra.mxu3 %vm439_vm1, %v6306_v4  ;;  %636 = vst.msk [vmem:[#allocation2 + $0x258] sm:$0xff] %vm439_vm1, %v581_v52  ;;  %v694_v52 = vld [vmem:[#allocation2 + $0xb2] sm:$0xff] }
  0x8d   : > { %5759 = vmatmul.msk.f32.gmra.mxu0 %vm439_vm1, %v2698_v11  ;;  %749 = vst.msk [vmem:[#allocation2 + $0x410] sm:$0xff] %vm439_vm1, %v694_v52 }
  0x92   : > { %5610 = vmatmul.msk.f32.gmra.mxu1 %vm439_vm1, %v2696_v63  ;;  %v575_v63 = vld [vmem:[#allocation2 + $0x79] sm:$0xff] }
  0x93   : > { %5660 = vmatmul.msk.f32.gmra.mxu2 %vm439_vm1, %v1695_v60  ;;  %630 = vst.msk [vmem:[#allocation2 + $0x228] sm:$0xff] %vm439_vm1, %v575_v63  ;;  %v2709_v63 = vld [vmem:[#allocation2 + $0x230] sm:$0xff] }
  0x94   : > { %5710 = vmatmul.msk.f32.gmra.mxu3 %vm439_vm1, %v6324_v12 }
  0x95   : > { %5760 = vmatmul.msk.f32.gmra.mxu0 %vm439_vm1, %v2699_v16 }
  0x97   : > { %v6445_v4 = vpop.f32.mrf.mxu1 }
  0x9a   : > { %5611 = vmatmul.msk.f32.gmra.mxu1 %vm439_vm1, %v2697_v6  ;;  %v6448_v22 = vpop.f32.mrf.mxu0 }
  0x9b   : > { %5661 = vmatmul.msk.f32.gmra.mxu2 %vm439_vm1, %v1696_v19  ;;  %v2706_v19 = vld [vmem:[#allocation2 + $0x218] sm:$0xff] }
  0x9c   : > { %5711 = vmatmul.msk.f32.gmra.mxu3 %vm439_vm1, %v6342_v21 }
  0x9d   : > { %5761 = vmatmul.msk.f32.gmra.mxu0 %vm439_vm1, %v2700_v23 }
  0x9e   : > { %v6456_v12 = vpop.f32.mrf.mxu2 }
  0x9f   : > { %v6458_v27 = vpop.f32.mrf.mxu3  ;;  %v6460_v28 = vpop.f32.mrf.mxu1 }
  0xa2   : > { %5612 = vmatmul.msk.f32.gmra.mxu1 %vm439_vm1, %v2698_v11  ;;  %v6463_v32 = vpop.f32.mrf.mxu0  ;;  %v686_v11 = vld [vmem:[#allocation2 + $0x72] sm:$0xff] }
  0xa3   : > { %5662 = vmatmul.msk.f32.gmra.mxu2 %vm439_vm1, %v1697_v30  ;;  %741 = vst.msk [vmem:[#allocation2 + $0x3d0] sm:$0xff] %vm439_vm1, %v686_v11  ;;  %v1703_v30 = vld [vmem:[#allocation2 + $0x3b8] sm:$0xff] }
  0xa4   : > { %5712 = vmatmul.msk.f32.gmra.mxu3 %vm439_vm1, %v6355_v29  ;;  %v691_v11 = vld [vmem:[#allocation2 + $0x9a] sm:$0xff] }
  0xa5   : > { %5762 = vmatmul.msk.f32.gmra.mxu0 %vm439_vm1, %v2701_v33  ;;  %746 = vst.msk [vmem:[#allocation2 + $0x3f8] sm:$0xff] %vm439_vm1, %v691_v11 }
  0xa6   : > { %v6471_v21 = vpop.f32.mrf.mxu2 }
  0xa7   : > { %v6473_v35 = vpop.f32.mrf.mxu3  ;;  %v1040_v38 = vpop.f32.mrf.mxu1 }
  0xa8   : > { %v688_v38 = vld [vmem:[#allocation2 + $0x82] sm:$0xff] }
  0xa9   : > { %743 = vst.msk [vmem:[#allocation2 + $0x3e0] sm:$0xff] %vm439_vm1, %v688_v38 }
  0xaa   : > { %5613 = vmatmul.msk.f32.gmra.mxu1 %vm439_vm1, %v2699_v16  ;;  %v1004_v42 = vpop.f32.mrf.mxu0  ;;  %v577_v16 = vld [vmem:[#allocation2 + $0x89] sm:$0xff] }
  0xab   : > { %5663 = vmatmul.msk.f32.gmra.mxu2 %vm439_vm1, %v1698_v39  ;;  %632 = vst.msk [vmem:[#allocation2 + $0x238] sm:$0xff] %vm439_vm1, %v577_v16  ;;  %v1704_v42 = vld [vmem:[#allocation2 + $0x3c0] sm:$0xff]  ;;  %v582_v16 = vld [vmem:[#allocation2 + $0xb1] sm:$0xff] }
  0xac   : > { %5713 = vmatmul.msk.f32.gmra.mxu3 %vm439_vm1, %v6384_v41  ;;  %637 = vst.msk [vmem:[#allocation2 + $0x260] sm:$0xff] %vm439_vm1, %v582_v16 }
  0xad   : > { %5763 = vmatmul.msk.f32.gmra.mxu0 %vm439_vm1, %v2702_v43 }
  0xae   : > { %v1076_v29 = vpop.f32.mrf.mxu2 }
  0xaf   : > { %v1112_v46 = vpop.f32.mrf.mxu3  ;;  %v6482_v47 = vpop.f32.mrf.mxu1  ;;  %v2708_v29 = vld [vmem:[#allocation2 + $0x228] sm:$0xff] }
  0xb0   : > { %v689_v46 = vld [vmem:[#allocation2 + $0x8a] sm:$0xff]  ;;  %v1708_v38 = vld [vmem:[#allocation2 + $0x3e0] sm:$0xff] }
  0xb1   : > { %744 = vst.msk [vmem:[#allocation2 + $0x3e8] sm:$0xff] %vm439_vm1, %v689_v46 }
  0xb2   : > { %5614 = vmatmul.msk.f32.gmra.mxu1 %vm439_vm1, %v2700_v23  ;;  %v6485_v54 = vpop.f32.mrf.mxu0 }
  0xb3   : > { %5664 = vmatmul.msk.f32.gmra.mxu2 %vm439_vm1, %v1699_v50 }
  0xb4   : > { %5714 = vmatmul.msk.f32.gmra.mxu3 %vm439_vm1, %v6397_v49 }
  0xb5   : > { %5764 = vmatmul.msk.f32.gmra.mxu0 %vm439_vm1, %v2703_v55 }
  0xb6   : > { %v6493_v41 = vpop.f32.mrf.mxu2 }
  0xb7   : > { %v6495_v59 = vpop.f32.mrf.mxu3  ;;  %v6497_v61 = vpop.f32.mrf.mxu1 }
  0xba   : > { %5615 = vmatmul.msk.f32.gmra.mxu1 %vm439_vm1, %v2701_v33  ;;  %v6500_v1 = vpop.f32.mrf.mxu0 }
  0xbb   : > { %5665 = vmatmul.msk.f32.gmra.mxu2 %vm439_vm1, %v1700_v62 }
  0xbc   : > { %5715 = vmatmul.msk.f32.gmra.mxu3 %vm439_vm1, %v6409_v57 }
  0xbd   : > { %5765 = vmatmul.msk.f32.gmra.mxu0 %vm439_vm1, %v2704_v2 }
  0xbe   : > { %v6508_v49 = vpop.f32.mrf.mxu2 }
  0xbf   : > { %v6510_v5 = vpop.f32.mrf.mxu3  ;;  %v1049_v6 = vpop.f32.mrf.mxu1 }
  0xc2   : > { %5616 = vmatmul.msk.f32.gmra.mxu1 %vm439_vm1, %v2702_v43  ;;  %v1013_v9 = vpop.f32.mrf.mxu0  ;;  %v579_v43 = vld [vmem:[#allocation2 + $0x99] sm:$0xff] }
  0xc3   : > { %5666 = vmatmul.msk.f32.gmra.mxu2 %vm439_vm1, %v1701_v7  ;;  %634 = vst.msk [vmem:[#allocation2 + $0x248] sm:$0xff] %vm439_vm1, %v579_v43  ;;  %v1706_v7 = vld [vmem:[#allocation2 + $0x3d0] sm:$0xff] }
  0xc4   : > { %5716 = vmatmul.msk.f32.gmra.mxu3 %vm439_vm1, %v6199_v15 }
  0xc5   : > { %5766 = vmatmul.msk.f32.gmra.mxu0 %vm439_vm1, %v2705_v10 }
  0xc6   : > { %v1085_v57 = vpop.f32.mrf.mxu2 }
  0xc7   : > { %v1121_v13 = vpop.f32.mrf.mxu3  ;;  %v6519_v60 = vpop.f32.mrf.mxu1 }
  0xca   : > { %5617 = vmatmul.msk.f32.gmra.mxu1 %vm439_vm1, %v2703_v55  ;;  %v6522_v18 = vpop.f32.mrf.mxu0  ;;  %v1705_v55 = vld [vmem:[#allocation2 + $0x3c8] sm:$0xff] }
  0xcb   : > { %5667 = vmatmul.msk.f32.gmra.mxu2 %vm439_vm1, %v1702_v14  ;;  %v1707_v14 = vld [vmem:[#allocation2 + $0x3d8] sm:$0xff]  ;;  %v2712_v43 = vld [vmem:[#allocation2 + $0x248] sm:$0xff] }
  0xcc   : > { %5717 = vmatmul.msk.f32.gmra.mxu3 %vm439_vm1, %v6218_v25 }
  0xcd   : > { %5767 = vmatmul.msk.f32.gmra.mxu0 %vm439_vm1, %v2706_v19 }
  0xce   : > { %v6530_v15 = vpop.f32.mrf.mxu2 }
  0xcf   : > { %v6532_v23 = vpop.f32.mrf.mxu3  ;;  %v6534_v26 = vpop.f32.mrf.mxu1 }
  0xd2   : > { %5618 = vmatmul.msk.f32.gmra.mxu1 %vm439_vm1, %v2704_v2  ;;  %v6537_v33 = vpop.f32.mrf.mxu0  ;;  %v690_v2 = vld [vmem:[#allocation2 + $0x92] sm:$0xff] }
  0xd3   : > { %5668 = vmatmul.msk.f32.gmra.mxu2 %vm439_vm1, %v1703_v30  ;;  %745 = vst.msk [vmem:[#allocation2 + $0x3f0] sm:$0xff] %vm439_vm1, %v690_v2  ;;  %v692_v30 = vld [vmem:[#allocation2 + $0xa2] sm:$0xff] }
  0xd4   : > { %5718 = vmatmul.msk.f32.gmra.mxu3 %vm439_vm1, %v6241_v37  ;;  %747 = vst.msk [vmem:[#allocation2 + $0x400] sm:$0xff] %vm439_vm1, %v692_v30  ;;  %v585_v30 = vld [vmem:[#allocation2 + $0xc9] sm:$0xff] }
  0xd5   : > { %5768 = vmatmul.msk.f32.gmra.mxu0 %vm439_vm1, %v2707_v34  ;;  %640 = vst.msk [vmem:[#allocation2 + $0x278] sm:$0xff] %vm439_vm1, %v585_v30  ;;  %v588_v30 = vld [vmem:[#allocation2 + $0xe1] sm:$0xff] }
  0xd6   : > { %v6545_v25 = vpop.f32.mrf.mxu2  ;;  %643 = vst.msk [vmem:[#allocation2 + $0x290] sm:$0xff] %vm439_vm1, %v588_v30  ;;  %v2218_v30 = vld [vmem:[#allocation2 + $0xd8] sm:$0xff] }
  0xd7   : > { %v6547_v39 = vpop.f32.mrf.mxu3  ;;  %v1058_v40 = vpop.f32.mrf.mxu1 }
  0xd8   : > { %v583_v40 = vld [vmem:[#allocation2 + $0xb9] sm:$0xff] }
  0xd9   : > { %638 = vst.msk [vmem:[#allocation2 + $0x268] sm:$0xff] %vm439_vm1, %v583_v40 }
  0xda   : > { %5619 = vmatmul.msk.f32.gmra.mxu1 %vm439_vm1, %v2705_v10  ;;  %v1022_v45 = vpop.f32.mrf.mxu0  ;;  %v2710_v10 = vld [vmem:[#allocation2 + $0x238] sm:$0xff]  ;;  %v1710_v16 = vld [vmem:[#allocation2 + $0x3f0] sm:$0xff] }
  0xdb   : > { %5669 = vmatmul.msk.f32.gmra.mxu2 %vm439_vm1, %v1704_v42  ;;  %v693_v45 = vld [vmem:[#allocation2 + $0xaa] sm:$0xff] }
  0xdc   : > { %5719 = vmatmul.msk.f32.gmra.mxu3 %vm439_vm1, %v6263_v48  ;;  %748 = vst.msk [vmem:[#allocation2 + $0x408] sm:$0xff] %vm439_vm1, %v693_v45 }
  0xdd   : > { %5769 = vmatmul.msk.f32.gmra.mxu0 %vm439_vm1, %v2708_v29 }
  0xde   : > { %v1094_v37 = vpop.f32.mrf.mxu2 }
  0xdf   : > { %v1130_v50 = vpop.f32.mrf.mxu3  ;;  %v6556_v53 = vpop.f32.mrf.mxu1 }
  0xe0   : > { %v2716_v52 = vld [vmem:[#allocation2 + $0x268] sm:$0xff] }
  0xe2   : > { %5620 = vmatmul.msk.f32.gmra.mxu1 %vm439_vm1, %v2706_v19  ;;  %v6559_v62 = vpop.f32.mrf.mxu0 }
  0xe3   : > { %5670 = vmatmul.msk.f32.gmra.mxu2 %vm439_vm1, %v1705_v55  ;;  %v1709_v55 = vld [vmem:[#allocation2 + $0x3e8] sm:$0xff] }
  0xe4   : > { %5720 = vmatmul.msk.f32.gmra.mxu3 %vm439_vm1, %v6283_v56 }
  0xe5   : > { %5770 = vmatmul.msk.f32.gmra.mxu0 %vm439_vm1, %v2709_v63 }
  0xe6   : > { %v6567_v48 = vpop.f32.mrf.mxu2 }
  0xe7   : > { %v6569_v3 = vpop.f32.mrf.mxu3  ;;  %v6571_v6 = vpop.f32.mrf.mxu1 }
  0xea   : > { %5621 = vmatmul.msk.f32.gmra.mxu1 %vm439_vm1, %v2707_v34  ;;  %v6574_v9 = vpop.f32.mrf.mxu0 }
  0xeb   : > { %5671 = vmatmul.msk.f32.gmra.mxu2 %vm439_vm1, %v1706_v7  ;;  %v2713_v7 = vld [vmem:[#allocation2 + $0x250] sm:$0xff] }
  0xec   : > { %5721 = vmatmul.msk.f32.gmra.mxu3 %vm439_vm1, %v6301_v0 }
  0xed   : > { %5771 = vmatmul.msk.f32.gmra.mxu0 %vm439_vm1, %v2710_v10 }
  0xee   : > { %v6582_v56 = vpop.f32.mrf.mxu2 }
  0xef   : > { %v6584_v57 = vpop.f32.mrf.mxu3  ;;  %v1067_v13 = vpop.f32.mrf.mxu1 }
  0xf2   : > { %5622 = vmatmul.msk.f32.gmra.mxu1 %vm439_vm1, %v2708_v29  ;;  %v1031_v19 = vpop.f32.mrf.mxu0 }
  0xf3   : > { %5672 = vmatmul.msk.f32.gmra.mxu2 %vm439_vm1, %v1707_v14 }
  0xf4   : > { %5722 = vmatmul.msk.f32.gmra.mxu3 %vm439_vm1, %v6319_v8 }
  0xf5   : > { %5772 = vmatmul.msk.f32.gmra.mxu0 %vm439_vm1, %v2711_v20 }
  0xf6   : > { %v1103_v0 = vpop.f32.mrf.mxu2 }
  0xf7   : > { %v1139_v31 = vpop.f32.mrf.mxu3  ;;  %v1404_v34 = vpop.f32.mrf.mxu1 }
  0xf8   : > { %v1596_v8 = vadd.f32 %v1404_v34, %v6448_v22  ;;  %v2714_v31 = vld [vmem:[#allocation2 + $0x258] sm:$0xff] }
  0xf9   : > { %v695_v34 = vld [vmem:[#allocation2 + $0xba] sm:$0xff] }
  0xfa   : > { %5623 = vmatmul.msk.f32.gmra.mxu1 %vm439_vm1, %v2709_v63  ;;  %v2910_v42 = vpop.f32.mrf.mxu0  ;;  %v584_v63 = vld [vmem:[#allocation2 + $0xc1] sm:$0xff]  ;;  %750 = vst.msk [vmem:[#allocation2 + $0x418] sm:$0xff] %vm439_vm1, %v695_v34 }
  0xfb   : > { %5673 = vmatmul.msk.f32.gmra.mxu2 %vm439_vm1, %v1708_v38  ;;  %639 = vst.msk [vmem:[#allocation2 + $0x270] sm:$0xff] %vm439_vm1, %v584_v63  ;;  %v587_v63 = vld [vmem:[#allocation2 + $0xd9] sm:$0xff] }
  0xfc   : > { %5723 = vmatmul.msk.f32.gmra.mxu3 %vm439_vm1, %v6337_v17  ;;  %642 = vst.msk [vmem:[#allocation2 + $0x288] sm:$0xff] %vm439_vm1, %v587_v63  ;;  %v2217_v63 = vld [vmem:[#allocation2 + $0xd0] sm:$0xff] }
  0xfd   : > { %5773 = vmatmul.msk.f32.gmra.mxu0 %vm439_vm1, %v2712_v43 }
  0xfe   : > { %v1906_v29 = vpop.f32.mrf.mxu2 }
  0xff   : > { %v2098_v46 = vadd.f32 %v1906_v29, %v1596_v8  ;;  %v2408_v37 = vpop.f32.mrf.mxu3  ;;  %v1407_v50 = vpop.f32.mrf.mxu1  ;;  %v2715_v8 = vld [vmem:[#allocation2 + $0x260] sm:$0xff] }
 0x100   : > { %v1597_v17 = vadd.f32 %v1407_v50, %v6463_v32  ;;  %v696_v29 = vld [vmem:[#allocation2 + $0xc2] sm:$0xff] }
 0x101   : > { %v2600_v58 = vadd.f32 %v2408_v37, %v2098_v46  ;;  %751 = vst.msk [vmem:[#allocation2 + $0x420] sm:$0xff] %vm439_vm1, %v696_v29  ;;  %v2718_v29 = vld [vmem:[#allocation2 + $0x278] sm:$0xff] }
 0x102   : > { %5624 = vmatmul.msk.f32.gmra.mxu1 %vm439_vm1, %v2710_v10  ;;  %v2913_v2 = vpop.f32.mrf.mxu0  ;;  %v2717_v34 = vld [vmem:[#allocation2 + $0x270] sm:$0xff] }
 0x103   : > { %v6603_v11 = vadd.f32 %v2910_v42, %v2600_v58  ;;  %5674 = vmatmul.msk.f32.gmra.mxu2 %vm439_vm1, %v1709_v55  ;;  %v586_v42 = vld [vmem:[#allocation2 + $0xd1] sm:$0xff]  ;;  %v1712_v55 = vld [vmem:[#allocation2 + $0x400] sm:$0xff] }
 0x104   : > { %5724 = vmatmul.msk.f32.gmra.mxu3 %vm439_vm1, %v6351_v24  ;;  %641 = vst.msk [vmem:[#allocation2 + $0x280] sm:$0xff] %vm439_vm1, %v586_v42  ;;  %v589_v42 = vld [vmem:[#allocation2 + $0xe9] sm:$0xff] }
 0x105   : > { %5774 = vmatmul.msk.f32.gmra.mxu0 %vm439_vm1, %v2713_v7  ;;  %644 = vst.msk [vmem:[#allocation2 + $0x298] sm:$0xff] %vm439_vm1, %v589_v42 }
 0x106   : > { %v1909_v22 = vpop.f32.mrf.mxu2 }
 0x107   : > { %v2099_v10 = vadd.f32 %v1909_v22, %v1597_v17  ;;  %v2411_v13 = vpop.f32.mrf.mxu3  ;;  %v1410_v14 = vpop.f32.mrf.mxu1  ;;  %v697_v17 = vld [vmem:[#allocation2 + $0xca] sm:$0xff] }
 0x108   : > { %752 = vst.msk [vmem:[#allocation2 + $0x428] sm:$0xff] %vm439_vm1, %v697_v17  ;;  %v1713_v14 = vld [vmem:[#allocation2 + $0x408] sm:$0xff] }
 0x109   : > { %v2601_v19 = vadd.f32 %v2411_v13, %v2099_v10 }
 0x10a   : > { %5625 = vmatmul.msk.f32.gmra.mxu1 %vm439_vm1, %v2711_v20  ;;  %v2916_v0 = vpop.f32.mrf.mxu0  ;;  %v1711_v20 = vld [vmem:[#allocation2 + $0x3f8] sm:$0xff] }
 0x10b   : > { %v6613_v38 = vadd.f32 %v2913_v2, %v2601_v19  ;;  %5675 = vmatmul.msk.f32.gmra.mxu2 %vm439_vm1, %v1710_v16  ;;  %v2215_v19 = vld [vmem:[#allocation2 + $0xc0] sm:$0xff] }
 0x10c   : > { %5725 = vmatmul.msk.f32.gmra.mxu3 %vm439_vm1, %v6380_v36 }
 0x10d   : > { %5775 = vmatmul.msk.f32.gmra.mxu0 %vm439_vm1, %v2714_v31 }
 0x10e   : > { %v1912_v24 = vpop.f32.mrf.mxu2 }
 0x10f   : > { %v2414_v32 = vpop.f32.mrf.mxu3  ;;  %v1413_v40 = vpop.f32.mrf.mxu1  ;;  %v698_v24 = vld [vmem:[#allocation2 + $0xd2] sm:$0xff]  ;;  %v1717_v42 = vld [vmem:[#allocation2 + $0x428] sm:$0xff] }
 0x110   : > { %v1599_v36 = vadd.f32 %v1413_v40, %v6485_v54  ;;  %753 = vst.msk [vmem:[#allocation2 + $0x430] sm:$0xff] %vm439_vm1, %v698_v24 }
 0x112   : > { %5626 = vmatmul.msk.f32.gmra.mxu1 %vm439_vm1, %v2712_v43  ;;  %v2919_v45 = vpop.f32.mrf.mxu0 }
 0x113   : > { %5676 = vmatmul.msk.f32.gmra.mxu2 %vm439_vm1, %v1711_v20  ;;  %v1714_v20 = vld [vmem:[#allocation2 + $0x410] sm:$0xff] }
 0x114   : > { %5726 = vmatmul.msk.f32.gmra.mxu3 %vm439_vm1, %v6393_v44 }
 0x115   : > { %5776 = vmatmul.msk.f32.gmra.mxu0 %vm439_vm1, %v2715_v8 }
 0x116   : > { %v1915_v46 = vpop.f32.mrf.mxu2 }
 0x117   : > { %v2101_v37 = vadd.f32 %v1915_v46, %v1599_v36  ;;  %v2417_v50 = vpop.f32.mrf.mxu3  ;;  %v1416_v43 = vpop.f32.mrf.mxu1  ;;  %v699_v36 = vld [vmem:[#allocation2 + $0xda] sm:$0xff] }
 0x118   : > { %v1600_v44 = vadd.f32 %v1416_v43, %v6500_v1  ;;  %754 = vst.msk [vmem:[#allocation2 + $0x438] sm:$0xff] %vm439_vm1, %v699_v36 }
 0x119   : > { %v2603_v58 = vadd.f32 %v2417_v50, %v2101_v37 }
 0x11a   : > { %5627 = vmatmul.msk.f32.gmra.mxu1 %vm439_vm1, %v2713_v7  ;;  %v2922_v2 = vpop.f32.mrf.mxu0 }
 0x11b   : > { %v6630_v22 = vadd.f32 %v2919_v45, %v2603_v58  ;;  %5677 = vmatmul.msk.f32.gmra.mxu2 %vm439_vm1, %v1712_v55 }
 0x11c   : > { %5727 = vmatmul.msk.f32.gmra.mxu3 %vm439_vm1, %v6405_v51 }
 0x11d   : > { %5777 = vmatmul.msk.f32.gmra.mxu0 %vm439_vm1, %v2716_v52 }
 0x11e   : > { %v1918_v54 = vpop.f32.mrf.mxu2 }
 0x11f   : > { %v2102_v7 = vadd.f32 %v1918_v54, %v1600_v44  ;;  %v2420_v10 = vpop.f32.mrf.mxu3  ;;  %v1419_v13 = vpop.f32.mrf.mxu1  ;;  %v2719_v44 = vld [vmem:[#allocation2 + $0x280] sm:$0xff] }
 0x120   : > { %v700_v54 = vld [vmem:[#allocation2 + $0xe2] sm:$0xff] }
 0x121   : > { %v2604_v16 = vadd.f32 %v2420_v10, %v2102_v7  ;;  %755 = vst.msk [vmem:[#allocation2 + $0x440] sm:$0xff] %vm439_vm1, %v700_v54 }
 0x122   : > { %5628 = vmatmul.msk.f32.gmra.mxu1 %vm439_vm1, %v2714_v31  ;;  %v2925_v0 = vpop.f32.mrf.mxu0  ;;  %v2216_v31 = vld [vmem:[#allocation2 + $0xc8] sm:$0xff] }
 0x123   : > { %v6640_v51 = vadd.f32 %v2922_v2, %v2604_v16  ;;  %5678 = vmatmul.msk.f32.gmra.mxu2 %vm439_vm1, %v1713_v14  ;;  %v590_v2 = vld [vmem:[#allocation2 + $0xf1] sm:$0xff]  ;;  %v1716_v16 = vld [vmem:[#allocation2 + $0x420] sm:$0xff] }
 0x124   : > { %5728 = vmatmul.msk.f32.gmra.mxu3 %vm439_vm1, %v2215_v19  ;;  %645 = vst.msk [vmem:[#allocation2 + $0x2a0] sm:$0xff] %vm439_vm1, %v590_v2  ;;  %v591_v0 = vld [vmem:[#allocation2 + $0xf9] sm:$0xff]  ;;  %v2220_v2 = vld [vmem:[#allocation2 + $0xe8] sm:$0xff] }
 0x125   : > { %5778 = vmatmul.msk.f32.gmra.mxu0 %vm439_vm1, %v2717_v34  ;;  %646 = vst.msk [vmem:[#allocation2 + $0x2a8] sm:$0xff] %vm439_vm1, %v591_v0  ;;  %v2221_v0 = vld [vmem:[#allocation2 + $0xf0] sm:$0xff] }
 0x126   : > { %v1921_v1 = vpop.f32.mrf.mxu2 }
 0x127   : > { %v2423_v32 = vpop.f32.mrf.mxu3  ;;  %v1422_v40 = vpop.f32.mrf.mxu1  ;;  %v2720_v1 = vld [vmem:[#allocation2 + $0x288] sm:$0xff] }
 0x128   : > { %v1602_v46 = vadd.f32 %v1422_v40, %v6522_v18  ;;  %v701_v32 = vld [vmem:[#allocation2 + $0xea] sm:$0xff] }
 0x129   : > { %756 = vst.msk [vmem:[#allocation2 + $0x448] sm:$0xff] %vm439_vm1, %v701_v32 }
 0x12a   : > { %5629 = vmatmul.msk.f32.gmra.mxu1 %vm439_vm1, %v2715_v8  ;;  %v2928_v45 = vpop.f32.mrf.mxu0  ;;  %v1715_v8 = vld [vmem:[#allocation2 + $0x418] sm:$0xff] }
 0x12b   : > { %5679 = vmatmul.msk.f32.gmra.mxu2 %vm439_vm1, %v1714_v20 }
 0x12c   : > { %5729 = vmatmul.msk.f32.gmra.mxu3 %vm439_vm1, %v2216_v31 }
 0x12d   : > { %5779 = vmatmul.msk.f32.gmra.mxu0 %vm439_vm1, %v2718_v29 }
 0x12e   : > { %v1924_v37 = vpop.f32.mrf.mxu2 }
 0x12f   : > { %v2104_v50 = vadd.f32 %v1924_v37, %v1602_v46  ;;  %v2426_v43 = vpop.f32.mrf.mxu3  ;;  %v1425_v55 = vpop.f32.mrf.mxu1  ;;  %v2721_v46 = vld [vmem:[#allocation2 + $0x290] sm:$0xff] }
 0x130   : > { %v1603_v18 = vadd.f32 %v1425_v55, %v6537_v33  ;;  %v702_v37 = vld [vmem:[#allocation2 + $0xf2] sm:$0xff] }
 0x131   : > { %v2606_v58 = vadd.f32 %v2426_v43, %v2104_v50  ;;  %757 = vst.msk [vmem:[#allocation2 + $0x450] sm:$0xff] %vm439_vm1, %v702_v37 }
 0x132   : > { %5630 = vmatmul.msk.f32.gmra.mxu1 %vm439_vm1, %v2716_v52  ;;  %v2931_v17 = vpop.f32.mrf.mxu0 }
 0x133   : > { %v6655_v7 = vadd.f32 %v2928_v45, %v2606_v58  ;;  %5680 = vmatmul.msk.f32.gmra.mxu2 %vm439_vm1, %v1715_v8  ;;  %v592_v45 = vld [vmem:[#allocation2 + $0x101] sm:$0xff] }
 0x134   : > { %5730 = vmatmul.msk.f32.gmra.mxu3 %vm439_vm1, %v2217_v63  ;;  %647 = vst.msk [vmem:[#allocation2 + $0x2b0] sm:$0xff] %vm439_vm1, %v592_v45  ;;  %v1720_v45 = vld [vmem:[#allocation2 + $0x440] sm:$0xff] }
 0x135   : > { %5780 = vmatmul.msk.f32.gmra.mxu0 %vm439_vm1, %v2719_v44 }
 0x136   : > { %v1927_v10 = vpop.f32.mrf.mxu2 }
 0x137   : > { %v2105_v13 = vadd.f32 %v1927_v10, %v1603_v18  ;;  %v2429_v52 = vpop.f32.mrf.mxu3  ;;  %v1428_v14 = vpop.f32.mrf.mxu1  ;;  %v2722_v18 = vld [vmem:[#allocation2 + $0x298] sm:$0xff] }
 0x138   : > { %v703_v10 = vld [vmem:[#allocation2 + $0xfa] sm:$0xff] }
 0x139   : > { %v2607_v19 = vadd.f32 %v2429_v52, %v2105_v13  ;;  %758 = vst.msk [vmem:[#allocation2 + $0x458] sm:$0xff] %vm439_vm1, %v703_v10 }
 0x13a   : > { %5631 = vmatmul.msk.f32.gmra.mxu1 %vm439_vm1, %v2717_v34  ;;  %v2934_v24 = vpop.f32.mrf.mxu0  ;;  %v2219_v34 = vld [vmem:[#allocation2 + $0xe0] sm:$0xff] }
 0x13b   : > { %v6664_v40 = vadd.f32 %v2931_v17, %v2607_v19  ;;  %5681 = vmatmul.msk.f32.gmra.mxu2 %vm439_vm1, %v1716_v16  ;;  %v593_v17 = vld [vmem:[#allocation2 + $0x109] sm:$0xff]  ;;  %v1719_v19 = vld [vmem:[#allocation2 + $0x438] sm:$0xff] }
 0x13c   : > { %5731 = vmatmul.msk.f32.gmra.mxu3 %vm439_vm1, %v2218_v30  ;;  %648 = vst.msk [vmem:[#allocation2 + $0x2b8] sm:$0xff] %vm439_vm1, %v593_v17  ;;  %v594_v24 = vld [vmem:[#allocation2 + $0x111] sm:$0xff]  ;;  %v2223_v17 = vld [vmem:[#allocation2 + $0x100] sm:$0xff] }
 0x13d   : > { %5781 = vmatmul.msk.f32.gmra.mxu0 %vm439_vm1, %v2720_v1  ;;  %649 = vst.msk [vmem:[#allocation2 + $0x2c0] sm:$0xff] %vm439_vm1, %v594_v24  ;;  %v2224_v24 = vld [vmem:[#allocation2 + $0x108] sm:$0xff] }
 0x13e   : > { %v1930_v33 = vpop.f32.mrf.mxu2 }
 0x13f   : > { %v2432_v20 = vpop.f32.mrf.mxu3  ;;  %v1431_v31 = vpop.f32.mrf.mxu1  ;;  %v2723_v33 = vld [vmem:[#allocation2 + $0x2a0] sm:$0xff] }
 0x140   : > { %v1605_v50 = vadd.f32 %v1431_v31, %v6559_v62  ;;  %v704_v20 = vld [vmem:[#allocation2 + $0x102] sm:$0xff] }
 0x141   : > { %759 = vst.msk [vmem:[#allocation2 + $0x460] sm:$0xff] %vm439_vm1, %v704_v20 }
 0x142   : > { %5632 = vmatmul.msk.f32.gmra.mxu1 %vm439_vm1, %v2718_v29  ;;  %v2937_v36 = vpop.f32.mrf.mxu0  ;;  %v1718_v29 = vld [vmem:[#allocation2 + $0x430] sm:$0xff] }
 0x143   : > { %5682 = vmatmul.msk.f32.gmra.mxu2 %vm439_vm1, %v1717_v42 }
 0x144   : > { %5732 = vmatmul.msk.f32.gmra.mxu3 %vm439_vm1, %v2219_v34 }
 0x145   : > { %5782 = vmatmul.msk.f32.gmra.mxu0 %vm439_vm1, %v2721_v46 }
 0x146   : > { %v1933_v43 = vpop.f32.mrf.mxu2 }
 0x147   : > { %v2107_v55 = vadd.f32 %v1933_v43, %v1605_v50  ;;  %v2435_v8 = vpop.f32.mrf.mxu3  ;;  %v1434_v58 = vpop.f32.mrf.mxu1  ;;  %v2724_v50 = vld [vmem:[#allocation2 + $0x2a8] sm:$0xff] }
 0x148   : > { %v1606_v62 = vadd.f32 %v1434_v58, %v6574_v9  ;;  %v705_v43 = vld [vmem:[#allocation2 + $0x10a] sm:$0xff] }
 0x149   : > { %v2609_v63 = vadd.f32 %v2435_v8, %v2107_v55  ;;  %760 = vst.msk [vmem:[#allocation2 + $0x468] sm:$0xff] %vm439_vm1, %v705_v43 }
 0x14a   : > { %5633 = vmatmul.msk.f32.gmra.mxu1 %vm439_vm1, %v2719_v44  ;;  %v2940_v54 = vpop.f32.mrf.mxu0 }
 0x14b   : > { %v6679_v13 = vadd.f32 %v2937_v36, %v2609_v63  ;;  %5683 = vmatmul.msk.f32.gmra.mxu2 %vm439_vm1, %v1718_v29  ;;  %v595_v36 = vld [vmem:[#allocation2 + $0x119] sm:$0xff] }
 0x14c   : > { %5733 = vmatmul.msk.f32.gmra.mxu3 %vm439_vm1, %v2220_v2  ;;  %650 = vst.msk [vmem:[#allocation2 + $0x2c8] sm:$0xff] %vm439_vm1, %v595_v36  ;;  %v1723_v36 = vld [vmem:[#allocation2 + $0x458] sm:$0xff] }
 0x14d   : > { %5783 = vmatmul.msk.f32.gmra.mxu0 %vm439_vm1, %v2722_v18 }
 0x14e   : > { %v1936_v52 = vpop.f32.mrf.mxu2 }
 0x14f   : > { %v2108_v14 = vadd.f32 %v1936_v52, %v1606_v62  ;;  %v2438_v44 = vpop.f32.mrf.mxu3  ;;  %v1437_v16 = vpop.f32.mrf.mxu1  ;;  %v2725_v62 = vld [vmem:[#allocation2 + $0x2b0] sm:$0xff] }
 0x150   : > { %v706_v52 = vld [vmem:[#allocation2 + $0x112] sm:$0xff] }
 0x151   : > { %v2610_v30 = vadd.f32 %v2438_v44, %v2108_v14  ;;  %761 = vst.msk [vmem:[#allocation2 + $0x470] sm:$0xff] %vm439_vm1, %v706_v52 }
 0x152   : > { %5634 = vmatmul.msk.f32.gmra.mxu1 %vm439_vm1, %v2720_v1  ;;  %v2943_v32 = vpop.f32.mrf.mxu0  ;;  %v2222_v1 = vld [vmem:[#allocation2 + $0xf8] sm:$0xff] }
 0x153   : > { %v6688_v31 = vadd.f32 %v2940_v54, %v2610_v30  ;;  %5684 = vmatmul.msk.f32.gmra.mxu2 %vm439_vm1, %v1719_v19  ;;  %v596_v54 = vld [vmem:[#allocation2 + $0x121] sm:$0xff]  ;;  %v1722_v30 = vld [vmem:[#allocation2 + $0x450] sm:$0xff] }
 0x154   : > { %5734 = vmatmul.msk.f32.gmra.mxu3 %vm439_vm1, %v2221_v0  ;;  %651 = vst.msk [vmem:[#allocation2 + $0x2d0] sm:$0xff] %vm439_vm1, %v596_v54  ;;  %v597_v32 = vld [vmem:[#allocation2 + $0x129] sm:$0xff]  ;;  %v2226_v54 = vld [vmem:[#allocation2 + $0x118] sm:$0xff] }
 0x155   : > { %5784 = vmatmul.msk.f32.gmra.mxu0 %vm439_vm1, %v2723_v33  ;;  %652 = vst.msk [vmem:[#allocation2 + $0x2d8] sm:$0xff] %vm439_vm1, %v597_v32  ;;  %v2227_v32 = vld [vmem:[#allocation2 + $0x120] sm:$0xff] }
 0x156   : > { %v1939_v9 = vpop.f32.mrf.mxu2 }
 0x157   : > { %v2441_v42 = vpop.f32.mrf.mxu3  ;;  %v1440_v34 = vpop.f32.mrf.mxu1  ;;  %v2726_v9 = vld [vmem:[#allocation2 + $0x2b8] sm:$0xff] }
 0x158   : > { %v1608_v55 = vadd.f32 %v1440_v34, %v6445_v4  ;;  %v707_v42 = vld [vmem:[#allocation2 + $0x11a] sm:$0xff] }
 0x159   : > { %762 = vst.msk [vmem:[#allocation2 + $0x478] sm:$0xff] %vm439_vm1, %v707_v42 }
 0x15a   : > { %5635 = vmatmul.msk.f32.gmra.mxu1 %vm439_vm1, %v2721_v46  ;;  %v2946_v37 = vpop.f32.mrf.mxu0  ;;  %v1721_v46 = vld [vmem:[#allocation2 + $0x448] sm:$0xff] }
 0x15b   : > { %5685 = vmatmul.msk.f32.gmra.mxu2 %vm439_vm1, %v1720_v45 }
 0x15c   : > { %5735 = vmatmul.msk.f32.gmra.mxu3 %vm439_vm1, %v2222_v1 }
 0x15d   : > { %5785 = vmatmul.msk.f32.gmra.mxu0 %vm439_vm1, %v2724_v50 }
 0x15e   : > { %v1942_v8 = vpop.f32.mrf.mxu2 }
 0x15f   : > { %v2110_v58 = vadd.f32 %v1942_v8, %v1608_v55  ;;  %v2444_v29 = vpop.f32.mrf.mxu3  ;;  %v1443_v63 = vpop.f32.mrf.mxu1  ;;  %v2727_v55 = vld [vmem:[#allocation2 + $0x2c0] sm:$0xff] }
 0x160   : > { %v1609_v4 = vadd.f32 %v1443_v63, %v6460_v28  ;;  %v708_v8 = vld [vmem:[#allocation2 + $0x122] sm:$0xff] }
 0x161   : > { %v2612_v2 = vadd.f32 %v2444_v29, %v2110_v58  ;;  %763 = vst.msk [vmem:[#allocation2 + $0x480] sm:$0xff] %vm439_vm1, %v708_v8 }
 0x162   : > { %5636 = vmatmul.msk.f32.gmra.mxu1 %vm439_vm1, %v2722_v18  ;;  %v2949_v10 = vpop.f32.mrf.mxu0 }
 0x163   : > { %v6703_v14 = vadd.f32 %v2946_v37, %v2612_v2  ;;  %5686 = vmatmul.msk.f32.gmra.mxu2 %vm439_vm1, %v1721_v46  ;;  %v598_v37 = vld [vmem:[#allocation2 + $0x131] sm:$0xff] }
 0x164   : > { %5736 = vmatmul.msk.f32.gmra.mxu3 %vm439_vm1, %v2223_v17  ;;  %653 = vst.msk [vmem:[#allocation2 + $0x2e0] sm:$0xff] %vm439_vm1, %v598_v37  ;;  %v1726_v37 = vld [vmem:[#allocation2 + $0x470] sm:$0xff] }
 0x165   : > { %5786 = vmatmul.msk.f32.gmra.mxu0 %vm439_vm1, %v2725_v62 }
 0x166   : > { %v1945_v44 = vpop.f32.mrf.mxu2 }
 0x167   : > { %v2111_v16 = vadd.f32 %v1945_v44, %v1609_v4  ;;  %v2447_v18 = vpop.f32.mrf.mxu3  ;;  %v1446_v19 = vpop.f32.mrf.mxu1  ;;  %v2728_v4 = vld [vmem:[#allocation2 + $0x2c8] sm:$0xff] }
 0x168   : > { %v709_v44 = vld [vmem:[#allocation2 + $0x12a] sm:$0xff] }
 0x169   : > { %v2613_v0 = vadd.f32 %v2447_v18, %v2111_v16  ;;  %764 = vst.msk [vmem:[#allocation2 + $0x488] sm:$0xff] %vm439_vm1, %v709_v44 }
 0x16a   : > { %5637 = vmatmul.msk.f32.gmra.mxu1 %vm439_vm1, %v2723_v33  ;;  %v2952_v20 = vpop.f32.mrf.mxu0  ;;  %v2225_v33 = vld [vmem:[#allocation2 + $0x110] sm:$0xff] }
 0x16b   : > { %v6712_v34 = vadd.f32 %v2949_v10, %v2613_v0  ;;  %5687 = vmatmul.msk.f32.gmra.mxu2 %vm439_vm1, %v1722_v30  ;;  %v599_v10 = vld [vmem:[#allocation2 + $0x139] sm:$0xff]  ;;  %v1725_v0 = vld [vmem:[#allocation2 + $0x468] sm:$0xff] }
 0x16c   : > { %5737 = vmatmul.msk.f32.gmra.mxu3 %vm439_vm1, %v2224_v24  ;;  %654 = vst.msk [vmem:[#allocation2 + $0x2e8] sm:$0xff] %vm439_vm1, %v599_v10  ;;  %v600_v20 = vld [vmem:[#allocation2 + $0x141] sm:$0xff]  ;;  %v2229_v10 = vld [vmem:[#allocation2 + $0x130] sm:$0xff] }
 0x16d   : > { %5787 = vmatmul.msk.f32.gmra.mxu0 %vm439_vm1, %v2726_v9  ;;  %655 = vst.msk [vmem:[#allocation2 + $0x2f0] sm:$0xff] %vm439_vm1, %v600_v20  ;;  %v2230_v20 = vld [vmem:[#allocation2 + $0x138] sm:$0xff] }
 0x16e   : > { %v1948_v28 = vpop.f32.mrf.mxu2 }
 0x16f   : > { %v2450_v45 = vpop.f32.mrf.mxu3  ;;  %v1449_v1 = vpop.f32.mrf.mxu1  ;;  %v2729_v28 = vld [vmem:[#allocation2 + $0x2d0] sm:$0xff] }
 0x170   : > { %v1611_v58 = vadd.f32 %v1449_v1, %v6482_v47  ;;  %v710_v45 = vld [vmem:[#allocation2 + $0x132] sm:$0xff] }
 0x171   : > { %765 = vst.msk [vmem:[#allocation2 + $0x490] sm:$0xff] %vm439_vm1, %v710_v45 }
 0x172   : > { %5638 = vmatmul.msk.f32.gmra.mxu1 %vm439_vm1, %v2724_v50  ;;  %v2955_v43 = vpop.f32.mrf.mxu0  ;;  %v1724_v50 = vld [vmem:[#allocation2 + $0x460] sm:$0xff] }
 0x173   : > { %5688 = vmatmul.msk.f32.gmra.mxu2 %vm439_vm1, %v1723_v36 }
 0x174   : > { %5738 = vmatmul.msk.f32.gmra.mxu3 %vm439_vm1, %v2225_v33 }
 0x175   : > { %5788 = vmatmul.msk.f32.gmra.mxu0 %vm439_vm1, %v2727_v55 }
 0x176   : > { %v1951_v29 = vpop.f32.mrf.mxu2 }
 0x177   : > { %v2113_v63 = vadd.f32 %v1951_v29, %v1611_v58  ;;  %v2453_v46 = vpop.f32.mrf.mxu3  ;;  %v1452_v2 = vpop.f32.mrf.mxu1  ;;  %v2730_v58 = vld [vmem:[#allocation2 + $0x2d8] sm:$0xff] }
 0x178   : > { %v1612_v47 = vadd.f32 %v1452_v2, %v6497_v61  ;;  %v711_v29 = vld [vmem:[#allocation2 + $0x13a] sm:$0xff] }
 0x179   : > { %v2615_v17 = vadd.f32 %v2453_v46, %v2113_v63  ;;  %766 = vst.msk [vmem:[#allocation2 + $0x498] sm:$0xff] %vm439_vm1, %v711_v29 }
 0x17a   : > { %5639 = vmatmul.msk.f32.gmra.mxu1 %vm439_vm1, %v2725_v62  ;;  %v2958_v52 = vpop.f32.mrf.mxu0 }
 0x17b   : > { %v6727_v16 = vadd.f32 %v2955_v43, %v2615_v17  ;;  %5689 = vmatmul.msk.f32.gmra.mxu2 %vm439_vm1, %v1724_v50  ;;  %v601_v43 = vld [vmem:[#allocation2 + $0x149] sm:$0xff] }
 0x17c   : > { %5739 = vmatmul.msk.f32.gmra.mxu3 %vm439_vm1, %v2226_v54  ;;  %656 = vst.msk [vmem:[#allocation2 + $0x2f8] sm:$0xff] %vm439_vm1, %v601_v43  ;;  %v1729_v43 = vld [vmem:[#allocation2 + $0x488] sm:$0xff] }
 0x17d   : > { %5789 = vmatmul.msk.f32.gmra.mxu0 %vm439_vm1, %v2728_v4 }
 0x17e   : > { %v1954_v18 = vpop.f32.mrf.mxu2 }
 0x17f   : > { %v2114_v19 = vadd.f32 %v1954_v18, %v1612_v47  ;;  %v2456_v62 = vpop.f32.mrf.mxu3  ;;  %v1455_v30 = vpop.f32.mrf.mxu1  ;;  %v2731_v47 = vld [vmem:[#allocation2 + $0x2e0] sm:$0xff] }
 0x180   : > { %v712_v18 = vld [vmem:[#allocation2 + $0x142] sm:$0xff] }
 0x181   : > { %v2616_v24 = vadd.f32 %v2456_v62, %v2114_v19  ;;  %767 = vst.msk [vmem:[#allocation2 + $0x4a0] sm:$0xff] %vm439_vm1, %v712_v18 }
 0x182   : > { %5640 = vmatmul.msk.f32.gmra.mxu1 %vm439_vm1, %v2726_v9  ;;  %v2961_v42 = vpop.f32.mrf.mxu0  ;;  %v2228_v9 = vld [vmem:[#allocation2 + $0x128] sm:$0xff] }
 0x183   : > { %v6736_v1 = vadd.f32 %v2958_v52, %v2616_v24  ;;  %5690 = vmatmul.msk.f32.gmra.mxu2 %vm439_vm1, %v1725_v0  ;;  %v602_v52 = vld [vmem:[#allocation2 + $0x151] sm:$0xff]  ;;  %v1728_v24 = vld [vmem:[#allocation2 + $0x480] sm:$0xff] }
 0x184   : > { %5740 = vmatmul.msk.f32.gmra.mxu3 %vm439_vm1, %v2227_v32  ;;  %657 = vst.msk [vmem:[#allocation2 + $0x300] sm:$0xff] %vm439_vm1, %v602_v52  ;;  %v603_v42 = vld [vmem:[#allocation2 + $0x159] sm:$0xff]  ;;  %v2232_v52 = vld [vmem:[#allocation2 + $0x148] sm:$0xff] }
 0x185   : > { %5790 = vmatmul.msk.f32.gmra.mxu0 %vm439_vm1, %v2729_v28  ;;  %658 = vst.msk [vmem:[#allocation2 + $0x308] sm:$0xff] %vm439_vm1, %v603_v42  ;;  %v2233_v42 = vld [vmem:[#allocation2 + $0x150] sm:$0xff] }
 0x186   : > { %v1957_v61 = vpop.f32.mrf.mxu2 }
 0x187   : > { %v2459_v36 = vpop.f32.mrf.mxu3  ;;  %v1458_v33 = vpop.f32.mrf.mxu1  ;;  %v2732_v61 = vld [vmem:[#allocation2 + $0x2e8] sm:$0xff] }
 0x188   : > { %v1614_v63 = vadd.f32 %v1458_v33, %v6519_v60  ;;  %v713_v36 = vld [vmem:[#allocation2 + $0x14a] sm:$0xff] }
 0x189   : > { %768 = vst.msk [vmem:[#allocation2 + $0x4a8] sm:$0xff] %vm439_vm1, %v713_v36  ;;  %v548_v36 = vld [vmem:[%s6786_s26] sm:$0xff] }
 0x18a   : > { %5641 = vmatmul.msk.f32.gmra.mxu1 %vm439_vm1, %v2727_v55  ;;  %v2964_v8 = vpop.f32.mrf.mxu0  ;;  %v1727_v55 = vld [vmem:[#allocation2 + $0x478] sm:$0xff]  ;;  %551 = vst.msk [vmem:[#allocation2 + $0x180] sm:$0xff] %vm439_vm1, %v548_v36 }
 0x18b   : > { %5691 = vmatmul.msk.f32.gmra.mxu2 %vm439_vm1, %v1726_v37 }
 0x18c   : > { %5741 = vmatmul.msk.f32.gmra.mxu3 %vm439_vm1, %v2228_v9 }
 0x18d   : > { %5791 = vmatmul.msk.f32.gmra.mxu0 %vm439_vm1, %v2730_v58 }
 0x18e   : > { %v1960_v46 = vpop.f32.mrf.mxu2 }
 0x18f   : > { %v2116_v2 = vadd.f32 %v1960_v46, %v1614_v63  ;;  %v2462_v50 = vpop.f32.mrf.mxu3  ;;  %v1461_v17 = vpop.f32.mrf.mxu1  ;;  %v2733_v63 = vld [vmem:[#allocation2 + $0x2f0] sm:$0xff] }
 0x190   : > { %v1615_v60 = vadd.f32 %v1461_v17, %v6534_v26  ;;  %v714_v46 = vld [vmem:[#allocation2 + $0x152] sm:$0xff] }
 0x191   : > { %v2618_v54 = vadd.f32 %v2462_v50, %v2116_v2  ;;  %769 = vst.msk [vmem:[#allocation2 + $0x4b0] sm:$0xff] %vm439_vm1, %v714_v46  ;;  %v549_v46 = vld [vmem:[%s6786_s26 + $0x8] sm:$0xff] }
 0x192   : > { %5642 = vmatmul.msk.f32.gmra.mxu1 %vm439_vm1, %v2728_v4  ;;  %v2967_v44 = vpop.f32.mrf.mxu0  ;;  %552 = vst.msk [vmem:[#allocation2 + $0x188] sm:$0xff] %vm439_vm1, %v549_v46 }
 0x193   : > { %v6751_v19 = vadd.f32 %v2964_v8, %v2618_v54  ;;  %5692 = vmatmul.msk.f32.gmra.mxu2 %vm439_vm1, %v1727_v55  ;;  %v604_v8 = vld [vmem:[#allocation2 + $0x161] sm:$0xff]  ;;  %v1730_v54 = vld [vmem:[#allocation2 + $0x490] sm:$0xff] }
 0x194   : > { %5742 = vmatmul.msk.f32.gmra.mxu3 %vm439_vm1, %v2229_v10  ;;  %659 = vst.msk [vmem:[#allocation2 + $0x310] sm:$0xff] %vm439_vm1, %v604_v8  ;;  %v1732_v8 = vld [vmem:[#allocation2 + $0x4a0] sm:$0xff] }
 0x195   : > { %5792 = vmatmul.msk.f32.gmra.mxu0 %vm439_vm1, %v2731_v47 }
 0x196   : > { %v1963_v62 = vpop.f32.mrf.mxu2 }
 0x197   : > { %v2117_v30 = vadd.f32 %v1963_v62, %v1615_v60  ;;  %v2465_v4 = vpop.f32.mrf.mxu3  ;;  %v1464_v0 = vpop.f32.mrf.mxu1  ;;  %v2734_v60 = vld [vmem:[#allocation2 + $0x2f8] sm:$0xff] }
 0x198   : > { %v715_v62 = vld [vmem:[#allocation2 + $0x15a] sm:$0xff]  ;;  %v1734_v36 = vld [vmem:[#allocation2 + $0x4b0] sm:$0xff] }
 0x199   : > { %v2619_v32 = vadd.f32 %v2465_v4, %v2117_v30  ;;  %770 = vst.msk [vmem:[#allocation2 + $0x4b8] sm:$0xff] %vm439_vm1, %v715_v62  ;;  %v2235_v62 = vld [vmem:[#allocation2 + $0x160] sm:$0xff] }
 0x19a   : > { %5643 = vmatmul.msk.f32.gmra.mxu1 %vm439_vm1, %v2729_v28  ;;  %v2970_v45 = vpop.f32.mrf.mxu0  ;;  %v2231_v28 = vld [vmem:[#allocation2 + $0x140] sm:$0xff] }
 0x19b   : > { %v6760_v33 = vadd.f32 %v2967_v44, %v2619_v32  ;;  %5693 = vmatmul.msk.f32.gmra.mxu2 %vm439_vm1, %v1728_v24  ;;  %v605_v44 = vld [vmem:[#allocation2 + $0x169] sm:$0xff]  ;;  %v1731_v32 = vld [vmem:[#allocation2 + $0x498] sm:$0xff] }
 0x19c   : > { %5743 = vmatmul.msk.f32.gmra.mxu3 %vm439_vm1, %v2230_v20  ;;  %660 = vst.msk [vmem:[#allocation2 + $0x318] sm:$0xff] %vm439_vm1, %v605_v44  ;;  %v606_v45 = vld [vmem:[#allocation2 + $0x171] sm:$0xff]  ;;  %v1733_v44 = vld [vmem:[#allocation2 + $0x4a8] sm:$0xff] }
 0x19d   : > { %5793 = vmatmul.msk.f32.gmra.mxu0 %vm439_vm1, %v2732_v61  ;;  %661 = vst.msk [vmem:[#allocation2 + $0x320] sm:$0xff] %vm439_vm1, %v606_v45 }
 0x19e   : > { %v1966_v26 = vpop.f32.mrf.mxu2 }
 0x19f   : > { %v2468_v37 = vpop.f32.mrf.mxu3  ;;  %v1467_v9 = vpop.f32.mrf.mxu1  ;;  %v2735_v26 = vld [vmem:[#allocation2 + $0x300] sm:$0xff] }
 0x1a0   : > { %v1617_v2 = vadd.f32 %v1467_v9, %v6556_v53  ;;  %v716_v37 = vld [vmem:[#allocation2 + $0x162] sm:$0xff] }
 0x1a1   : > { %771 = vst.msk [vmem:[#allocation2 + $0x4c0] sm:$0xff] %vm439_vm1, %v716_v37  ;;  %v2236_v37 = vld [vmem:[#allocation2 + $0x168] sm:$0xff] }
 0x1a2   : > { %5644 = vmatmul.msk.f32.gmra.mxu1 %vm439_vm1, %v2730_v58  ;;  %v2973_v29 = vpop.f32.mrf.mxu0 }
 0x1a3   : > { %5694 = vmatmul.msk.f32.gmra.mxu2 %vm439_vm1, %v1729_v43 }
 0x1a4   : > { %5744 = vmatmul.msk.f32.gmra.mxu3 %vm439_vm1, %v2231_v28 }
 0x1a5   : > { %5794 = vmatmul.msk.f32.gmra.mxu0 %vm439_vm1, %v2733_v63 }
 0x1a6   : > { %v1969_v50 = vpop.f32.mrf.mxu2 }
 0x1a7   : > { %v2119_v17 = vadd.f32 %v1969_v50, %v1617_v2  ;;  %v2471_v55 = vpop.f32.mrf.mxu3  ;;  %v1470_v58 = vpop.f32.mrf.mxu1  ;;  %v2736_v50 = vld [vmem:[#allocation2 + $0x308] sm:$0xff] }
 0x1a8   : > { %v1618_v53 = vadd.f32 %v1470_v58, %v6571_v6 }
 0x1a9   : > { %v2621_v10 = vadd.f32 %v2471_v55, %v2119_v17  ;;  %v717_v17 = vld [vmem:[#allocation2 + $0x16a] sm:$0xff]  ;;  %v607_v55 = vld [vmem:[#allocation2 + $0x179] sm:$0xff] }
 0x1aa   : > { %5645 = vmatmul.msk.f32.gmra.mxu1 %vm439_vm1, %v2731_v47  ;;  %v2976_v18 = vpop.f32.mrf.mxu0  ;;  %772 = vst.msk [vmem:[#allocation2 + $0x4c8] sm:$0xff] %vm439_vm1, %v717_v17  ;;  %v1735_v17 = vld [vmem:[#allocation2 + $0x4b8] sm:$0xff] }
 0x1ab   : > { %v6775_v30 = vadd.f32 %v2973_v29, %v2621_v10  ;;  %5695 = vmatmul.msk.f32.gmra.mxu2 %vm439_vm1, %v1730_v54  ;;  %v2234_v29 = vld [vmem:[#allocation2 + $0x158] sm:$0xff]  ;;  %662 = vst.msk [vmem:[#allocation2 + $0x328] sm:$0xff] %vm439_vm1, %v607_v55  ;;  %v2237_v55 = vld [vmem:[#allocation2 + $0x170] sm:$0xff] }
 0x1ac   : > { %5745 = vmatmul.msk.f32.gmra.mxu3 %vm439_vm1, %v2232_v52 }
 0x1ad   : > { %5795 = vmatmul.msk.f32.gmra.mxu0 %vm439_vm1, %v2734_v60 }
 0x1ae   : > { %v1972_v4 = vpop.f32.mrf.mxu2 }
 0x1af   : > { %v2120_v47 = vadd.f32 %v1972_v4, %v1618_v53  ;;  %v2474_v0 = vpop.f32.mrf.mxu3  ;;  %v1473_v24 = vpop.f32.mrf.mxu1  ;;  %v608_v53 = vld [vmem:[#allocation2 + $0x181] sm:$0xff]  ;;  %v550_v4 = vld [vmem:[%s6786_s26 + $0x10] sm:$0xff] }
 0x1b0   : > { %663 = vst.msk [vmem:[#allocation2 + $0x330] sm:$0xff] %vm439_vm1, %v608_v53  ;;  %v718_v24 = vld [vmem:[#allocation2 + $0x172] sm:$0xff]  ;;  %v1736_v53 = vld [vmem:[#allocation2 + $0x4c0] sm:$0xff] }
 0x1b1   : > { %v2622_v20 = vadd.f32 %v2474_v0, %v2120_v47  ;;  %v2737_v0 = vld [vmem:[#allocation2 + $0x310] sm:$0xff]  ;;  %773 = vst.msk [vmem:[#allocation2 + $0x4d0] sm:$0xff] %vm439_vm1, %v718_v24 }
 0x1b2   : > { %5646 = vmatmul.msk.f32.gmra.mxu1 %vm439_vm1, %v2732_v61  ;;  %v2979_v6 = vpop.f32.mrf.mxu0  ;;  %553 = vst.msk [vmem:[#allocation2 + $0x190] sm:$0xff] %vm439_vm1, %v550_v4  ;;  %v2740_v24 = vld [vmem:[#allocation2 + $0x328] sm:$0xff] }
 0x1b3   : > { %v6791_v9 = vadd.f32 %v2976_v18, %v2622_v20  ;;  %5696 = vmatmul.msk.f32.gmra.mxu2 %vm439_vm1, %v1731_v32 }
 0x1b4   : > { %5746 = vmatmul.msk.f32.gmra.mxu3 %vm439_vm1, %v2233_v42 }
 0x1b5   : > { %5796 = vmatmul.msk.f32.gmra.mxu0 %vm439_vm1, %v2735_v26 }
 0x1b6   : > { %v1975_v43 = vpop.f32.mrf.mxu2 }
 0x1b7   : > { %v2477_v61 = vpop.f32.mrf.mxu3  ;;  %v1476_v28 = vpop.f32.mrf.mxu1  ;;  %v554_v43 = vld [vmem:[%s6822_s30] sm:$0xff] }
 0x1b8   : > { %v1620_v58 = vadd.f32 %v1476_v28, %v6456_v12  ;;  %v719_v28 = vld [vmem:[#allocation2 + $0x17a] sm:$0xff]  ;;  %557 = vst.msk [vmem:[#allocation2 + $0x198] sm:$0xff] %vm439_vm1, %v554_v43  ;;  %v2741_v43 = vld [vmem:[#allocation2 + $0x330] sm:$0xff] }
 0x1b9   : > { %774 = vst.msk [vmem:[#allocation2 + $0x4d8] sm:$0xff] %vm439_vm1, %v719_v28 }
 0x1ba   : > { %5647 = vmatmul.msk.f32.gmra.mxu1 %vm439_vm1, %v2733_v63  ;;  %v2982_v2 = vpop.f32.mrf.mxu0 }
 0x1bb   : > { %5697 = vmatmul.msk.f32.gmra.mxu2 %vm439_vm1, %v1732_v8 }
 0x1bc   : > { %5747 = vmatmul.msk.f32.gmra.mxu3 %vm439_vm1, %v2234_v29  ;;  %v609_v29 = vld [vmem:[#allocation2 + $0x189] sm:$0xff] }
 0x1bd   : > { %5797 = vmatmul.msk.f32.gmra.mxu0 %vm439_vm1, %v2736_v50  ;;  %664 = vst.msk [vmem:[#allocation2 + $0x338] sm:$0xff] %vm439_vm1, %v609_v29 }
 0x1be   : > { %v1978_v63 = vpop.f32.mrf.mxu2 }
 0x1bf   : > { %v2122_v54 = vadd.f32 %v1978_v63, %v1620_v58  ;;  %v2480_v10 = vpop.f32.mrf.mxu3  ;;  %v1479_v52 = vpop.f32.mrf.mxu1  ;;  %v610_v58 = vld [vmem:[#allocation2 + $0x191] sm:$0xff] }
 0x1c0   : > { %v1621_v32 = vadd.f32 %v1479_v52, %v6471_v21  ;;  %v2738_v21 = vld [vmem:[#allocation2 + $0x318] sm:$0xff]  ;;  %665 = vst.msk [vmem:[#allocation2 + $0x340] sm:$0xff] %vm439_vm1, %v610_v58 }
 0x1c1   : > { %v2624_v18 = vadd.f32 %v2480_v10, %v2122_v54  ;;  %v2739_v54 = vld [vmem:[#allocation2 + $0x320] sm:$0xff] }
 0x1c2   : > { %5648 = vmatmul.msk.f32.gmra.mxu1 %vm439_vm1, %v2734_v60  ;;  %v2985_v47 = vpop.f32.mrf.mxu0 }
 0x1c3   : > { %v6810_v12 = vadd.f32 %v2982_v2, %v2624_v18  ;;  %5698 = vmatmul.msk.f32.gmra.mxu2 %vm439_vm1, %v1733_v44 }
 0x1c4   : > { %5748 = vmatmul.msk.f32.gmra.mxu3 %vm439_vm1, %v2235_v62 }
 0x1c5   : > { %5798 = vmatmul.msk.f32.gmra.mxu0 %vm439_vm1, %v2737_v0 }
 0x1c6   : > { %v1981_v60 = vpop.f32.mrf.mxu2 }
 0x1c7   : > { %v2123_v20 = vadd.f32 %v1981_v60, %v1621_v32  ;;  %v2483_v42 = vpop.f32.mrf.mxu3  ;;  %v1482_v45 = vpop.f32.mrf.mxu1 }
 0x1c9   : > { %v2625_v6 = vadd.f32 %v2483_v42, %v2123_v20 }
 0x1ca   : > { %5649 = vmatmul.msk.f32.gmra.mxu1 %vm439_vm1, %v2735_v26  ;;  %v2988_v61 = vpop.f32.mrf.mxu0 }
 0x1cb   : > { %v6827_v8 = vadd.f32 %v2985_v47, %v2625_v6  ;;  %5699 = vmatmul.msk.f32.gmra.mxu2 %vm439_vm1, %v1734_v36  ;;  %v2238_v47 = vld [vmem:[#allocation2 + $0x178] sm:$0xff]  ;;  %v1737_v36 = vld [vmem:[#allocation2 + $0x4c8] sm:$0xff] }
 0x1cc   : > { %5749 = vmatmul.msk.f32.gmra.mxu3 %vm439_vm1, %v2236_v37  ;;  %v2239_v37 = vld [vmem:[#allocation2 + $0x180] sm:$0xff] }
 0x1cd   : > { %5799 = vmatmul.msk.f32.gmra.mxu0 %vm439_vm1, %v2738_v21 }
 0x1ce   : > { %v1984_v46 = vpop.f32.mrf.mxu2 }
 0x1cf   : > { %v2486_v26 = vpop.f32.mrf.mxu3  ;;  %v1485_v2 = vpop.f32.mrf.mxu1  ;;  %v1738_v46 = vld [vmem:[#allocation2 + $0x4d0] sm:$0xff] }
 0x1d0   : > { %v1623_v10 = vadd.f32 %v1485_v2, %v6493_v41  ;;  %v2240_v26 = vld [vmem:[#allocation2 + $0x188] sm:$0xff] }
 0x1d2   : > { %5650 = vmatmul.msk.f32.gmra.mxu1 %vm439_vm1, %v2736_v50  ;;  %v2991_v63 = vpop.f32.mrf.mxu0 }
 0x1d3   : > { %5700 = vmatmul.msk.f32.gmra.mxu2 %vm439_vm1, %v1735_v17  ;;  %v2742_v17 = vld [vmem:[#allocation2 + $0x338] sm:$0xff] }
 0x1d4   : > { %5750 = vmatmul.msk.f32.gmra.mxu3 %vm439_vm1, %v2237_v55 }
 0x1d5   : > { %5800 = vmatmul.msk.f32.gmra.mxu0 %vm439_vm1, %v2739_v54 }
 0x1d6   : > { %v1987_v52 = vpop.f32.mrf.mxu2 }
 0x1d7   : > { %v2125_v44 = vadd.f32 %v1987_v52, %v1623_v10  ;;  %v2489_v18 = vpop.f32.mrf.mxu3  ;;  %v1488_v62 = vpop.f32.mrf.mxu1  ;;  %v1739_v52 = vld [vmem:[#allocation2 + $0x4d8] sm:$0xff] }
 0x1d8   : > { %v1624_v41 = vadd.f32 %v1488_v62, %v6508_v49  ;;  %v2743_v62 = vld [vmem:[#allocation2 + $0x340] sm:$0xff] }
 0x1d9   : > { %v2627_v4 = vadd.f32 %v2489_v18, %v2125_v44  ;;  %v2241_v18 = vld [vmem:[#allocation2 + $0x190] sm:$0xff] }
 0x1da   : > { %5651 = vmatmul.msk.f32.gmra.mxu1 %vm439_vm1, %v2737_v0  ;;  %v2994_v50 = vpop.f32.mrf.mxu0 }
 0x1db   : > { %v6841_v32 = vadd.f32 %v2991_v63, %v2627_v4  ;;  %5701 = vmatmul.msk.f32.gmra.mxu2 %vm439_vm1, %v1736_v53 }
 0x1dc   : > { %5751 = vmatmul.msk.f32.gmra.mxu3 %vm439_vm1, %v2238_v47 }
 0x1dd   : > { %5801 = vmatmul.msk.f32.gmra.mxu0 %vm439_vm1, %v2740_v24 }
 0x1de   : > { %v1990_v60 = vpop.f32.mrf.mxu2 }
 0x1df   : > { %v2126_v20 = vadd.f32 %v1990_v60, %v1624_v41  ;;  %v2492_v42 = vpop.f32.mrf.mxu3  ;;  %v1491_v45 = vpop.f32.mrf.mxu1  ;;  %v3198_v60 = vld [vmem:[#allocation2 + $0x378] sm:$0xff] }
 0x1e1   : > { %v2628_v6 = vadd.f32 %v2492_v42, %v2126_v20  ;;  %v3700_v20 = vld [vmem:[#allocation2 + $0x30] sm:$0xff] }
 0x1e2   : > { %5652 = vmatmul.msk.f32.gmra.mxu1 %vm439_vm1, %v2738_v21  ;;  %v2997_v0 = vpop.f32.mrf.mxu0 }
 0x1e3   : > { %v6848_v61 = vadd.f32 %v2994_v50, %v2628_v6  ;;  %5702 = vmatmul.msk.f32.gmra.mxu2 %vm439_vm1, %v1737_v36  ;;  %v4704_v36 = vld [vmem:[#allocation2 + $0x390] sm:$0xff] }
 0x1e4   : > { %5752 = vmatmul.msk.f32.gmra.mxu3 %vm439_vm1, %v2239_v37 }
 0x1e5   : > { %5802 = vmatmul.msk.f32.gmra.mxu0 %vm439_vm1, %v2741_v43  ;;  %v3199_v43 = vld [vmem:[#allocation2 + $0x380] sm:$0xff] }
 0x1e6   : > { %v1993_v49 = vpop.f32.mrf.mxu2 }
 0x1e7   : > { %v2495_v28 = vpop.f32.mrf.mxu3  ;;  %v1494_v29 = vpop.f32.mrf.mxu1  ;;  %v3701_v49 = vld [vmem:[#allocation2 + $0x38] sm:$0xff] }
 0x1e8   : > { %v1626_v21 = vadd.f32 %v1494_v29, %v6530_v15  ;;  %v4203_v28 = vld [vmem:[#allocation2 + $0x1e8] sm:$0xff] }
 0x1ea   : > { %5653 = vmatmul.msk.f32.gmra.mxu1 %vm439_vm1, %v2739_v54  ;;  %v3000_v2 = vpop.f32.mrf.mxu0 }
 0x1eb   : > { %5703 = vmatmul.msk.f32.gmra.mxu2 %vm439_vm1, %v1738_v46  ;;  %v4705_v46 = vld [vmem:[#allocation2 + $0x398] sm:$0xff] }
 0x1ec   : > { %5753 = vmatmul.msk.f32.gmra.mxu3 %vm439_vm1, %v2240_v26 }
 0x1ed   : > { %5803 = vmatmul.msk.f32.gmra.mxu0 %vm439_vm1, %v2742_v17 }
 0x1ee   : > { %v1996_v55 = vpop.f32.mrf.mxu2 }
 0x1ef   : > { %v2128_v58 = vadd.f32 %v1996_v55, %v1626_v21  ;;  %v2498_v63 = vpop.f32.mrf.mxu3  ;;  %v1497_v10 = vpop.f32.mrf.mxu1 }
 0x1f0   : > { %v1627_v15 = vadd.f32 %v1497_v10, %v6545_v25 }
 0x1f1   : > { %v2630_v44 = vadd.f32 %v2498_v63, %v2128_v58  ;;  %v3200_v58 = vld [vmem:[#allocation2 + $0x388] sm:$0xff]  ;;  %v3702_v63 = vld [vmem:[#allocation2 + $0x40] sm:$0xff] }
 0x1f2   : > { %5654 = vmatmul.msk.f32.gmra.mxu1 %vm439_vm1, %v2740_v24  ;;  %v3003_v54 = vpop.f32.mrf.mxu0  ;;  %v4202_v24 = vld [vmem:[#allocation2 + $0x1e0] sm:$0xff] }
 0x1f3   : > { %v6859_v53 = vadd.f32 %v3000_v2, %v2630_v44  ;;  %5704 = vmatmul.msk.f32.gmra.mxu2 %vm439_vm1, %v1739_v52  ;;  %v4204_v52 = vld [vmem:[#allocation2 + $0x1f0] sm:$0xff] }
 0x1f4   : > { %5754 = vmatmul.msk.f32.gmra.mxu3 %vm439_vm1, %v2241_v18  ;;  %v4706_v18 = vld [vmem:[#allocation2 + $0x3a0] sm:$0xff] }
 0x1f5   : > { %5804 = vmatmul.msk.f32.gmra.mxu0 %vm439_vm1, %v2743_v62 }
 0x1f6   : > { %v1999_v4 = vpop.f32.mrf.mxu2 }
 0x1f7   : > { %v2129_v47 = vadd.f32 %v1999_v4, %v1627_v15  ;;  %v2501_v50 = vpop.f32.mrf.mxu3  ;;  %v1500_v41 = vpop.f32.mrf.mxu1 }
 0x1f9   : > { %v2631_v42 = vadd.f32 %v2501_v50, %v2129_v47  ;;  %v3703_v50 = vld [vmem:[#allocation2 + $0x48] sm:$0xff] }
 0x1fa   : > { %5807 = vmatmul.msk.f32.vlgmr.msra.gmra.mxu1 %vm439_vm1, %v3198_v60  ;;  %v3006_v45 = vpop.f32.mrf.mxu0  ;;  %v4205_v60 = vld [vmem:[#allocation2 + $0x1f8] sm:$0xff] }
 0x1fb   : > { %v6866_v6 = vadd.f32 %v3003_v54, %v2631_v42  ;;  %5857 = vmatmul.msk.f32.vlgmr.msra.gmra.mxu2 %vm439_vm1, %v3700_v20  ;;  %v4707_v42 = vld [vmem:[#allocation2 + $0x3a8] sm:$0xff] }
 0x1fc   : > { %5907 = vmatmul.msk.f32.vlgmr.msra.gmra.mxu3 %vm439_vm1, %v4202_v24 }
 0x1fd   : > { %5957 = vmatmul.msk.f32.vlgmr.msra.gmra.mxu0 %vm439_vm1, %v4704_v36 }
 0x1fe   : > { %v2002_v25 = vpop.f32.mrf.mxu2 }
 0x1ff   : > { %v2504_v37 = vpop.f32.mrf.mxu3  ;;  %v1503_v0 = vpop.f32.mrf.mxu1 }
 0x200   : > { %v1629_v26 = vadd.f32 %v1503_v0, %v6567_v48  ;;  %v3704_v37 = vld [vmem:[#allocation2 + $0x50] sm:$0xff]  ;;  %v4206_v0 = vld [vmem:[#allocation2 + $0x200] sm:$0xff] }
 0x202   : > { %5808 = vmatmul.msk.f32.gmra.mxu1 %vm439_vm1, %v3199_v43  ;;  %v3009_v29 = vpop.f32.mrf.mxu0 }
 0x203   : > { %5858 = vmatmul.msk.f32.gmra.mxu2 %vm439_vm1, %v3701_v49  ;;  %v4708_v49 = vld [vmem:[#allocation2 + $0x3b0] sm:$0xff] }
 0x204   : > { %5908 = vmatmul.msk.f32.gmra.mxu3 %vm439_vm1, %v4203_v28 }
 0x205   : > { %5958 = vmatmul.msk.f32.gmra.mxu0 %vm439_vm1, %v4705_v46 }
 0x206   : > { %v2005_v2 = vpop.f32.mrf.mxu2 }
 0x207   : > { %v2131_v17 = vadd.f32 %v2005_v2, %v1629_v26  ;;  %v2507_v21 = vpop.f32.mrf.mxu3  ;;  %v1506_v55 = vpop.f32.mrf.mxu1 }
 0x208   : > { %v1630_v48 = vadd.f32 %v1506_v55, %v6582_v56  ;;  %v4207_v55 = vld [vmem:[#allocation2 + $0x208] sm:$0xff] }
 0x209   : > { %v2633_v10 = vadd.f32 %v2507_v21, %v2131_v17  ;;  %v3705_v17 = vld [vmem:[#allocation2 + $0x58] sm:$0xff] }
 0x20a   : > { %5809 = vmatmul.msk.f32.gmra.mxu1 %vm439_vm1, %v3200_v58  ;;  %v3012_v44 = vpop.f32.mrf.mxu0  ;;  %v4709_v58 = vld [vmem:[#allocation2 + $0x3b8] sm:$0xff] }
 0x20b   : > { %v6877_v54 = vadd.f32 %v3009_v29, %v2633_v10  ;;  %5859 = vmatmul.msk.f32.gmra.mxu2 %vm439_vm1, %v3702_v63 }
 0x20c   : > { %5909 = vmatmul.msk.f32.gmra.mxu3 %vm439_vm1, %v4204_v52 }
 0x20d   : > { %5959 = vmatmul.msk.f32.gmra.mxu0 %vm439_vm1, %v4706_v18 }
 0x20e   : > { %v2008_v62 = vpop.f32.mrf.mxu2 }
 0x20f   : > { %v2132_v15 = vadd.f32 %v2008_v62, %v1630_v48  ;;  %v2510_v4 = vpop.f32.mrf.mxu3  ;;  %v1509_v47 = vpop.f32.mrf.mxu1  ;;  %v3706_v62 = vld [vmem:[#allocation2 + $0x60] sm:$0xff] }
 0x210   : > { %v4710_v47 = vld [vmem:[#allocation2 + $0x3c0] sm:$0xff] }
 0x211   : > { %v2634_v41 = vadd.f32 %v2510_v4, %v2132_v15  ;;  %v4208_v4 = vld [vmem:[#allocation2 + $0x210] sm:$0xff] }
 0x212   : > { %5810 = vmatmul.msk.f32.gmra.mxu1 %vm439_vm1, %v4704_v36  ;;  %v3015_v20 = vpop.f32.mrf.mxu0 }
 0x213   : > { %v6884_v24 = vadd.f32 %v3012_v44, %v2634_v41  ;;  %5860 = vmatmul.msk.f32.gmra.mxu2 %vm439_vm1, %v3703_v50  ;;  %v3707_v20 = vld [vmem:[#allocation2 + $0x68] sm:$0xff] }
 0x214   : > { %5910 = vmatmul.msk.f32.gmra.mxu3 %vm439_vm1, %v4205_v60 }
 0x215   : > { %5960 = vmatmul.msk.f32.gmra.mxu0 %vm439_vm1, %v4707_v42 }
 0x216   : > { %v2011_v56 = vpop.f32.mrf.mxu2 }
 0x217   : > { %v2513_v45 = vpop.f32.mrf.mxu3  ;;  %v1512_v25 = vpop.f32.mrf.mxu1  ;;  %v4209_v56 = vld [vmem:[#allocation2 + $0x218] sm:$0xff] }
 0x218   : > { %v1632_v36 = vadd.f32 %v1512_v25, %v6458_v27  ;;  %v4711_v25 = vld [vmem:[#allocation2 + $0x3c8] sm:$0xff] }
 0x21a   : > { %5811 = vmatmul.msk.f32.gmra.mxu1 %vm439_vm1, %v4705_v46  ;;  %v3018_v43 = vpop.f32.mrf.mxu0 }
 0x21b   : > { %5861 = vmatmul.msk.f32.gmra.mxu2 %vm439_vm1, %v3704_v37 }
 0x21c   : > { %5911 = vmatmul.msk.f32.gmra.mxu3 %vm439_vm1, %v4206_v0 }
 0x21d   : > { %5961 = vmatmul.msk.f32.gmra.mxu0 %vm439_vm1, %v4708_v49 }
 0x21e   : > { %v2014_v28 = vpop.f32.mrf.mxu2 }
 0x21f   : > { %v2134_v29 = vadd.f32 %v2014_v28, %v1632_v36  ;;  %v2516_v26 = vpop.f32.mrf.mxu3  ;;  %v1515_v2 = vpop.f32.mrf.mxu1  ;;  %v3708_v28 = vld [vmem:[#allocation2 + $0x70] sm:$0xff] }
 0x220   : > { %v1633_v27 = vadd.f32 %v1515_v2, %v6473_v35  ;;  %v4712_v2 = vld [vmem:[#allocation2 + $0x3d0] sm:$0xff] }
 0x221   : > { %v2636_v21 = vadd.f32 %v2516_v26, %v2134_v29  ;;  %v4210_v26 = vld [vmem:[#allocation2 + $0x220] sm:$0xff] }
 0x222   : > { %5812 = vmatmul.msk.f32.gmra.mxu1 %vm439_vm1, %v4706_v18  ;;  %v3021_v46 = vpop.f32.mrf.mxu0 }
 0x223   : > { %v6895_v63 = vadd.f32 %v3018_v43, %v2636_v21  ;;  %5862 = vmatmul.msk.f32.gmra.mxu2 %vm439_vm1, %v3705_v17 }
 0x224   : > { %5912 = vmatmul.msk.f32.gmra.mxu3 %vm439_vm1, %v4207_v55 }
 0x225   : > { %5962 = vmatmul.msk.f32.gmra.mxu0 %vm439_vm1, %v4709_v58 }
 0x226   : > { %v2017_v10 = vpop.f32.mrf.mxu2 }
 0x227   : > { %v2135_v52 = vadd.f32 %v2017_v10, %v1633_v27  ;;  %v2519_v44 = vpop.f32.mrf.mxu3  ;;  %v1518_v48 = vpop.f32.mrf.mxu1  ;;  %v3709_v10 = vld [vmem:[#allocation2 + $0x78] sm:$0xff] }
 0x228   : > { %v4713_v48 = vld [vmem:[#allocation2 + $0x3d8] sm:$0xff] }
 0x229   : > { %v2637_v15 = vadd.f32 %v2519_v44, %v2135_v52  ;;  %v4211_v44 = vld [vmem:[#allocation2 + $0x228] sm:$0xff] }
 0x22a   : > { %5813 = vmatmul.msk.f32.gmra.mxu1 %vm439_vm1, %v4707_v42  ;;  %v3024_v18 = vpop.f32.mrf.mxu0 }
 0x22b   : > { %v6902_v50 = vadd.f32 %v3021_v46, %v2637_v15  ;;  %5863 = vmatmul.msk.f32.gmra.mxu2 %vm439_vm1, %v3706_v62  ;;  %v3710_v18 = vld [vmem:[#allocation2 + $0x80] sm:$0xff] }
 0x22c   : > { %5913 = vmatmul.msk.f32.gmra.mxu3 %vm439_vm1, %v4208_v4 }
 0x22d   : > { %5963 = vmatmul.msk.f32.gmra.mxu0 %vm439_vm1, %v4710_v47 }
 0x22e   : > { %v2020_v35 = vpop.f32.mrf.mxu2 }
 0x22f   : > { %v2522_v41 = vpop.f32.mrf.mxu3  ;;  %v1521_v60 = vpop.f32.mrf.mxu1  ;;  %v4212_v35 = vld [vmem:[#allocation2 + $0x230] sm:$0xff] }
 0x230   : > { %v1635_v42 = vadd.f32 %v1521_v60, %v6495_v59  ;;  %v4714_v60 = vld [vmem:[#allocation2 + $0x3e0] sm:$0xff] }
 0x232   : > { %5814 = vmatmul.msk.f32.gmra.mxu1 %vm439_vm1, %v4708_v49  ;;  %v3027_v45 = vpop.f32.mrf.mxu0 }
 0x233   : > { %5864 = vmatmul.msk.f32.gmra.mxu2 %vm439_vm1, %v3707_v20 }
 0x234   : > { %5914 = vmatmul.msk.f32.gmra.mxu3 %vm439_vm1, %v4209_v56 }
 0x235   : > { %5964 = vmatmul.msk.f32.gmra.mxu0 %vm439_vm1, %v4711_v25 }
 0x236   : > { %v2023_v37 = vpop.f32.mrf.mxu2 }
 0x237   : > { %v2137_v0 = vadd.f32 %v2023_v37, %v1635_v42  ;;  %v2525_v43 = vpop.f32.mrf.mxu3  ;;  %v1524_v36 = vpop.f32.mrf.mxu1  ;;  %v3711_v37 = vld [vmem:[#allocation2 + $0x88] sm:$0xff] }
 0x238   : > { %v1636_v59 = vadd.f32 %v1524_v36, %v6510_v5  ;;  %v4715_v36 = vld [vmem:[#allocation2 + $0x3e8] sm:$0xff] }
 0x239   : > { %v2639_v29 = vadd.f32 %v2525_v43, %v2137_v0  ;;  %v4213_v43 = vld [vmem:[#allocation2 + $0x238] sm:$0xff] }
 0x23a   : > { %5815 = vmatmul.msk.f32.gmra.mxu1 %vm439_vm1, %v4709_v58  ;;  %v3030_v49 = vpop.f32.mrf.mxu0 }
 0x23b   : > { %v6913_v17 = vadd.f32 %v3027_v45, %v2639_v29  ;;  %5865 = vmatmul.msk.f32.gmra.mxu2 %vm439_vm1, %v3708_v28 }
 0x23c   : > { %5915 = vmatmul.msk.f32.gmra.mxu3 %vm439_vm1, %v4210_v26 }
 0x23d   : > { %5965 = vmatmul.msk.f32.gmra.mxu0 %vm439_vm1, %v4712_v2 }
 0x23e   : > { %v2026_v21 = vpop.f32.mrf.mxu2 }
 0x23f   : > { %v2138_v55 = vadd.f32 %v2026_v21, %v1636_v59  ;;  %v2528_v46 = vpop.f32.mrf.mxu3  ;;  %v1527_v27 = vpop.f32.mrf.mxu1  ;;  %v3712_v21 = vld [vmem:[#allocation2 + $0x90] sm:$0xff] }
 0x240   : > { %v4716_v27 = vld [vmem:[#allocation2 + $0x3f0] sm:$0xff] }
 0x241   : > { %v2640_v52 = vadd.f32 %v2528_v46, %v2138_v55  ;;  %v4214_v46 = vld [vmem:[#allocation2 + $0x240] sm:$0xff] }
 0x242   : > { %5816 = vmatmul.msk.f32.gmra.mxu1 %vm439_vm1, %v4710_v47  ;;  %v3033_v58 = vpop.f32.mrf.mxu0 }
 0x243   : > { %v6920_v62 = vadd.f32 %v3030_v49, %v2640_v52  ;;  %5866 = vmatmul.msk.f32.gmra.mxu2 %vm439_vm1, %v3709_v10  ;;  %v3713_v58 = vld [vmem:[#allocation2 + $0x98] sm:$0xff] }
 0x244   : > { %5916 = vmatmul.msk.f32.gmra.mxu3 %vm439_vm1, %v4211_v44 }
 0x245   : > { %5966 = vmatmul.msk.f32.gmra.mxu0 %vm439_vm1, %v4713_v48 }
 0x246   : > { %v2029_v5 = vpop.f32.mrf.mxu2 }
 0x247   : > { %v2531_v15 = vpop.f32.mrf.mxu3  ;;  %v1530_v4 = vpop.f32.mrf.mxu1  ;;  %v4215_v5 = vld [vmem:[#allocation2 + $0x248] sm:$0xff] }
 0x248   : > { %v1638_v47 = vadd.f32 %v1530_v4, %v6532_v23  ;;  %v4717_v4 = vld [vmem:[#allocation2 + $0x3f8] sm:$0xff] }
 0x24a   : > { %5817 = vmatmul.msk.f32.gmra.mxu1 %vm439_vm1, %v4711_v25  ;;  %v3036_v41 = vpop.f32.mrf.mxu0 }
 0x24b   : > { %5867 = vmatmul.msk.f32.gmra.mxu2 %vm439_vm1, %v3710_v18 }
 0x24c   : > { %5917 = vmatmul.msk.f32.gmra.mxu3 %vm439_vm1, %v4212_v35 }
 0x24d   : > { %5967 = vmatmul.msk.f32.gmra.mxu0 %vm439_vm1, %v4714_v60 }
 0x24e   : > { %v2032_v20 = vpop.f32.mrf.mxu2 }
 0x24f   : > { %v2140_v56 = vadd.f32 %v2032_v20, %v1638_v47  ;;  %v2534_v45 = vpop.f32.mrf.mxu3  ;;  %v1533_v42 = vpop.f32.mrf.mxu1  ;;  %v3714_v20 = vld [vmem:[#allocation2 + $0xa0] sm:$0xff] }
 0x250   : > { %v1639_v23 = vadd.f32 %v1533_v42, %v6547_v39  ;;  %v4718_v42 = vld [vmem:[#allocation2 + $0x400] sm:$0xff] }
 0x251   : > { %v2642_v0 = vadd.f32 %v2534_v45, %v2140_v56  ;;  %v4216_v45 = vld [vmem:[#allocation2 + $0x250] sm:$0xff] }
 0x252   : > { %5818 = vmatmul.msk.f32.gmra.mxu1 %vm439_vm1, %v4712_v2  ;;  %v3039_v25 = vpop.f32.mrf.mxu0 }
 0x253   : > { %v6931_v28 = vadd.f32 %v3036_v41, %v2642_v0  ;;  %5868 = vmatmul.msk.f32.gmra.mxu2 %vm439_vm1, %v3711_v37 }
 0x254   : > { %5918 = vmatmul.msk.f32.gmra.mxu3 %vm439_vm1, %v4213_v43 }
 0x255   : > { %5968 = vmatmul.msk.f32.gmra.mxu0 %vm439_vm1, %v4715_v36 }
 0x256   : > { %v2035_v29 = vpop.f32.mrf.mxu2 }
 0x257   : > { %v2141_v26 = vadd.f32 %v2035_v29, %v1639_v23  ;;  %v2537_v49 = vpop.f32.mrf.mxu3  ;;  %v1536_v59 = vpop.f32.mrf.mxu1  ;;  %v3715_v29 = vld [vmem:[#allocation2 + $0xa8] sm:$0xff] }
 0x258   : > { %v4719_v59 = vld [vmem:[#allocation2 + $0x408] sm:$0xff] }
 0x259   : > { %v2643_v55 = vadd.f32 %v2537_v49, %v2141_v26  ;;  %v4217_v49 = vld [vmem:[#allocation2 + $0x258] sm:$0xff] }
 0x25a   : > { %5819 = vmatmul.msk.f32.gmra.mxu1 %vm439_vm1, %v4713_v48  ;;  %v3042_v2 = vpop.f32.mrf.mxu0 }
 0x25b   : > { %v6938_v10 = vadd.f32 %v3039_v25, %v2643_v55  ;;  %5869 = vmatmul.msk.f32.gmra.mxu2 %vm439_vm1, %v3712_v21  ;;  %v3716_v2 = vld [vmem:[#allocation2 + $0xb0] sm:$0xff] }
 0x25c   : > { %5919 = vmatmul.msk.f32.gmra.mxu3 %vm439_vm1, %v4214_v46 }
 0x25d   : > { %5969 = vmatmul.msk.f32.gmra.mxu0 %vm439_vm1, %v4716_v27 }
 0x25e   : > { %v2038_v39 = vpop.f32.mrf.mxu2 }
 0x25f   : > { %v2540_v52 = vpop.f32.mrf.mxu3  ;;  %v1539_v44 = vpop.f32.mrf.mxu1  ;;  %v4218_v39 = vld [vmem:[#allocation2 + $0x260] sm:$0xff] }
 0x260   : > { %v1641_v48 = vadd.f32 %v1539_v44, %v6569_v3 }
 0x262   : > { %5820 = vmatmul.msk.f32.gmra.mxu1 %vm439_vm1, %v4714_v60  ;;  %v3045_v15 = vpop.f32.mrf.mxu0 }
 0x263   : > { %5870 = vmatmul.msk.f32.gmra.mxu2 %vm439_vm1, %v3713_v58 }
 0x264   : > { %5920 = vmatmul.msk.f32.gmra.mxu3 %vm439_vm1, %v4215_v5 }
 0x265   : > { %5970 = vmatmul.msk.f32.gmra.mxu0 %vm439_vm1, %v4717_v4 }
 0x266   : > { %v2041_v18 = vpop.f32.mrf.mxu2 }
 0x267   : > { %v2143_v35 = vadd.f32 %v2041_v18, %v1641_v48  ;;  %v2543_v41 = vpop.f32.mrf.mxu3  ;;  %v1542_v47 = vpop.f32.mrf.mxu1  ;;  %v3717_v18 = vld [vmem:[#allocation2 + $0xb8] sm:$0xff] }
 0x268   : > { %v1642_v3 = vadd.f32 %v1542_v47, %v6584_v57 }
 0x269   : > { %v2645_v56 = vadd.f32 %v2543_v41, %v2143_v35  ;;  %v4219_v41 = vld [vmem:[#allocation2 + $0x268] sm:$0xff] }
 0x26a   : > { %5821 = vmatmul.msk.f32.gmra.mxu1 %vm439_vm1, %v4715_v36  ;;  %v3048_v60 = vpop.f32.mrf.mxu0 }
 0x26b   : > { %v6949_v37 = vadd.f32 %v3045_v15, %v2645_v56  ;;  %5871 = vmatmul.msk.f32.gmra.mxu2 %vm439_vm1, %v3714_v20  ;;  %v4721_v20 = vld [vmem:[#allocation2 + $0x418] sm:$0xff] }
 0x26c   : > { %5921 = vmatmul.msk.f32.gmra.mxu3 %vm439_vm1, %v4216_v45 }
 0x26d   : > { %5971 = vmatmul.msk.f32.gmra.mxu0 %vm439_vm1, %v4718_v42 }
 0x26e   : > { %v2044_v0 = vpop.f32.mrf.mxu2 }
 0x26f   : > { %v2144_v43 = vadd.f32 %v2044_v0, %v1642_v3  ;;  %v2546_v25 = vpop.f32.mrf.mxu3  ;;  %v1545_v23 = vpop.f32.mrf.mxu1 }
 0x270   : > { %v4220_v23 = vld [vmem:[#allocation2 + $0x270] sm:$0xff] }
 0x271   : > { %v2646_v26 = vadd.f32 %v2546_v25, %v2144_v43  ;;  %v3718_v43 = vld [vmem:[#allocation2 + $0xc0] sm:$0xff] }
 0x272   : > { %5822 = vmatmul.msk.f32.gmra.mxu1 %vm439_vm1, %v4716_v27  ;;  %v3051_v36 = vpop.f32.mrf.mxu0  ;;  %v4720_v27 = vld [vmem:[#allocation2 + $0x410] sm:$0xff] }
 0x273   : > { %v6956_v21 = vadd.f32 %v3048_v60, %v2646_v26  ;;  %5872 = vmatmul.msk.f32.gmra.mxu2 %vm439_vm1, %v3715_v29  ;;  %v4722_v26 = vld [vmem:[#allocation2 + $0x420] sm:$0xff] }
 0x274   : > { %5922 = vmatmul.msk.f32.gmra.mxu3 %vm439_vm1, %v4217_v49 }
 0x275   : > { %5972 = vmatmul.msk.f32.gmra.mxu0 %vm439_vm1, %v4719_v59 }
 0x276   : > { %v2047_v57 = vpop.f32.mrf.mxu2 }
 0x277   : > { %v2549_v55 = vpop.f32.mrf.mxu3  ;;  %v3412_v46 = vpop.f32.mrf.mxu1 }
 0x278   : > { %v3604_v44 = vadd.f32 %v3412_v46, %v6603_v11  ;;  %v3719_v46 = vld [vmem:[#allocation2 + $0xc8] sm:$0xff] }
 0x27a   : > { %5823 = vmatmul.msk.f32.gmra.mxu1 %vm439_vm1, %v4717_v4  ;;  %v4918_v52 = vpop.f32.mrf.mxu0  ;;  %v6970_v4 = vld [vmem:[%s7229_s4] ss:$0 sm:$0xff] }
 0x27b   : > { %5873 = vmatmul.msk.f32.gmra.mxu2 %vm439_vm1, %v3716_v2  ;;  %v4221_v2 = vld [vmem:[#allocation2 + $0x278] sm:$0xff] }
 0x27c   : > { %5923 = vmatmul.msk.f32.gmra.mxu3 %vm439_vm1, %v4218_v39  ;;  %v4723_v39 = vld [vmem:[#allocation2 + $0x428] sm:$0xff] }
 0x27d   : > { %5973 = vmatmul.msk.f32.gmra.mxu0 %vm439_vm1, %v4720_v27 }
 0x27e   : > { %v3914_v58 = vpop.f32.mrf.mxu2 }
 0x27f   : > { %v4106_v5 = vadd.f32 %v3914_v58, %v3604_v44  ;;  %v4416_v15 = vpop.f32.mrf.mxu3  ;;  %v3415_v48 = vpop.f32.mrf.mxu1 }
 0x280   : > { %v3605_v45 = vadd.f32 %v3415_v48, %v6613_v38  ;;  %v3720_v48 = vld [vmem:[#allocation2 + $0xd0] sm:$0xff] }
 0x281   : > { %v4608_v35 = vadd.f32 %v4416_v15, %v4106_v5 }
 0x282   : > { %5824 = vmatmul.msk.f32.gmra.mxu1 %vm439_vm1, %v4718_v42  ;;  %v4921_v47 = vpop.f32.mrf.mxu0 }
 0x283   : > { %v5110_v11 = vadd.f32 %v4918_v52, %v4608_v35  ;;  %5874 = vmatmul.msk.f32.gmra.mxu2 %vm439_vm1, %v3717_v18  ;;  %v4222_v35 = vld [vmem:[#allocation2 + $0x280] sm:$0xff] }
 0x284   : > { %5924 = vmatmul.msk.f32.gmra.mxu3 %vm439_vm1, %v4219_v41  ;;  %v4724_v41 = vld [vmem:[#allocation2 + $0x430] sm:$0xff] }
 0x285   : > { %v5212_v56 = vadd.f32 %v6970_v4, %v5110_v11  ;;  %5974 = vmatmul.msk.f32.gmra.mxu0 %vm439_vm1, %v4721_v20 }
 0x286   : > { %v3917_v60 = vpop.f32.mrf.mxu2 }
 0x287   : > { %5214 = vst [vmem:[%s6977_s11] sm:$0xff] %v5212_v56  ;;  %v4107_v42 = vadd.f32 %v3917_v60, %v3605_v45  ;;  %v4419_v3 = vpop.f32.mrf.mxu3  ;;  %v3418_v0 = vpop.f32.mrf.mxu1 }
 0x288   : > { %v4223_v0 = vld [vmem:[#allocation2 + $0x288] sm:$0xff] }
 0x289   : > { %v4609_v25 = vadd.f32 %v4419_v3, %v4107_v42 }
 0x28a   : > { %5825 = vmatmul.msk.f32.gmra.mxu1 %vm439_vm1, %v4719_v59  ;;  %v4924_v29 = vpop.f32.mrf.mxu0 }
 0x28b   : > { %v5111_v49 = vadd.f32 %v4921_v47, %v4609_v25  ;;  %5875 = vmatmul.msk.f32.gmra.mxu2 %vm439_vm1, %v3718_v43  ;;  %v4725_v25 = vld [vmem:[#allocation2 + $0x438] sm:$0xff] }
 0x28c   : > { %5925 = vmatmul.msk.f32.gmra.mxu3 %vm439_vm1, %v4220_v23 }
 0x28d   : > { %v5213_v38 = vadd.f32 %v6970_v4, %v5111_v49  ;;  %5975 = vmatmul.msk.f32.gmra.mxu0 %vm439_vm1, %v4722_v26 }
 0x28e   : > { %v3920_v36 = vpop.f32.mrf.mxu2 }
 0x28f   : > { %5215 = vst [vmem:[%s6977_s11 + $0x8] sm:$0xff] %v5213_v38  ;;  %v4422_v57 = vpop.f32.mrf.mxu3  ;;  %v3421_v55 = vpop.f32.mrf.mxu1  ;;  %v3722_v36 = vld [vmem:[#allocation2 + $0xe0] sm:$0xff] }
 0x290   : > { %v3607_v52 = vadd.f32 %v3421_v55, %v6630_v22  ;;  %v4224_v57 = vld [vmem:[#allocation2 + $0x290] sm:$0xff]  ;;  %v4726_v55 = vld [vmem:[#allocation2 + $0x440] sm:$0xff] }
 0x292   : > { %5826 = vmatmul.msk.f32.gmra.mxu1 %vm439_vm1, %v4720_v27  ;;  %v4927_v59 = vpop.f32.mrf.mxu0 }
 0x293   : > { %5876 = vmatmul.msk.f32.gmra.mxu2 %vm439_vm1, %v3719_v46 }
 0x294   : > { %5926 = vmatmul.msk.f32.gmra.mxu3 %vm439_vm1, %v4221_v2 }
 0x295   : > { %5976 = vmatmul.msk.f32.gmra.mxu0 %vm439_vm1, %v4723_v39 }
 0x296   : > { %v3923_v44 = vpop.f32.mrf.mxu2 }
 0x297   : > { %v4109_v58 = vadd.f32 %v3923_v44, %v3607_v52  ;;  %v4425_v5 = vpop.f32.mrf.mxu3  ;;  %v3424_v15 = vpop.f32.mrf.mxu1 }
 0x298   : > { %v3608_v11 = vadd.f32 %v3424_v15, %v6640_v51  ;;  %v4225_v15 = vld [vmem:[#allocation2 + $0x298] sm:$0xff] }
 0x299   : > { %v4611_v18 = vadd.f32 %v4425_v5, %v4109_v58  ;;  %v3723_v58 = vld [vmem:[#allocation2 + $0xe8] sm:$0xff] }
 0x29a   : > { %5827 = vmatmul.msk.f32.gmra.mxu1 %vm439_vm1, %v4721_v20  ;;  %v4930_v27 = vpop.f32.mrf.mxu0  ;;  %v3721_v20 = vld [vmem:[#allocation2 + $0xd8] sm:$0xff] }
 0x29b   : > { %v5113_v47 = vadd.f32 %v4927_v59, %v4611_v18  ;;  %5877 = vmatmul.msk.f32.gmra.mxu2 %vm439_vm1, %v3720_v48  ;;  %v4727_v48 = vld [vmem:[#allocation2 + $0x448] sm:$0xff] }
 0x29c   : > { %5927 = vmatmul.msk.f32.gmra.mxu3 %vm439_vm1, %v4222_v35 }
 0x29d   : > { %v5218_v22 = vadd.f32 %v6970_v4, %v5113_v47  ;;  %5977 = vmatmul.msk.f32.gmra.mxu0 %vm439_vm1, %v4724_v41 }
 0x29e   : > { %v3926_v56 = vpop.f32.mrf.mxu2 }
 0x29f   : > { %6005 = vst [vmem:[%s6977_s11 + $0x10] sm:$0xff] %v5218_v22  ;;  %v4110_v45 = vadd.f32 %v3926_v56, %v3608_v11  ;;  %v4428_v60 = vpop.f32.mrf.mxu3  ;;  %v3427_v42 = vpop.f32.mrf.mxu1 }
 0x2a0   : > { %v4728_v42 = vld [vmem:[#allocation2 + $0x450] sm:$0xff] }
 0x2a1   : > { %v4612_v3 = vadd.f32 %v4428_v60, %v4110_v45  ;;  %v4226_v45 = vld [vmem:[#allocation2 + $0x2a0] sm:$0xff] }
 0x2a2   : > { %5828 = vmatmul.msk.f32.gmra.mxu1 %vm439_vm1, %v4722_v26  ;;  %v4933_v43 = vpop.f32.mrf.mxu0 }
 0x2a3   : > { %v5114_v23 = vadd.f32 %v4930_v27, %v4612_v3  ;;  %5878 = vmatmul.msk.f32.gmra.mxu2 %vm439_vm1, %v3721_v20 }
 0x2a4   : > { %5928 = vmatmul.msk.f32.gmra.mxu3 %vm439_vm1, %v4223_v0 }
 0x2a5   : > { %v5219_v51 = vadd.f32 %v6970_v4, %v5114_v23  ;;  %5978 = vmatmul.msk.f32.gmra.mxu0 %vm439_vm1, %v4725_v25  ;;  %v3725_v23 = vld [vmem:[#allocation2 + $0xf8] sm:$0xff] }
 0x2a6   : > { %v3929_v29 = vpop.f32.mrf.mxu2 }
 0x2a7   : > { %6006 = vst [vmem:[%s6977_s11 + $0x18] sm:$0xff] %v5219_v51  ;;  %v4431_v49 = vpop.f32.mrf.mxu3  ;;  %v3430_v38 = vpop.f32.mrf.mxu1  ;;  %v4227_v51 = vld [vmem:[#allocation2 + $0x2a8] sm:$0xff]  ;;  %v4729_v29 = vld [vmem:[#allocation2 + $0x458] sm:$0xff] }
 0x2a8   : > { %v3610_v46 = vadd.f32 %v3430_v38, %v6655_v7 }
 0x2aa   : > { %5829 = vmatmul.msk.f32.gmra.mxu1 %vm439_vm1, %v4723_v39  ;;  %v4936_v26 = vpop.f32.mrf.mxu0 }
 0x2ab   : > { %5879 = vmatmul.msk.f32.gmra.mxu2 %vm439_vm1, %v3722_v36 }
 0x2ac   : > { %5929 = vmatmul.msk.f32.gmra.mxu3 %vm439_vm1, %v4224_v57 }
 0x2ad   : > { %5979 = vmatmul.msk.f32.gmra.mxu0 %vm439_vm1, %v4726_v55 }
 0x2ae   : > { %v3932_v2 = vpop.f32.mrf.mxu2 }
 0x2af   : > { %v4112_v59 = vadd.f32 %v3932_v2, %v3610_v46  ;;  %v4434_v52 = vpop.f32.mrf.mxu3  ;;  %v3433_v44 = vpop.f32.mrf.mxu1  ;;  %v3726_v46 = vld [vmem:[#allocation2 + $0x100] sm:$0xff] }
 0x2b0   : > { %v3611_v35 = vadd.f32 %v3433_v44, %v6664_v40 }
 0x2b1   : > { %v4614_v5 = vadd.f32 %v4434_v52, %v4112_v59  ;;  %v4228_v59 = vld [vmem:[#allocation2 + $0x2b0] sm:$0xff]  ;;  %v4730_v52 = vld [vmem:[#allocation2 + $0x460] sm:$0xff] }
 0x2b2   : > { %5830 = vmatmul.msk.f32.gmra.mxu1 %vm439_vm1, %v4724_v41  ;;  %v4939_v39 = vpop.f32.mrf.mxu0  ;;  %v3724_v41 = vld [vmem:[#allocation2 + $0xf0] sm:$0xff] }
 0x2b3   : > { %v5116_v18 = vadd.f32 %v4936_v26, %v4614_v5  ;;  %5880 = vmatmul.msk.f32.gmra.mxu2 %vm439_vm1, %v3723_v58 }
 0x2b4   : > { %5930 = vmatmul.msk.f32.gmra.mxu3 %vm439_vm1, %v4225_v15 }
 0x2b5   : > { %v5225_v7 = vadd.f32 %v6970_v4, %v5116_v18  ;;  %5980 = vmatmul.msk.f32.gmra.mxu0 %vm439_vm1, %v4727_v48 }
 0x2b6   : > { %v3935_v27 = vpop.f32.mrf.mxu2 }
 0x2b7   : > { %6007 = vst [vmem:[%s6977_s11 + $0x20] sm:$0xff] %v5225_v7  ;;  %v4113_v47 = vadd.f32 %v3935_v27, %v3611_v35  ;;  %v4437_v22 = vpop.f32.mrf.mxu3  ;;  %v3436_v11 = vpop.f32.mrf.mxu1  ;;  %v4229_v35 = vld [vmem:[#allocation2 + $0x2b8] sm:$0xff] }
 0x2b9   : > { %v4615_v56 = vadd.f32 %v4437_v22, %v4113_v47  ;;  %v4731_v47 = vld [vmem:[#allocation2 + $0x468] sm:$0xff] }
 0x2ba   : > { %5831 = vmatmul.msk.f32.gmra.mxu1 %vm439_vm1, %v4725_v25  ;;  %v4942_v60 = vpop.f32.mrf.mxu0 }
 0x2bb   : > { %v5117_v20 = vadd.f32 %v4939_v39, %v4615_v56  ;;  %5881 = vmatmul.msk.f32.gmra.mxu2 %vm439_vm1, %v3724_v41  ;;  %v4230_v60 = vld [vmem:[#allocation2 + $0x2c0] sm:$0xff] }
 0x2bc   : > { %5931 = vmatmul.msk.f32.gmra.mxu3 %vm439_vm1, %v4226_v45  ;;  %v3728_v45 = vld [vmem:[#allocation2 + $0x110] sm:$0xff] }
 0x2bd   : > { %v5226_v40 = vadd.f32 %v6970_v4, %v5117_v20  ;;  %5981 = vmatmul.msk.f32.gmra.mxu0 %vm439_vm1, %v4728_v42  ;;  %v4732_v20 = vld [vmem:[#allocation2 + $0x470] sm:$0xff] }
 0x2be   : > { %v3938_v3 = vpop.f32.mrf.mxu2 }
 0x2bf   : > { %6008 = vst [vmem:[%s6977_s11 + $0x28] sm:$0xff] %v5226_v40  ;;  %v4440_v0 = vpop.f32.mrf.mxu3  ;;  %v3439_v43 = vpop.f32.mrf.mxu1 }
 0x2c0   : > { %v3613_v49 = vadd.f32 %v3439_v43, %v6679_v13 }
 0x2c2   : > { %5832 = vmatmul.msk.f32.gmra.mxu1 %vm439_vm1, %v4726_v55  ;;  %v4945_v25 = vpop.f32.mrf.mxu0 }
 0x2c3   : > { %5882 = vmatmul.msk.f32.gmra.mxu2 %vm439_vm1, %v3725_v23 }
 0x2c4   : > { %5932 = vmatmul.msk.f32.gmra.mxu3 %vm439_vm1, %v4227_v51  ;;  %v3729_v51 = vld [vmem:[#allocation2 + $0x118] sm:$0xff] }
 0x2c5   : > { %5982 = vmatmul.msk.f32.gmra.mxu0 %vm439_vm1, %v4729_v29 }
 0x2c6   : > { %v3941_v38 = vpop.f32.mrf.mxu2 }
 0x2c7   : > { %v4115_v36 = vadd.f32 %v3941_v38, %v3613_v49  ;;  %v4443_v57 = vpop.f32.mrf.mxu3  ;;  %v3442_v26 = vpop.f32.mrf.mxu1  ;;  %v4231_v49 = vld [vmem:[#allocation2 + $0x2c8] sm:$0xff]  ;;  %v4733_v38 = vld [vmem:[#allocation2 + $0x478] sm:$0xff] }
 0x2c8   : > { %v3614_v58 = vadd.f32 %v3442_v26, %v6688_v31 }
 0x2c9   : > { %v4617_v2 = vadd.f32 %v4443_v57, %v4115_v36 }
 0x2ca   : > { %5833 = vmatmul.msk.f32.gmra.mxu1 %vm439_vm1, %v4727_v48  ;;  %v4948_v55 = vpop.f32.mrf.mxu0  ;;  %v3727_v48 = vld [vmem:[#allocation2 + $0x108] sm:$0xff] }
 0x2cb   : > { %v5119_v44 = vadd.f32 %v4945_v25, %v4617_v2  ;;  %5883 = vmatmul.msk.f32.gmra.mxu2 %vm439_vm1, %v3726_v46 }
 0x2cc   : > { %5933 = vmatmul.msk.f32.gmra.mxu3 %vm439_vm1, %v4228_v59 }
 0x2cd   : > { %v5232_v13 = vadd.f32 %v6970_v4, %v5119_v44  ;;  %5983 = vmatmul.msk.f32.gmra.mxu0 %vm439_vm1, %v4730_v52  ;;  %v4232_v44 = vld [vmem:[#allocation2 + $0x2d0] sm:$0xff] }
 0x2ce   : > { %v3944_v5 = vpop.f32.mrf.mxu2 }
 0x2cf   : > { %6009 = vst [vmem:[%s6977_s11 + $0x30] sm:$0xff] %v5232_v13  ;;  %v4116_v15 = vadd.f32 %v3944_v5, %v3614_v58  ;;  %v4446_v39 = vpop.f32.mrf.mxu3  ;;  %v3445_v18 = vpop.f32.mrf.mxu1  ;;  %v4734_v58 = vld [vmem:[#allocation2 + $0x480] sm:$0xff] }
 0x2d1   : > { %v4618_v7 = vadd.f32 %v4446_v39, %v4116_v15 }
 0x2d2   : > { %5834 = vmatmul.msk.f32.gmra.mxu1 %vm439_vm1, %v4728_v42  ;;  %v4951_v27 = vpop.f32.mrf.mxu0 }
 0x2d3   : > { %v5120_v22 = vadd.f32 %v4948_v55, %v4618_v7  ;;  %5884 = vmatmul.msk.f32.gmra.mxu2 %vm439_vm1, %v3727_v48  ;;  %v3730_v55 = vld [vmem:[#allocation2 + $0x120] sm:$0xff]  ;;  %v3731_v48 = vld [vmem:[#allocation2 + $0x128] sm:$0xff]  ;;  %v4233_v7 = vld [vmem:[#allocation2 + $0x2d8] sm:$0xff] }
 0x2d4   : > { %5934 = vmatmul.msk.f32.gmra.mxu3 %vm439_vm1, %v4229_v35  ;;  %v4735_v27 = vld [vmem:[#allocation2 + $0x488] sm:$0xff] }
 0x2d5   : > { %v5233_v31 = vadd.f32 %v6970_v4, %v5120_v22  ;;  %5984 = vmatmul.msk.f32.gmra.mxu0 %vm439_vm1, %v4731_v47 }
 0x2d6   : > { %v3947_v11 = vpop.f32.mrf.mxu2 }
 0x2d7   : > { %6010 = vst [vmem:[%s6977_s11 + $0x38] sm:$0xff] %v5233_v31  ;;  %v4449_v41 = vpop.f32.mrf.mxu3  ;;  %v3448_v56 = vpop.f32.mrf.mxu1 }
 0x2d8   : > { %v3616_v40 = vadd.f32 %v3448_v56, %v6703_v14  ;;  %v3732_v56 = vld [vmem:[#allocation2 + $0x130] sm:$0xff] }
 0x2da   : > { %5835 = vmatmul.msk.f32.gmra.mxu1 %vm439_vm1, %v4729_v29  ;;  %v4954_v42 = vpop.f32.mrf.mxu0 }
 0x2db   : > { %5885 = vmatmul.msk.f32.gmra.mxu2 %vm439_vm1, %v3728_v45 }
 0x2dc   : > { %5935 = vmatmul.msk.f32.gmra.mxu3 %vm439_vm1, %v4230_v60  ;;  %v4234_v60 = vld [vmem:[#allocation2 + $0x2e0] sm:$0xff] }
 0x2dd   : > { %5985 = vmatmul.msk.f32.gmra.mxu0 %vm439_vm1, %v4732_v20 }
 0x2de   : > { %v3950_v3 = vpop.f32.mrf.mxu2 }
 0x2df   : > { %v4118_v0 = vadd.f32 %v3950_v3, %v3616_v40  ;;  %v4452_v43 = vpop.f32.mrf.mxu3  ;;  %v3451_v23 = vpop.f32.mrf.mxu1 }
 0x2e0   : > { %v3617_v57 = vadd.f32 %v3451_v23, %v6712_v34 }
 0x2e1   : > { %v4620_v25 = vadd.f32 %v4452_v43, %v4118_v0 }
 0x2e2   : > { %5836 = vmatmul.msk.f32.gmra.mxu1 %vm439_vm1, %v4730_v52  ;;  %v4957_v29 = vpop.f32.mrf.mxu0 }
 0x2e3   : > { %v5122_v36 = vadd.f32 %v4954_v42, %v4620_v25  ;;  %5886 = vmatmul.msk.f32.gmra.mxu2 %vm439_vm1, %v3729_v51  ;;  %v3733_v25 = vld [vmem:[#allocation2 + $0x138] sm:$0xff] }
 0x2e4   : > { %5936 = vmatmul.msk.f32.gmra.mxu3 %vm439_vm1, %v4231_v49 }
 0x2e5   : > { %v5239_v14 = vadd.f32 %v6970_v4, %v5122_v36  ;;  %5986 = vmatmul.msk.f32.gmra.mxu0 %vm439_vm1, %v4733_v38  ;;  %v4737_v36 = vld [vmem:[#allocation2 + $0x498] sm:$0xff] }
 0x2e6   : > { %v3953_v26 = vpop.f32.mrf.mxu2 }
 0x2e7   : > { %6011 = vst [vmem:[%s6977_s11 + $0x40] sm:$0xff] %v5239_v14  ;;  %v4119_v46 = vadd.f32 %v3953_v26, %v3617_v57  ;;  %v4455_v2 = vpop.f32.mrf.mxu3  ;;  %v3454_v59 = vpop.f32.mrf.mxu1 }
 0x2e8   : > { %v4236_v59 = vld [vmem:[#allocation2 + $0x2f0] sm:$0xff] }
 0x2e9   : > { %v4621_v52 = vadd.f32 %v4455_v2, %v4119_v46  ;;  %v3734_v2 = vld [vmem:[#allocation2 + $0x140] sm:$0xff] }
 0x2ea   : > { %5837 = vmatmul.msk.f32.gmra.mxu1 %vm439_vm1, %v4731_v47  ;;  %v4960_v13 = vpop.f32.mrf.mxu0 }
 0x2eb   : > { %v5123_v5 = vadd.f32 %v4957_v29, %v4621_v52  ;;  %5887 = vmatmul.msk.f32.gmra.mxu2 %vm439_vm1, %v3730_v55  ;;  %v4235_v29 = vld [vmem:[#allocation2 + $0x2e8] sm:$0xff]  ;;  %v4738_v52 = vld [vmem:[#allocation2 + $0x4a0] sm:$0xff] }
 0x2ec   : > { %5937 = vmatmul.msk.f32.gmra.mxu3 %vm439_vm1, %v4232_v44 }
 0x2ed   : > { %v5240_v34 = vadd.f32 %v6970_v4, %v5123_v5  ;;  %5987 = vmatmul.msk.f32.gmra.mxu0 %vm439_vm1, %v4734_v58 }
 0x2ee   : > { %v3956_v15 = vpop.f32.mrf.mxu2 }
 0x2ef   : > { %6012 = vst [vmem:[%s6977_s11 + $0x48] sm:$0xff] %v5240_v34  ;;  %v4458_v39 = vpop.f32.mrf.mxu3  ;;  %v3457_v18 = vpop.f32.mrf.mxu1  ;;  %v3735_v15 = vld [vmem:[#allocation2 + $0x148] sm:$0xff] }
 0x2f0   : > { %v3619_v47 = vadd.f32 %v3457_v18, %v6727_v16  ;;  %v4237_v18 = vld [vmem:[#allocation2 + $0x2f8] sm:$0xff] }
 0x2f2   : > { %5838 = vmatmul.msk.f32.gmra.mxu1 %vm439_vm1, %v4732_v20  ;;  %v4963_v35 = vpop.f32.mrf.mxu0  ;;  %v4736_v20 = vld [vmem:[#allocation2 + $0x490] sm:$0xff] }
 0x2f3   : > { %5888 = vmatmul.msk.f32.gmra.mxu2 %vm439_vm1, %v3731_v48 }
 0x2f4   : > { %5938 = vmatmul.msk.f32.gmra.mxu3 %vm439_vm1, %v4233_v7  ;;  %v4739_v7 = vld [vmem:[#allocation2 + $0x4a8] sm:$0xff] }
 0x2f5   : > { %5988 = vmatmul.msk.f32.gmra.mxu0 %vm439_vm1, %v4735_v27 }
 0x2f6   : > { %v3959_v22 = vpop.f32.mrf.mxu2 }
 0x2f7   : > { %v4121_v31 = vadd.f32 %v3959_v22, %v3619_v47  ;;  %v4461_v11 = vpop.f32.mrf.mxu3  ;;  %v3460_v41 = vpop.f32.mrf.mxu1 }
 0x2f8   : > { %v3620_v3 = vadd.f32 %v3460_v41, %v6736_v1  ;;  %v3736_v41 = vld [vmem:[#allocation2 + $0x150] sm:$0xff] }
 0x2f9   : > { %v4623_v45 = vadd.f32 %v4461_v11, %v4121_v31 }
 0x2fa   : > { %5839 = vmatmul.msk.f32.gmra.mxu1 %vm439_vm1, %v4733_v38  ;;  %v4966_v42 = vpop.f32.mrf.mxu0 }
 0x2fb   : > { %v5125_v40 = vadd.f32 %v4963_v35, %v4623_v45  ;;  %5889 = vmatmul.msk.f32.gmra.mxu2 %vm439_vm1, %v3732_v56  ;;  %v4238_v45 = vld [vmem:[#allocation2 + $0x300] sm:$0xff] }
 0x2fc   : > { %5939 = vmatmul.msk.f32.gmra.mxu3 %vm439_vm1, %v4234_v60 }
 0x2fd   : > { %v5246_v16 = vadd.f32 %v6970_v4, %v5125_v40  ;;  %5989 = vmatmul.msk.f32.gmra.mxu0 %vm439_vm1, %v4736_v20 }
 0x2fe   : > { %v3962_v0 = vpop.f32.mrf.mxu2 }
 0x2ff   : > { %6013 = vst [vmem:[%s6977_s11 + $0x50] sm:$0xff] %v5246_v16  ;;  %v4122_v43 = vadd.f32 %v3962_v0, %v3620_v3  ;;  %v4464_v23 = vpop.f32.mrf.mxu3  ;;  %v3463_v51 = vpop.f32.mrf.mxu1  ;;  %v3737_v0 = vld [vmem:[#allocation2 + $0x158] sm:$0xff] }
 0x300   : > { %v4741_v51 = vld [vmem:[#allocation2 + $0x4b8] sm:$0xff] }
 0x301   : > { %v4624_v49 = vadd.f32 %v4464_v23, %v4122_v43  ;;  %v4239_v43 = vld [vmem:[#allocation2 + $0x308] sm:$0xff] }
 0x302   : > { %5840 = vmatmul.msk.f32.gmra.mxu1 %vm439_vm1, %v4734_v58  ;;  %v4969_v38 = vpop.f32.mrf.mxu0 }
 0x303   : > { %v5126_v14 = vadd.f32 %v4966_v42, %v4624_v49  ;;  %5890 = vmatmul.msk.f32.gmra.mxu2 %vm439_vm1, %v3733_v25  ;;  %v4740_v42 = vld [vmem:[#allocation2 + $0x4b0] sm:$0xff] }
 0x304   : > { %5940 = vmatmul.msk.f32.gmra.mxu3 %vm439_vm1, %v4235_v29 }
 0x305   : > { %v5247_v1 = vadd.f32 %v6970_v4, %v5126_v14  ;;  %5990 = vmatmul.msk.f32.gmra.mxu0 %vm439_vm1, %v4737_v36  ;;  %v3738_v14 = vld [vmem:[#allocation2 + $0x160] sm:$0xff] }
 0x306   : > { %v3965_v57 = vpop.f32.mrf.mxu2 }
 0x307   : > { %6014 = vst [vmem:[%s6977_s11 + $0x58] sm:$0xff] %v5247_v1  ;;  %v4467_v26 = vpop.f32.mrf.mxu3  ;;  %v3466_v46 = vpop.f32.mrf.mxu1  ;;  %v4240_v57 = vld [vmem:[#allocation2 + $0x310] sm:$0xff] }
 0x308   : > { %v3622_v44 = vadd.f32 %v3466_v46, %v6751_v19  ;;  %v720_v26 = vld [vmem:[#allocation2 + $0x182] sm:$0xff] }
 0x309   : > { %775 = vst.msk [vmem:[#allocation2 + $0x4e0] sm:$0xff] %vm439_vm1, %v720_v26  ;;  %v3742_v26 = vld [vmem:[#allocation2 + $0x180] sm:$0xff] }
 0x30a   : > { %5841 = vmatmul.msk.f32.gmra.mxu1 %vm439_vm1, %v4735_v27  ;;  %v4972_v55 = vpop.f32.mrf.mxu0 }
 0x30b   : > { %5891 = vmatmul.msk.f32.gmra.mxu2 %vm439_vm1, %v3734_v2  ;;  %v4742_v2 = vld [vmem:[#allocation2 + $0x4c0] sm:$0xff] }
 0x30c   : > { %5941 = vmatmul.msk.f32.gmra.mxu3 %vm439_vm1, %v4236_v59 }
 0x30d   : > { %5991 = vmatmul.msk.f32.gmra.mxu0 %vm439_vm1, %v4738_v52 }
 0x30e   : > { %v3968_v13 = vpop.f32.mrf.mxu2 }
 0x30f   : > { %v4124_v58 = vadd.f32 %v3968_v13, %v3622_v44  ;;  %v4470_v5 = vpop.f32.mrf.mxu3  ;;  %v3469_v34 = vpop.f32.mrf.mxu1 }
 0x310   : > { %v3623_v27 = vadd.f32 %v3469_v34, %v6760_v33 }
 0x311   : > { %v4626_v39 = vadd.f32 %v4470_v5, %v4124_v58  ;;  %v3739_v5 = vld [vmem:[#allocation2 + $0x168] sm:$0xff] }
 0x312   : > { %5842 = vmatmul.msk.f32.gmra.mxu1 %vm439_vm1, %v4736_v20  ;;  %v4975_v48 = vpop.f32.mrf.mxu0 }
 0x313   : > { %v5128_v35 = vadd.f32 %v4972_v55, %v4626_v39  ;;  %5892 = vmatmul.msk.f32.gmra.mxu2 %vm439_vm1, %v3735_v15  ;;  %v4241_v15 = vld [vmem:[#allocation2 + $0x318] sm:$0xff]  ;;  %v721_v39 = vld [vmem:[#allocation2 + $0x18a] sm:$0xff] }
 0x314   : > { %5942 = vmatmul.msk.f32.gmra.mxu3 %vm439_vm1, %v4237_v18  ;;  %776 = vst.msk [vmem:[#allocation2 + $0x4e8] sm:$0xff] %vm439_vm1, %v721_v39  ;;  %v4245_v39 = vld [vmem:[#allocation2 + $0x338] sm:$0xff] }
 0x315   : > { %v5253_v19 = vadd.f32 %v6970_v4, %v5128_v35  ;;  %5992 = vmatmul.msk.f32.gmra.mxu0 %vm439_vm1, %v4739_v7 }
 0x316   : > { %v3971_v47 = vpop.f32.mrf.mxu2 }
 0x317   : > { %6015 = vst [vmem:[%s6977_s11 + $0x60] sm:$0xff] %v5253_v19  ;;  %v4125_v22 = vadd.f32 %v3971_v47, %v3623_v27  ;;  %v4473_v31 = vpop.f32.mrf.mxu3  ;;  %v3472_v11 = vpop.f32.mrf.mxu1 }
 0x318   : > { %v722_v11 = vld [vmem:[#allocation2 + $0x192] sm:$0xff] }
 0x319   : > { %v4627_v56 = vadd.f32 %v4473_v31, %v4125_v22  ;;  %v3740_v22 = vld [vmem:[#allocation2 + $0x170] sm:$0xff]  ;;  %v4242_v31 = vld [vmem:[#allocation2 + $0x320] sm:$0xff]  ;;  %777 = vst.msk [vmem:[#allocation2 + $0x4f0] sm:$0xff] %vm439_vm1, %v722_v11 }
 0x31a   : > { %5843 = vmatmul.msk.f32.gmra.mxu1 %vm439_vm1, %v4737_v36  ;;  %v4978_v60 = vpop.f32.mrf.mxu0  ;;  %v4246_v11 = vld [vmem:[#allocation2 + $0x340] sm:$0xff] }
 0x31b   : > { %v5129_v20 = vadd.f32 %v4975_v48, %v4627_v56  ;;  %5893 = vmatmul.msk.f32.gmra.mxu2 %vm439_vm1, %v3736_v41  ;;  %v4743_v48 = vld [vmem:[#allocation2 + $0x4c8] sm:$0xff]  ;;  %v7121_v56 = vld [vmem:[#allocation2 + $0x4d0] sm:$0xff] }
 0x31c   : > { %5943 = vmatmul.msk.f32.gmra.mxu3 %vm439_vm1, %v4238_v45  ;;  %v556_v60 = vld [vmem:[%s6822_s30 + $0x10] sm:$0xff] }
 0x31d   : > { %v5254_v33 = vadd.f32 %v6970_v4, %v5129_v20  ;;  %5993 = vmatmul.msk.f32.gmra.mxu0 %vm439_vm1, %v4740_v42  ;;  %559 = vst.msk [vmem:[#allocation2 + $0x1a8] sm:$0xff] %vm439_vm1, %v556_v60 }
 0x31e   : > { %v3974_v40 = vpop.f32.mrf.mxu2 }
 0x31f   : > { %6016 = vst [vmem:[%s6977_s11 + $0x68] sm:$0xff] %v5254_v33  ;;  %v4476_v16 = vpop.f32.mrf.mxu3  ;;  %v3475_v3 = vpop.f32.mrf.mxu1 }
 0x320   : > { %v3625_v25 = vadd.f32 %v3475_v3, %v6775_v30  ;;  %v3741_v3 = vld [vmem:[#allocation2 + $0x178] sm:$0xff] }
 0x322   : > { %5844 = vmatmul.msk.f32.gmra.mxu1 %vm439_vm1, %v4738_v52  ;;  %v4981_v23 = vpop.f32.mrf.mxu0 }
 0x323   : > { %5894 = vmatmul.msk.f32.gmra.mxu2 %vm439_vm1, %v3737_v0 }
 0x324   : > { %5944 = vmatmul.msk.f32.gmra.mxu3 %vm439_vm1, %v4239_v43  ;;  %v4243_v43 = vld [vmem:[#allocation2 + $0x328] sm:$0xff] }
 0x325   : > { %5994 = vmatmul.msk.f32.gmra.mxu0 %vm439_vm1, %v4741_v51 }
 0x326   : > { %v3977_v49 = vpop.f32.mrf.mxu2 }
 0x327   : > { %v4127_v29 = vadd.f32 %v3977_v49, %v3625_v25  ;;  %v4479_v38 = vpop.f32.mrf.mxu3  ;;  %v3478_v36 = vpop.f32.mrf.mxu1  ;;  %v4745_v25 = vld [vmem:[#allocation2 + $0x4d8] sm:$0xff] }
 0x328   : > { %v3626_v55 = vadd.f32 %v3478_v36, %v6791_v9 }
 0x329   : > { %v4629_v1 = vadd.f32 %v4479_v38, %v4127_v29 }
 0x32a   : > { %5845 = vmatmul.msk.f32.gmra.mxu1 %vm439_vm1, %v4739_v7  ;;  %v4984_v46 = vpop.f32.mrf.mxu0  ;;  %v555_v7 = vld [vmem:[%s6822_s30 + $0x8] sm:$0xff] }
 0x32b   : > { %v5131_v59 = vadd.f32 %v4981_v23, %v4629_v1  ;;  %5895 = vmatmul.msk.f32.gmra.mxu2 %vm439_vm1, %v3738_v14  ;;  %558 = vst.msk [vmem:[#allocation2 + $0x1a0] sm:$0xff] %vm439_vm1, %v555_v7 }
 0x32c   : > { %5945 = vmatmul.msk.f32.gmra.mxu3 %vm439_vm1, %v4240_v57 }
 0x32d   : > { %v5260_v30 = vadd.f32 %v6970_v4, %v5131_v59  ;;  %5995 = vmatmul.msk.f32.gmra.mxu0 %vm439_vm1, %v4742_v2 }
 0x32e   : > { %v3980_v52 = vpop.f32.mrf.mxu2 }
 0x32f   : > { %6017 = vst [vmem:[%s6977_s11 + $0x70] sm:$0xff] %v5260_v30  ;;  %v4128_v44 = vadd.f32 %v3980_v52, %v3626_v55  ;;  %v4482_v13 = vpop.f32.mrf.mxu3  ;;  %v3481_v58 = vpop.f32.mrf.mxu1  ;;  %v4746_v55 = vld [vmem:[#allocation2 + $0x4e0] sm:$0xff]  ;;  %v613_v52 = vld [vmem:[#allocation2 + $0x1a9] sm:$0x7f] }
 0x330   : > { %669 = vst.msk [vmem:[#allocation2 + $0x358] sm:$0x7f] %vm668_vm2, %v613_v52 }
 0x331   : > { %v4630_v34 = vadd.f32 %v4482_v13, %v4128_v44  ;;  %v6099_v13 = vmov 0.0  }
 0x332   : > { %5846 = vmatmul.msk.f32.gmra.mxu1 %vm439_vm1, %v4740_v42  ;;  %v4987_v18 = vpop.f32.mrf.mxu0  ;;  %v611_v45 = vld [vmem:[#allocation2 + $0x199] sm:$0xff]  ;;  %v612_v49 = vld [vmem:[#allocation2 + $0x1a1] sm:$0xff]  ;;  %671 = vst.msk [vmem:[#allocation2 + $0x35f] sm:$0x1] %vm670_vm3, %v6099_v13 }
 0x333   : > { %v5132_v9 = vadd.f32 %v4984_v46, %v4630_v34  ;;  %5896 = vmatmul.msk.f32.gmra.mxu2 %vm439_vm1, %v3739_v5  ;;  %666 = vst.msk [vmem:[#allocation2 + $0x348] sm:$0xff] %vm439_vm1, %v611_v45  ;;  %v723_v23 = vld [vmem:[#allocation2 + $0x19a] sm:$0xff]  ;;  %v724_v59 = vld [vmem:[#allocation2 + $0x1a2] sm:$0xff]  ;;  %v725_v18 = vld [vmem:[#allocation2 + $0x1aa] sm:$0x3f] }
 0x334   : > { %5946 = vmatmul.msk.f32.gmra.mxu3 %vm439_vm1, %v4241_v15  ;;  %778 = vst.msk [vmem:[#allocation2 + $0x4f8] sm:$0xff] %vm439_vm1, %v723_v23  ;;  %v3743_v15 = vld [vmem:[#allocation2 + $0x188] sm:$0xff] }
 0x335   : > { %v5261_v35 = vadd.f32 %v6970_v4, %v5132_v9  ;;  %5996 = vmatmul.msk.f32.gmra.mxu0 %vm439_vm1, %v4743_v48  ;;  %667 = vst.msk [vmem:[#allocation2 + $0x350] sm:$0xff] %vm439_vm1, %v612_v49  ;;  %v4747_v9 = vld [vmem:[#allocation2 + $0x4e8] sm:$0xff] }
 0x336   : > { %v3983_v19 = vpop.f32.mrf.mxu2  ;;  %779 = vst.msk [vmem:[#allocation2 + $0x500] sm:$0xff] %vm439_vm1, %v724_v59  ;;  %v3747_v59 = vld [vmem:[#allocation2 + $0x1a8] sm:$0xff] }
 0x337   : > { %6018 = vst [vmem:[%s6977_s11 + $0x78] sm:$0xff] %v5261_v35  ;;  %v4485_v27 = vpop.f32.mrf.mxu3  ;;  %v3484_v47 = vpop.f32.mrf.mxu1 }
 0x338   : > { %v3628_v42 = vadd.f32 %v3484_v47, %v6810_v12  ;;  %781 = vst.msk [vmem:[#allocation2 + $0x508] sm:$0x3f] %vm780_vm4, %v725_v18 }
 0x339   : > { %783 = vst.msk [vmem:[#allocation2 + $0x50e] sm:$0x3] %vm782_vm5, %v6099_v13 }
 0x33a   : > { %5847 = vmatmul.msk.f32.gmra.mxu1 %vm439_vm1, %v4741_v51  ;;  %v4990_v41 = vpop.f32.mrf.mxu0 }
 0x33b   : > { %5897 = vmatmul.msk.f32.gmra.mxu2 %vm439_vm1, %v3740_v22  ;;  %v3744_v22 = vld [vmem:[#allocation2 + $0x190] sm:$0xff]  ;;  %v4749_v23 = vld [vmem:[#allocation2 + $0x4f8] sm:$0xff] }
 0x33c   : > { %5947 = vmatmul.msk.f32.gmra.mxu3 %vm439_vm1, %v4242_v31 }
 0x33d   : > { %5997 = vmatmul.msk.f32.gmra.mxu0 %vm439_vm1, %v7121_v56 }
 0x33e   : > { %v3986_v20 = vpop.f32.mrf.mxu2 }
 0x33f   : > { %v4130_v33 = vadd.f32 %v3986_v20, %v3628_v42  ;;  %v4488_v40 = vpop.f32.mrf.mxu3  ;;  %v3487_v16 = vpop.f32.mrf.mxu1 }
 0x340   : > { %v3629_v38 = vadd.f32 %v3487_v16, %v6827_v8  ;;  %v3745_v16 = vld [vmem:[#allocation2 + $0x198] sm:$0xff]  ;;  %v4751_v52 = vld [vmem:[#allocation2 + $0x508] sm:$0xff] }
 0x341   : > { %v4632_v0 = vadd.f32 %v4488_v40, %v4130_v33 }
 0x342   : > { %5848 = vmatmul.msk.f32.gmra.mxu1 %vm439_vm1, %v4742_v2  ;;  %v4993_v51 = vpop.f32.mrf.mxu0  ;;  %v4244_v2 = vld [vmem:[#allocation2 + $0x330] sm:$0xff] }
 0x343   : > { %v5134_v12 = vadd.f32 %v4990_v41, %v4632_v0  ;;  %5898 = vmatmul.msk.f32.gmra.mxu2 %vm439_vm1, %v3741_v3  ;;  %v4247_v0 = vld [vmem:[#allocation2 + $0x348] sm:$0xff] }
 0x344   : > { %5948 = vmatmul.msk.f32.gmra.mxu3 %vm439_vm1, %v4243_v43 }
 0x345   : > { %v5267_v29 = vadd.f32 %v6970_v4, %v5134_v12  ;;  %5998 = vmatmul.msk.f32.gmra.mxu0 %vm439_vm1, %v4745_v25 }
 0x346   : > { %v3989_v36 = vpop.f32.mrf.mxu2 }
 0x347   : > { %6019 = vst [vmem:[%s6977_s11 + $0x80] sm:$0xff] %v5267_v29  ;;  %v4131_v14 = vadd.f32 %v3989_v36, %v3629_v38  ;;  %v4491_v1 = vpop.f32.mrf.mxu3  ;;  %v3490_v57 = vpop.f32.mrf.mxu1  ;;  %v3746_v29 = vld [vmem:[#allocation2 + $0x1a0] sm:$0xff]  ;;  %v4248_v38 = vld [vmem:[#allocation2 + $0x350] sm:$0xff] }
 0x349   : > { %v4633_v46 = vadd.f32 %v4491_v1, %v4131_v14  ;;  %v4750_v14 = vld [vmem:[#allocation2 + $0x500] sm:$0xff] }
 0x34a   : > { %5849 = vmatmul.msk.f32.gmra.mxu1 %vm439_vm1, %v4743_v48  ;;  %v4996_v30 = vpop.f32.mrf.mxu0 }
 0x34b   : > { %v5135_v8 = vadd.f32 %v4993_v51, %v4633_v46  ;;  %5899 = vmatmul.msk.f32.gmra.mxu2 %vm439_vm1, %v3742_v26 }
 0x34c   : > { %5949 = vmatmul.msk.f32.gmra.mxu3 %vm439_vm1, %v4244_v2 }
 0x34d   : > { %v5268_v44 = vadd.f32 %v6970_v4, %v5135_v8  ;;  %5999 = vmatmul.msk.f32.gmra.mxu0 %vm439_vm1, %v4746_v55 }
 0x34e   : > { %v3992_v58 = vpop.f32.mrf.mxu2 }
 0x34f   : > { %6020 = vst [vmem:[%s6977_s11 + $0x88] sm:$0xff] %v5268_v44  ;;  %v4494_v5 = vpop.f32.mrf.mxu3  ;;  %v3493_v34 = vpop.f32.mrf.mxu1 }
 0x350   : > { %v3631_v7 = vadd.f32 %v3493_v34, %v6841_v32 }
 0x352   : > { %5850 = vmatmul.msk.f32.gmra.mxu1 %vm439_vm1, %v7121_v56  ;;  %v4999_v48 = vpop.f32.mrf.mxu0  ;;  %v4748_v56 = vld [vmem:[#allocation2 + $0x4f0] sm:$0xff] }
 0x353   : > { %5900 = vmatmul.msk.f32.gmra.mxu2 %vm439_vm1, %v3743_v15 }
 0x354   : > { %5950 = vmatmul.msk.f32.gmra.mxu3 %vm439_vm1, %v4245_v39 }
 0x355   : > { %6000 = vmatmul.msk.f32.gmra.mxu0 %vm439_vm1, %v4747_v9 }
 0x356   : > { %v3995_v35 = vpop.f32.mrf.mxu2 }
 0x357   : > { %v4133_v19 = vadd.f32 %v3995_v35, %v3631_v7  ;;  %v4497_v27 = vpop.f32.mrf.mxu3  ;;  %v3496_v47 = vpop.f32.mrf.mxu1 }
 0x358   : > { %v3632_v60 = vadd.f32 %v3496_v47, %v6848_v61 }
 0x359   : > { %v4635_v31 = vadd.f32 %v4497_v27, %v4133_v19 }
 0x35a   : > { %5851 = vmatmul.msk.f32.gmra.mxu1 %vm439_vm1, %v4745_v25  ;;  %v5002_v41 = vpop.f32.mrf.mxu0 }
 0x35b   : > { %v5137_v45 = vadd.f32 %v4999_v48, %v4635_v31  ;;  %5901 = vmatmul.msk.f32.gmra.mxu2 %vm439_vm1, %v3744_v22 }
 0x35c   : > { %5951 = vmatmul.msk.f32.gmra.mxu3 %vm439_vm1, %v4246_v11 }
 0x35d   : > { %v5274_v32 = vadd.f32 %v6970_v4, %v5137_v45  ;;  %6001 = vmatmul.msk.f32.gmra.mxu0 %vm439_vm1, %v4748_v56 }
 0x35e   : > { %v3998_v42 = vpop.f32.mrf.mxu2 }
 0x35f   : > { %6021 = vst [vmem:[%s6977_s11 + $0x90] sm:$0xff] %v5274_v32  ;;  %v4134_v20 = vadd.f32 %v3998_v42, %v3632_v60  ;;  %v4500_v33 = vpop.f32.mrf.mxu3  ;;  %v3499_v40 = vpop.f32.mrf.mxu1 }
 0x361   : > { %v4636_v3 = vadd.f32 %v4500_v33, %v4134_v20 }
 0x362   : > { %5852 = vmatmul.msk.f32.gmra.mxu1 %vm439_vm1, %v4746_v55  ;;  %v5005_v43 = vpop.f32.mrf.mxu0  ;;  %v4249_v55 = vld [vmem:[#allocation2 + $0x358] sm:$0xff] }
 0x363   : > { %v5138_v51 = vadd.f32 %v5002_v41, %v4636_v3  ;;  %5902 = vmatmul.msk.f32.gmra.mxu2 %vm439_vm1, %v3745_v16 }
 0x364   : > { %5952 = vmatmul.msk.f32.gmra.mxu3 %vm439_vm1, %v4247_v0 }
 0x365   : > { %v5275_v61 = vadd.f32 %v6970_v4, %v5138_v51  ;;  %6002 = vmatmul.msk.f32.gmra.mxu0 %vm439_vm1, %v4749_v23 }
 0x366   : > { %v4001_v25 = vpop.f32.mrf.mxu2 }
 0x367   : > { %6022 = vst [vmem:[%s6977_s11 + $0x98] sm:$0xff] %v5275_v61  ;;  %v4503_v12 = vpop.f32.mrf.mxu3  ;;  %v3502_v49 = vpop.f32.mrf.mxu1 }
 0x368   : > { %v3634_v1 = vadd.f32 %v3502_v49, %v6859_v53 }
 0x36a   : > { %5853 = vmatmul.msk.f32.gmra.mxu1 %vm439_vm1, %v4747_v9  ;;  %v5008_v36 = vpop.f32.mrf.mxu0 }
 0x36b   : > { %5903 = vmatmul.msk.f32.gmra.mxu2 %vm439_vm1, %v3746_v29 }
 0x36c   : > { %5953 = vmatmul.msk.f32.gmra.mxu3 %vm439_vm1, %v4248_v38 }
 0x36d   : > { %6003 = vmatmul.msk.f32.gmra.mxu0 %vm439_vm1, %v4750_v14 }
 0x36e   : > { %v4004_v57 = vpop.f32.mrf.mxu2 }
 0x36f   : > { %v4136_v26 = vadd.f32 %v4004_v57, %v3634_v1  ;;  %v4506_v46 = vpop.f32.mrf.mxu3  ;;  %v3505_v2 = vpop.f32.mrf.mxu1 }
 0x370   : > { %v3635_v13 = vadd.f32 %v3505_v2, %v6866_v6 }
 0x371   : > { %v4638_v30 = vadd.f32 %v4506_v46, %v4136_v26 }
 0x372   : > { %v5011_v8 = vpop.f32.mrf.mxu0  ;;  %5854 = vmatmul.msk.f32.gmra.mxu1 %vm439_vm1, %v4748_v56 }
 0x373   : > { %v5140_v44 = vadd.f32 %v5008_v36, %v4638_v30  ;;  %5904 = vmatmul.msk.f32.gmra.mxu2 %vm439_vm1, %v3747_v59 }
 0x374   : > { %5954 = vmatmul.msk.f32.gmra.mxu3 %vm439_vm1, %v4249_v55 }
 0x375   : > { %v5281_v53 = vadd.f32 %v6970_v4, %v5140_v44  ;;  %6004 = vmatmul.msk.f32.gmra.mxu0 %vm439_vm1, %v4751_v52 }
 0x376   : > { %v4007_v58 = vpop.f32.mrf.mxu2 }
 0x377   : > { %6023 = vst [vmem:[%s6977_s11 + $0xa0] sm:$0xff] %v5281_v53  ;;  %v4137_v5 = vadd.f32 %v4007_v58, %v3635_v13  ;;  %v4509_v34 = vpop.f32.mrf.mxu3  ;;  %v3508_v15 = vpop.f32.mrf.mxu1 }
 0x379   : > { %v4639_v39 = vadd.f32 %v4509_v34, %v4137_v5 }
 0x37a   : > { %v5014_v18 = vpop.f32.mrf.mxu0 }
 0x37b   : > { %v5141_v48 = vadd.f32 %v5011_v8, %v4639_v39 }
 0x37d   : > { %v5282_v9 = vadd.f32 %v6970_v4, %v5141_v48  ;;  %v7185_v4 = vld [vmem:[%s7229_s4] ss:$0 sm:$0xff] }
 0x37e   : > { %v4010_v7 = vpop.f32.mrf.mxu2 }
 0x37f   : > { %6024 = vst [vmem:[%s6977_s11 + $0xa8] sm:$0xff] %v5282_v9  ;;  %v4512_v35 = vpop.f32.mrf.mxu3  ;;  %v3511_v19 = vpop.f32.mrf.mxu1 }
 0x380   : > { %v3637_v6 = vadd.f32 %v3511_v19, %v6877_v54 }
 0x382   : > { %v5017_v27 = vpop.f32.mrf.mxu0 }
 0x386   : > { %v4013_v47 = vpop.f32.mrf.mxu2 }
 0x387   : > { %v4139_v22 = vadd.f32 %v4013_v47, %v3637_v6  ;;  %v4515_v31 = vpop.f32.mrf.mxu3  ;;  %v3514_v11 = vpop.f32.mrf.mxu1 }
 0x388   : > { %v3638_v60 = vadd.f32 %v3514_v11, %v6884_v24 }
 0x389   : > { %v4641_v41 = vadd.f32 %v4515_v31, %v4139_v22 }
 0x38a   : > { %v5020_v56 = vpop.f32.mrf.mxu0 }
 0x38b   : > { %v5143_v45 = vadd.f32 %v5017_v27, %v4641_v41 }
 0x38d   : > { %v5288_v32 = vadd.f32 %v7185_v4, %v5143_v45 }
 0x38e   : > { %v4016_v42 = vpop.f32.mrf.mxu2 }
 0x38f   : > { %6025 = vst [vmem:[%s6977_s11 + $0xb0] sm:$0xff] %v5288_v32  ;;  %v4140_v54 = vadd.f32 %v4016_v42, %v3638_v60  ;;  %v4518_v20 = vpop.f32.mrf.mxu3  ;;  %v3517_v33 = vpop.f32.mrf.mxu1 }
 0x391   : > { %v4642_v40 = vadd.f32 %v4518_v20, %v4140_v54 }
 0x392   : > { %v5023_v16 = vpop.f32.mrf.mxu0 }
 0x393   : > { %v5144_v3 = vadd.f32 %v5020_v56, %v4642_v40 }
 0x395   : > { %v5289_v0 = vadd.f32 %v7185_v4, %v5144_v3 }
 0x396   : > { %v4019_v43 = vpop.f32.mrf.mxu2 }
 0x397   : > { %6026 = vst [vmem:[%s6977_s11 + $0xb8] sm:$0xff] %v5289_v0  ;;  %v4521_v23 = vpop.f32.mrf.mxu3  ;;  %v3520_v51 = vpop.f32.mrf.mxu1 }
 0x398   : > { %v3640_v25 = vadd.f32 %v3520_v51, %v6895_v63 }
 0x39a   : > { %v5026_v61 = vpop.f32.mrf.mxu0 }
 0x39e   : > { %v4022_v12 = vpop.f32.mrf.mxu2 }
 0x39f   : > { %v4142_v24 = vadd.f32 %v4022_v12, %v3640_v25  ;;  %v4524_v49 = vpop.f32.mrf.mxu3  ;;  %v3523_v29 = vpop.f32.mrf.mxu1 }
 0x3a0   : > { %v3641_v57 = vadd.f32 %v3523_v29, %v6902_v50 }
 0x3a1   : > { %v4644_v38 = vadd.f32 %v4524_v49, %v4142_v24 }
 0x3a2   : > { %v5029_v36 = vpop.f32.mrf.mxu0 }
 0x3a3   : > { %v5146_v14 = vadd.f32 %v5026_v61, %v4644_v38 }
 0x3a5   : > { %v5295_v1 = vadd.f32 %v7185_v4, %v5146_v14 }
 0x3a6   : > { %v4025_v26 = vpop.f32.mrf.mxu2 }
 0x3a7   : > { %6027 = vst [vmem:[%s6977_s11 + $0xc0] sm:$0xff] %v5295_v1  ;;  %v4143_v46 = vadd.f32 %v4025_v26, %v3641_v57  ;;  %v4527_v2 = vpop.f32.mrf.mxu3  ;;  %v3526_v59 = vpop.f32.mrf.mxu1 }
 0x3a9   : > { %v4645_v30 = vadd.f32 %v4527_v2, %v4143_v46 }
 0x3aa   : > { %v5032_v55 = vpop.f32.mrf.mxu0 }
 0x3ab   : > { %v5147_v63 = vadd.f32 %v5029_v36, %v4645_v30 }
 0x3ad   : > { %v5296_v8 = vadd.f32 %v7185_v4, %v5147_v63 }
 0x3ae   : > { %v4028_v52 = vpop.f32.mrf.mxu2 }
 0x3af   : > { %6028 = vst [vmem:[%s6977_s11 + $0xc8] sm:$0xff] %v5296_v8  ;;  %v4530_v44 = vpop.f32.mrf.mxu3  ;;  %v3529_v53 = vpop.f32.mrf.mxu1 }
 0x3b0   : > { %v3643_v58 = vadd.f32 %v3529_v53, %v6913_v17 }
 0x3b2   : > { %v5035_v13 = vpop.f32.mrf.mxu0 }
 0x3b6   : > { %v4031_v5 = vpop.f32.mrf.mxu2 }
 0x3b7   : > { %v4145_v50 = vadd.f32 %v4031_v5, %v3643_v58  ;;  %v4533_v34 = vpop.f32.mrf.mxu3  ;;  %v3532_v15 = vpop.f32.mrf.mxu1 }
 0x3b8   : > { %v3644_v7 = vadd.f32 %v3532_v15, %v6920_v62 }
 0x3b9   : > { %v4647_v39 = vadd.f32 %v4533_v34, %v4145_v50 }
 0x3ba   : > { %v5038_v18 = vpop.f32.mrf.mxu0 }
 0x3bb   : > { %v5149_v48 = vadd.f32 %v5035_v13, %v4647_v39 }
 0x3bd   : > { %v5302_v9 = vadd.f32 %v7185_v4, %v5149_v48 }
 0x3be   : > { %v4034_v35 = vpop.f32.mrf.mxu2 }
 0x3bf   : > { %6029 = vst [vmem:[%s6977_s11 + $0xd0] sm:$0xff] %v5302_v9  ;;  %v4146_v19 = vadd.f32 %v4034_v35, %v3644_v7  ;;  %v4536_v27 = vpop.f32.mrf.mxu3  ;;  %v3535_v6 = vpop.f32.mrf.mxu1 }
 0x3c1   : > { %v4648_v47 = vadd.f32 %v4536_v27, %v4146_v19 }
 0x3c2   : > { %v5041_v22 = vpop.f32.mrf.mxu0 }
 0x3c3   : > { %v5150_v17 = vadd.f32 %v5038_v18, %v4648_v47 }
 0x3c5   : > { %v5303_v31 = vadd.f32 %v7185_v4, %v5150_v17 }
 0x3c6   : > { %v4037_v11 = vpop.f32.mrf.mxu2 }
 0x3c7   : > { %6030 = vst [vmem:[%s6977_s11 + $0xd8] sm:$0xff] %v5303_v31  ;;  %v4539_v41 = vpop.f32.mrf.mxu3  ;;  %v3538_v56 = vpop.f32.mrf.mxu1 }
 0x3c8   : > { %v3646_v32 = vadd.f32 %v3538_v56, %v6931_v28 }
 0x3ca   : > { %v5044_v45 = vpop.f32.mrf.mxu0 }
 0x3ce   : > { %v4040_v60 = vpop.f32.mrf.mxu2 }
 0x3cf   : > { %v4148_v62 = vadd.f32 %v4040_v60, %v3646_v32  ;;  %v4542_v42 = vpop.f32.mrf.mxu3  ;;  %v3541_v54 = vpop.f32.mrf.mxu1 }
 0x3d0   : > { %v3647_v3 = vadd.f32 %v3541_v54, %v6938_v10 }
 0x3d1   : > { %v4650_v20 = vadd.f32 %v4542_v42, %v4148_v62 }
 0x3d2   : > { %v5047_v33 = vpop.f32.mrf.mxu0 }
 0x3d3   : > { %v5152_v40 = vadd.f32 %v5044_v45, %v4650_v20 }
 0x3d5   : > { %v5309_v16 = vadd.f32 %v7185_v4, %v5152_v40 }
 0x3d6   : > { %v4043_v0 = vpop.f32.mrf.mxu2 }
 0x3d7   : > { %6031 = vst [vmem:[%s6977_s11 + $0xe0] sm:$0xff] %v5309_v16  ;;  %v4149_v43 = vadd.f32 %v4043_v0, %v3647_v3  ;;  %v4545_v23 = vpop.f32.mrf.mxu3  ;;  %v3544_v51 = vpop.f32.mrf.mxu1 }
 0x3d9   : > { %v4651_v61 = vadd.f32 %v4545_v23, %v4149_v43 }
 0x3da   : > { %v5050_v25 = vpop.f32.mrf.mxu0 }
 0x3db   : > { %v5153_v28 = vadd.f32 %v5047_v33, %v4651_v61 }
 0x3dd   : > { %v5310_v12 = vadd.f32 %v7185_v4, %v5153_v28 }
 0x3de   : > { %v4046_v24 = vpop.f32.mrf.mxu2 }
 0x3df   : > { %6032 = vst [vmem:[%s6977_s11 + $0xe8] sm:$0xff] %v5310_v12  ;;  %v4548_v49 = vpop.f32.mrf.mxu3  ;;  %v3547_v29 = vpop.f32.mrf.mxu1 }
 0x3e0   : > { %v3649_v36 = vadd.f32 %v3547_v29, %v6949_v37 }
 0x3e2   : > { %v5053_v38 = vpop.f32.mrf.mxu0 }
 0x3e6   : > { %v4049_v14 = vpop.f32.mrf.mxu2 }
 0x3e7   : > { %v4151_v10 = vadd.f32 %v4049_v14, %v3649_v36  ;;  %v4551_v1 = vpop.f32.mrf.mxu3  ;;  %v3550_v57 = vpop.f32.mrf.mxu1 }
 0x3e8   : > { %v3650_v30 = vadd.f32 %v3550_v57, %v6956_v21 }
 0x3e9   : > { %v4653_v26 = vadd.f32 %v4551_v1, %v4151_v10 }
 0x3ea   : > { %v5056_v46 = vpop.f32.mrf.mxu0 }
 0x3eb   : > { %v5155_v2 = vadd.f32 %v5053_v38, %v4653_v26 }
 0x3ed   : > { %v5316_v59 = vadd.f32 %v7185_v4, %v5155_v2 }
 0x3ee   : > { %v4052_v55 = vpop.f32.mrf.mxu2 }
 0x3ef   : > { %6033 = vst [vmem:[%s6977_s11 + $0xf0] sm:$0xff] %v5316_v59  ;;  %v4152_v63 = vadd.f32 %v4052_v55, %v3650_v30  ;;  %v4554_v8 = vpop.f32.mrf.mxu3  ;;  %v3553_v52 = vpop.f32.mrf.mxu1 }
 0x3f1   : > { %v4654_v44 = vadd.f32 %v4554_v8, %v4152_v63 }
 0x3f2   : > { %v5059_v53 = vpop.f32.mrf.mxu0 }
 0x3f3   : > { %v5156_v37 = vadd.f32 %v5056_v46, %v4654_v44 }
 0x3f5   : > { %v5317_v13 = vadd.f32 %v7185_v4, %v5156_v37 }
 0x3f6   : > { %v4055_v58 = vpop.f32.mrf.mxu2 }
 0x3f7   : > { %6034 = vst [vmem:[%s6977_s11 + $0xf8] sm:$0xff] %v5317_v13  ;;  %v4557_v5 = vpop.f32.mrf.mxu3 }
 0x3f8 PF: > { %s15_s20 = sadd.s32 1, %s6097_s20   ;;  %s7231_s18 = smov %s6093_s19 }
 0x3f9   : > { %p12_p5 = scmp.ge.s32.totalorder %s15_s20, 4   ;;  %s7232_s19 = smov %s7234_s21 }
 0x3fb   :  { %14 = sbr.rel (!%p12_p5) target bundleno = 2 (0x2), region = 122 }

</bundles_post_ra>
